<compile_context>
chip_gen: v5e
topology: v5e:2x2
jax: 0.10.0
libtpu: 0.0.40
codegen_flags: <defaults>
</compile_context>

<pallas_src>
import jax
import jax.numpy as jnp
from jax.experimental import pallas as pl
from jax.experimental.pallas import tpu as pltpu

L = 60            # sequence length implied by fc1 = Linear(64 * 60, 128)
LP = 64           # L padded up to a multiple of 8 (sublane tiling)
C_IN = 12
C1 = 32
C2 = 64
HID = 128
OUT = 2
OUT_PAD = 128     # lane-dense final output tile (slice [:, :OUT] in the wrapper)


def conv_kernel(x_ref, w1_ref, b1_ref, w2_ref, b2_ref, h2_ref):
    # x_ref: (mblk, C_IN) rows ordered (batch, position), LP rows per element,
    # rows with l >= L are zero (they double as the conv zero padding).
    m = x_ref.shape[0]
    x = x_ref[...]

    # conv1: in-kernel im2col -> one fused K = 3*C_IN = 36 MXU matmul.
    x_prev = pltpu.roll(x, shift=1, axis=0)          # x[l-1] (wrap rows are zero pad)
    x_next = pltpu.roll(x, shift=m - 1, axis=0)      # x[l+1]
    xcol = jnp.concatenate([x_prev, x, x_next], axis=-1)      # (m, 36)
    h1 = jnp.dot(xcol, w1_ref[...], preferred_element_type=jnp.float32)
    h1 = jnp.maximum(h1 + b1_ref[...], 0.0)

    # zero the LP-padding rows (l >= L) so conv2's rolls see true zero padding
    lpos = jax.lax.broadcasted_iota(jnp.int32, h1.shape, 0) % LP
    h1 = jnp.where(lpos < L, h1, 0.0)

    # conv2: three position shifts fused into one K = 3*C1 = 96 matmul
    h1_prev = pltpu.roll(h1, shift=1, axis=0)        # h1[l-1]
    h1_next = pltpu.roll(h1, shift=m - 1, axis=0)    # h1[l+1]
    h1cat = jnp.concatenate([h1_prev, h1, h1_next], axis=-1)  # (m, 96)
    h2 = jnp.dot(h1cat, w2_ref[...], preferred_element_type=jnp.float32)
    h2_ref[...] = jnp.maximum(h2 + b2_ref[...], 0.0)


def fc_kernel(flat_ref, wf1_ref, bf1_ref, wf2_ref, bf2_ref, out_ref):
    a = jnp.dot(flat_ref[...], wf1_ref[...], preferred_element_type=jnp.float32)
    a = jnp.maximum(a + bf1_ref[...], 0.0)                      # ReLU(fc1)
    out_ref[...] = (jnp.dot(a, wf2_ref[...], preferred_element_type=jnp.float32)
                    + bf2_ref[...])                             # fc2 (padded lanes)


def _prep_params(p):
    # conv1 weight -> (3*C_IN, C1): row k*C_IN + ci pairs with im2col column order
    # [x_prev | x | x_next]  (tap k=0 multiplies x[l-1]).
    w1k = jnp.transpose(p["w1"], (2, 1, 0)).reshape(3 * C_IN, C1)
    b1k = p["b1"].reshape(1, C1)
    # conv2 weight -> (3*C1, C2): row k*C1 + ci pairs with [h1_prev | h1 | h1_next].
    w2k = jnp.transpose(p["w2"], (2, 1, 0)).reshape(3 * C1, C2)
    b2k = p["b2"].reshape(1, C2)
    # fc1: fold the torch flatten permutation (c*L + l) into the weight rows so
    # the kernels consume h2 in its natural (l, c) order; zero rows for LP padding.
    wl = jnp.transpose(p["wf1"].reshape(HID, C2, L), (2, 1, 0))    # (L, C2, HID)
    wl = jnp.pad(wl, ((0, LP - L), (0, 0), (0, 0)))                # (LP, C2, HID)
    wf1k = wl.reshape(LP * C2, HID)
    bf1k = p["bf1"].reshape(1, HID)
    # fc2: pad the 2 output lanes to 128 for an unmasked final store
    wf2k = jnp.pad(p["wf2"].T, ((0, 0), (0, OUT_PAD - OUT)))
    bf2k = jnp.pad(p["bf2"].reshape(1, OUT), ((0, 0), (0, OUT_PAD - OUT)))
    return w1k, b1k, w2k, b2k, wf1k, bf1k, wf2k, bf2k


def _pick_tile(total, cap):
    """Largest multiple-of-8 tile <= cap that divides `total`, preferring >= 2
    grid steps so v7x's two TensorCores both get work (no-op on v5e/v6e)."""
    cands = [c for c in range(min(cap, total), 7, -8) if total % c == 0]
    for c in cands:
        if total // c >= 2:
            return c
    return cands[0]


def _const_spec(shape):
    """BlockSpec for a weight/bias whose block index never changes: single-buffer."""
    nd = len(shape)
    return pl.BlockSpec(shape, lambda i: (0,) * nd, pipeline_mode=pl.Buffered(1))


def cnn_forward(x, params):
    """x: (B, L, C_IN) float32, same as the torch module's input (pre-permute)."""
    B = x.shape[0]
    w1k, b1k, w2k, b2k, wf1k, bf1k, wf2k, bf2k = _prep_params(params)

    # --- batch padding and per-stage tile choice (conv and fc decoupled) ---
    bpad = -(-B // 8) * 8
    if bpad > 64:
        bpad = -(-bpad // 64) * 64           # keep big batches tileable at 64/128/256
    conv_bblk = _pick_tile(bpad, 64)         # conv working set must fit v7x 64 MiB VMEM
    fc_bblk = _pick_tile(bpad, 256)          # fc1 wants a much larger M tile

    # batch pad + zero-pad L -> LP: the zero rows double as the conv zero padding
    # consumed by the in-kernel roll-based im2col.
    xb = jnp.pad(x, ((0, bpad - B), (0, LP - L), (0, 0)))          # (bpad, LP, C_IN)
    xrows = xb.reshape(bpad * LP, C_IN)

    mblk = conv_bblk * LP
    h2 = pl.pallas_call(
        conv_kernel,
        out_shape=jax.ShapeDtypeStruct((bpad * LP, C2), jnp.float32),
        grid=(bpad // conv_bblk,),
        in_specs=[
            pl.BlockSpec((mblk, C_IN), lambda i: (i, 0)),
            _const_spec((3 * C_IN, C1)),
            _const_spec((1, C1)),
            _const_spec((3 * C1, C2)),
            _const_spec((1, C2)),
        ],
        out_specs=pl.BlockSpec((mblk, C2), lambda i: (i, 0)),
        compiler_params=pltpu.CompilerParams(
            dimension_semantics=("parallel",),
            vmem_limit_bytes=48 * 1024 * 1024),   # past v5e's 16 MiB scoped default
    )(xrows, w1k, b1k, w2k, b2k)

    # torch's view(B, -1) permutation is already folded into wf1k's row order ->
    # plain row-major reshape, no transpose.
    flat = h2.reshape(bpad, LP * C2)

    out_pad = pl.pallas_call(
        fc_kernel,
        out_shape=jax.ShapeDtypeStruct((bpad, OUT_PAD), jnp.float32),
        grid=(bpad // fc_bblk,),
        in_specs=[
            pl.BlockSpec((fc_bblk, LP * C2), lambda i: (i, 0)),
            _const_spec((LP * C2, HID)),
            _const_spec((1, HID)),
            _const_spec((HID, OUT_PAD)),
            _const_spec((1, OUT_PAD)),
        ],
        out_specs=pl.BlockSpec((fc_bblk, OUT_PAD), lambda i: (i, 0)),
        compiler_params=pltpu.CompilerParams(
            dimension_semantics=("parallel",),
            vmem_limit_bytes=32 * 1024 * 1024),
    )(flat, wf1k, bf1k, wf2k, bf2k)

    return out_pad[:B, :OUT]


def torch_reference(x, p):
    """Pure-JAX mirror of the PyTorch forward (NCL conv), for validation."""
    xc = jnp.transpose(x, (0, 2, 1))                       # permute(0, 2, 1)
    dn = ("NCH", "OIH", "NCH")
    h = jax.lax.conv_general_dilated(xc, p["w1"], (1,), [(1, 1)], dimension_numbers=dn)
    h = jax.nn.relu(h + p["b1"][None, :, None])
    h = jax.lax.conv_general_dilated(h, p["w2"], (1,), [(1, 1)], dimension_numbers=dn)
    h = jax.nn.relu(h + p["b2"][None, :, None])
    flat = h.reshape(h.shape[0], -1)
    a = jax.nn.relu(flat @ p["wf1"].T + p["bf1"])
    return a @ p["wf2"].T + p["bf2"]


if __name__ == "__main__":
    key = jax.random.PRNGKey(0)
    ks = jax.random.split(key, 9)

    def u(k, shape, fan_in):
        bound = 1.0 / (fan_in ** 0.5)
        return jax.random.uniform(k, shape, jnp.float32, -bound, bound)

    # deterministic parameters in PyTorch layouts
    params = {
        "w1": u(ks[0], (C1, C_IN, 3), C_IN * 3),   # Conv1d(12, 32, 3)
        "b1": u(ks[1], (C1,), C_IN * 3),
        "w2": u(ks[2], (C2, C1, 3), C1 * 3),       # Conv1d(32, 64, 3)
        "b2": u(ks[3], (C2,), C1 * 3),
        "wf1": u(ks[4], (HID, C2 * L), C2 * L),    # Linear(3840, 128)
        "bf1": u(ks[5], (HID,), C2 * L),
        "wf2": u(ks[6], (OUT, HID), HID),          # Linear(128, 2)
        "bf2": u(ks[7], (OUT,), HID),
    }
    x = jax.random.normal(ks[8], (2, L, C_IN), jnp.float32)   # (batch, 60, 12)

    out = jax.block_until_ready(jax.jit(cnn_forward)(x, params))
    ref = jax.block_until_ready(torch_reference(x, params))

    assert out.shape == (2, OUT)
    if not jnp.allclose(out, ref, rtol=1e-3, atol=1e-3):
        raise AssertionError(
            f"Pallas/reference mismatch, max abs diff = {jnp.max(jnp.abs(out - ref))}")
    print("KERNEL_OK")
</pallas_src>

<mosaic_0001>
module attributes {stable_mosaic.version = 11 : i64} {
  func.func @conv_kernel(%arg0: i32, %arg1: memref<512x12xf32, #tpu.memory_space<vmem>>, %arg2: memref<36x32xf32, #tpu.memory_space<vmem>>, %arg3: memref<1x32xf32, #tpu.memory_space<vmem>>, %arg4: memref<96x64xf32, #tpu.memory_space<vmem>>, %arg5: memref<1x64xf32, #tpu.memory_space<vmem>>, %arg6: memref<512x64xf32, #tpu.memory_space<vmem>>) attributes {dimension_semantics = [#tpu.dimension_semantics<parallel>], iteration_bounds = array<i64: 1>, scalar_prefetch = 0 : i64, scratch_operands = 0 : i64, tpu.core_type = #tpu.core_type<tc>, window_params = [{transform_indices = @transform_0, window_bounds = array<i64: 512, 12>}, {pipeline_mode = #tpu.pipeline_mode<synchronous>, transform_indices = @transform_1, window_bounds = array<i64: 36, 32>}, {pipeline_mode = #tpu.pipeline_mode<synchronous>, transform_indices = @transform_2, window_bounds = array<i64: 1, 32>}, {pipeline_mode = #tpu.pipeline_mode<synchronous>, transform_indices = @transform_3, window_bounds = array<i64: 96, 64>}, {pipeline_mode = #tpu.pipeline_mode<synchronous>, transform_indices = @transform_4, window_bounds = array<i64: 1, 64>}, {transform_indices = @transform_5, window_bounds = array<i64: 512, 64>}]} {
    %c0 = arith.constant 0 : index
    %c0_0 = arith.constant 0 : index
    %0 = vector.load %arg1[%c0, %c0_0] : memref<512x12xf32, #tpu.memory_space<vmem>>, vector<512x12xf32>
    %c1_i32 = arith.constant 1 : i32
    %1 = tpu.dynamic_rotate %0 by %c1_i32 dim 0 : vector<512x12xf32>, i32 -> vector<512x12xf32>
    %c511_i32 = arith.constant 511 : i32
    %2 = tpu.dynamic_rotate %0 by %c511_i32 dim 0 : vector<512x12xf32>, i32 -> vector<512x12xf32>
    %3 = tpu.concatenate %1, %0, %2 in 1 : vector<512x12xf32>, vector<512x12xf32>, vector<512x12xf32> -> vector<512x36xf32>
    %c0_1 = arith.constant 0 : index
    %c0_2 = arith.constant 0 : index
    %4 = vector.load %arg2[%c0_1, %c0_2] : memref<36x32xf32, #tpu.memory_space<vmem>>, vector<36x32xf32>
    %cst = arith.constant dense<0.000000e+00> : vector<512x32xf32>
    %5 = tpu.matmul %3, %4, %cst {dimension_numbers = #tpu.dot_dimension_numbers<[1], [0], [0], [1], [0, 0, 1, 1], [], []>} : vector<512x36xf32>, vector<36x32xf32>, vector<512x32xf32> -> vector<512x32xf32>
    %c0_3 = arith.constant 0 : index
    %c0_4 = arith.constant 0 : index
    %6 = vector.load %arg3[%c0_3, %c0_4] : memref<1x32xf32, #tpu.memory_space<vmem>>, vector<1x32xf32>
    %7 = vector.broadcast %6 : vector<1x32xf32> to vector<512x32xf32>
    %8 = arith.addf %5, %7 : vector<512x32xf32>
    %cst_5 = arith.constant 0.000000e+00 : f32
    %9 = vector.broadcast %cst_5 : f32 to vector<512x32xf32>
    %10 = arith.maximumf %8, %9 : vector<512x32xf32>
    %11 = tpu.iota {dimensions = array<i32: 0>} : vector<512x32xi32>
    %c64_i32 = arith.constant 64 : i32
    %c0_i32 = arith.constant 0 : i32
    %12 = arith.cmpi eq, %c64_i32, %c0_i32 : i32
    %c1_i32_6 = arith.constant 1 : i32
    %13 = arith.select %12, %c1_i32_6, %c64_i32 : i32
    %14 = vector.broadcast %13 : i32 to vector<512x32xi32>
    %15 = arith.remsi %11, %14 : vector<512x32xi32>
    %c0_i32_7 = arith.constant 0 : i32
    %16 = vector.broadcast %c0_i32_7 : i32 to vector<512x32xi32>
    %17 = arith.cmpi ne, %15, %16 : vector<512x32xi32>
    %c0_i32_8 = arith.constant 0 : i32
    %18 = vector.broadcast %c0_i32_8 : i32 to vector<512x32xi32>
    %19 = arith.cmpi slt, %15, %18 : vector<512x32xi32>
    %c0_i32_9 = arith.constant 0 : i32
    %20 = arith.cmpi slt, %13, %c0_i32_9 : i32
    %21 = vector.broadcast %20 : i1 to vector<512x32xi1>
    %22 = vector.broadcast %21 : vector<512x32xi1> to vector<512x32xi1>
    %23 = arith.xori %19, %22 : vector<512x32xi1>
    %24 = arith.andi %23, %17 : vector<512x32xi1>
    %25 = vector.broadcast %13 : i32 to vector<512x32xi32>
    %26 = arith.addi %15, %25 : vector<512x32xi32>
    %27 = arith.select %24, %26, %15 : vector<512x32xi1>, vector<512x32xi32>
    %c60_i32 = arith.constant 60 : i32
    %28 = vector.broadcast %c60_i32 : i32 to vector<512x32xi32>
    %29 = arith.cmpi slt, %27, %28 : vector<512x32xi32>
    %cst_10 = arith.constant 0.000000e+00 : f32
    %30 = vector.broadcast %cst_10 : f32 to vector<512x32xf32>
    %31 = arith.select %29, %10, %30 : vector<512x32xi1>, vector<512x32xf32>
    %c1_i32_11 = arith.constant 1 : i32
    %32 = tpu.dynamic_rotate %31 by %c1_i32_11 dim 0 : vector<512x32xf32>, i32 -> vector<512x32xf32>
    %c511_i32_12 = arith.constant 511 : i32
    %33 = tpu.dynamic_rotate %31 by %c511_i32_12 dim 0 : vector<512x32xf32>, i32 -> vector<512x32xf32>
    %34 = tpu.concatenate %32, %31, %33 in 1 : vector<512x32xf32>, vector<512x32xf32>, vector<512x32xf32> -> vector<512x96xf32>
    %c0_13 = arith.constant 0 : index
    %c0_14 = arith.constant 0 : index
    %35 = vector.load %arg4[%c0_13, %c0_14] : memref<96x64xf32, #tpu.memory_space<vmem>>, vector<96x64xf32>
    %cst_15 = arith.constant dense<0.000000e+00> : vector<512x64xf32>
    %36 = tpu.matmul %34, %35, %cst_15 {dimension_numbers = #tpu.dot_dimension_numbers<[1], [0], [0], [1], [0, 0, 1, 1], [], []>} : vector<512x96xf32>, vector<96x64xf32>, vector<512x64xf32> -> vector<512x64xf32>
    %c0_16 = arith.constant 0 : index
    %c0_17 = arith.constant 0 : index
    %37 = vector.load %arg5[%c0_16, %c0_17] : memref<1x64xf32, #tpu.memory_space<vmem>>, vector<1x64xf32>
    %38 = vector.broadcast %37 : vector<1x64xf32> to vector<512x64xf32>
    %39 = arith.addf %36, %38 : vector<512x64xf32>
    %cst_18 = arith.constant 0.000000e+00 : f32
    %40 = vector.broadcast %cst_18 : f32 to vector<512x64xf32>
    %41 = arith.maximumf %39, %40 : vector<512x64xf32>
    %c0_19 = arith.constant 0 : index
    %c0_20 = arith.constant 0 : index
    %42 = vector.load %arg6[%c0_19, %c0_20] : memref<512x64xf32, #tpu.memory_space<vmem>>, vector<512x64xf32>
    tpu.vector_store %arg6[%c0_19, %c0_20], %41 {strides = array<i32>} : memref<512x64xf32, #tpu.memory_space<vmem>>, vector<512x64xf32>,
    return
  }
  func.func @transform_0(%arg0: i32) -> (i32, i32) {
    %c0_i32 = arith.constant 0 : i32
    %c0_i32_0 = arith.constant 0 : i32
    return %arg0, %c0_i32 : i32, i32
  }
  func.func @transform_1(%arg0: i32) -> (i32, i32) {
    %c0_i32 = arith.constant 0 : i32
    %c0_i32_0 = arith.constant 0 : i32
    %c0_i32_1 = arith.constant 0 : i32
    return %c0_i32, %c0_i32_0 : i32, i32
  }
  func.func @transform_2(%arg0: i32) -> (i32, i32) {
    %c0_i32 = arith.constant 0 : i32
    %c0_i32_0 = arith.constant 0 : i32
    %c0_i32_1 = arith.constant 0 : i32
    return %c0_i32, %c0_i32_0 : i32, i32
  }
  func.func @transform_3(%arg0: i32) -> (i32, i32) {
    %c0_i32 = arith.constant 0 : i32
    %c0_i32_0 = arith.constant 0 : i32
    %c0_i32_1 = arith.constant 0 : i32
    return %c0_i32, %c0_i32_0 : i32, i32
  }
  func.func @transform_4(%arg0: i32) -> (i32, i32) {
    %c0_i32 = arith.constant 0 : i32
    %c0_i32_0 = arith.constant 0 : i32
    %c0_i32_1 = arith.constant 0 : i32
    return %c0_i32, %c0_i32_0 : i32, i32
  }
  func.func @transform_5(%arg0: i32) -> (i32, i32) {
    %c0_i32 = arith.constant 0 : i32
    %c0_i32_0 = arith.constant 0 : i32
    return %arg0, %c0_i32 : i32, i32
  }
}

module attributes {stable_mosaic.version = 11 : i64} {
  func.func @fc_kernel(%arg0: i32, %arg1: memref<8x4096xf32, #tpu.memory_space<vmem>>, %arg2: memref<4096x128xf32, #tpu.memory_space<vmem>>, %arg3: memref<1x128xf32, #tpu.memory_space<vmem>>, %arg4: memref<128x128xf32, #tpu.memory_space<vmem>>, %arg5: memref<1x128xf32, #tpu.memory_space<vmem>>, %arg6: memref<8x128xf32, #tpu.memory_space<vmem>>) attributes {dimension_semantics = [#tpu.dimension_semantics<parallel>], iteration_bounds = array<i64: 1>, scalar_prefetch = 0 : i64, scratch_operands = 0 : i64, tpu.core_type = #tpu.core_type<tc>, window_params = [{transform_indices = @transform_0, window_bounds = array<i64: 8, 4096>}, {pipeline_mode = #tpu.pipeline_mode<synchronous>, transform_indices = @transform_1, window_bounds = array<i64: 4096, 128>}, {pipeline_mode = #tpu.pipeline_mode<synchronous>, transform_indices = @transform_2, window_bounds = array<i64: 1, 128>}, {pipeline_mode = #tpu.pipeline_mode<synchronous>, transform_indices = @transform_3, window_bounds = array<i64: 128, 128>}, {pipeline_mode = #tpu.pipeline_mode<synchronous>, transform_indices = @transform_4, window_bounds = array<i64: 1, 128>}, {transform_indices = @transform_5, window_bounds = array<i64: 8, 128>}]} {
    %c0 = arith.constant 0 : index
    %c0_0 = arith.constant 0 : index
    %0 = vector.load %arg1[%c0, %c0_0] : memref<8x4096xf32, #tpu.memory_space<vmem>>, vector<8x4096xf32>
    %c0_1 = arith.constant 0 : index
    %c0_2 = arith.constant 0 : index
    %1 = vector.load %arg2[%c0_1, %c0_2] : memref<4096x128xf32, #tpu.memory_space<vmem>>, vector<4096x128xf32>
    %cst = arith.constant dense<0.000000e+00> : vector<8x128xf32>
    %2 = tpu.matmul %0, %1, %cst {dimension_numbers = #tpu.dot_dimension_numbers<[1], [0], [0], [1], [0, 0, 1, 1], [], []>} : vector<8x4096xf32>, vector<4096x128xf32>, vector<8x128xf32> -> vector<8x128xf32>
    %c0_3 = arith.constant 0 : index
    %c0_4 = arith.constant 0 : index
    %3 = vector.load %arg3[%c0_3, %c0_4] : memref<1x128xf32, #tpu.memory_space<vmem>>, vector<1x128xf32>
    %4 = vector.broadcast %3 : vector<1x128xf32> to vector<8x128xf32>
    %5 = arith.addf %2, %4 : vector<8x128xf32>
    %cst_5 = arith.constant 0.000000e+00 : f32
    %6 = vector.broadcast %cst_5 : f32 to vector<8x128xf32>
    %7 = arith.maximumf %5, %6 : vector<8x128xf32>
    %c0_6 = arith.constant 0 : index
    %c0_7 = arith.constant 0 : index
    %8 = vector.load %arg4[%c0_6, %c0_7] : memref<128x128xf32, #tpu.memory_space<vmem>>, vector<128x128xf32>
    %cst_8 = arith.constant dense<0.000000e+00> : vector<8x128xf32>
    %9 = tpu.matmul %7, %8, %cst_8 {dimension_numbers = #tpu.dot_dimension_numbers<[1], [0], [0], [1], [0, 0, 1, 1], [], []>} : vector<8x128xf32>, vector<128x128xf32>, vector<8x128xf32> -> vector<8x128xf32>
    %c0_9 = arith.constant 0 : index
    %c0_10 = arith.constant 0 : index
    %10 = vector.load %arg5[%c0_9, %c0_10] : memref<1x128xf32, #tpu.memory_space<vmem>>, vector<1x128xf32>
    %11 = vector.broadcast %10 : vector<1x128xf32> to vector<8x128xf32>
    %12 = arith.addf %9, %11 : vector<8x128xf32>
    %c0_11 = arith.constant 0 : index
    %c0_12 = arith.constant 0 : index
    %13 = vector.load %arg6[%c0_11, %c0_12] : memref<8x128xf32, #tpu.memory_space<vmem>>, vector<8x128xf32>
    tpu.vector_store %arg6[%c0_11, %c0_12], %12 {strides = array<i32>} : memref<8x128xf32, #tpu.memory_space<vmem>>, vector<8x128xf32>,
    return
  }
  func.func @transform_0(%arg0: i32) -> (i32, i32) {
    %c0_i32 = arith.constant 0 : i32
    %c0_i32_0 = arith.constant 0 : i32
    return %arg0, %c0_i32 : i32, i32
  }
  func.func @transform_1(%arg0: i32) -> (i32, i32) {
    %c0_i32 = arith.constant 0 : i32
    %c0_i32_0 = arith.constant 0 : i32
    %c0_i32_1 = arith.constant 0 : i32
    return %c0_i32, %c0_i32_0 : i32, i32
  }
  func.func @transform_2(%arg0: i32) -> (i32, i32) {
    %c0_i32 = arith.constant 0 : i32
    %c0_i32_0 = arith.constant 0 : i32
    %c0_i32_1 = arith.constant 0 : i32
    return %c0_i32, %c0_i32_0 : i32, i32
  }
  func.func @transform_3(%arg0: i32) -> (i32, i32) {
    %c0_i32 = arith.constant 0 : i32
    %c0_i32_0 = arith.constant 0 : i32
    %c0_i32_1 = arith.constant 0 : i32
    return %c0_i32, %c0_i32_0 : i32, i32
  }
  func.func @transform_4(%arg0: i32) -> (i32, i32) {
    %c0_i32 = arith.constant 0 : i32
    %c0_i32_0 = arith.constant 0 : i32
    %c0_i32_1 = arith.constant 0 : i32
    return %c0_i32, %c0_i32_0 : i32, i32
  }
  func.func @transform_5(%arg0: i32) -> (i32, i32) {
    %c0_i32 = arith.constant 0 : i32
    %c0_i32_0 = arith.constant 0 : i32
    return %arg0, %c0_i32 : i32, i32
  }
}

</mosaic_0001>

<bundles_post_ra>
// kernel: cnn_forward.3
= control target key start
LH: loop header
LB: loop body
LE: loop exit
PB: predicated region body
PF: predicated region fallthrough
CT: control target
= control target key end

     0   :  { %s2975_s1 = inlined_call_operand.vmem [shape: f32[4096,128], index: 1, kind: input, shape index: {}]   ;;  %s2976_s0 = inlined_call_operand.vmem [shape: f32[8,4096], index: 0, kind: input, shape index: {}]   ;;  %s2977_s2 = inlined_call_operand.vmem [shape: f32[1,128], index: 2, kind: input, shape index: {}]   ;;  %s2978_s4 = inlined_call_operand.vmem [shape: f32[1,128], index: 4, kind: input, shape index: {}]   ;;  %s2979_s3 = inlined_call_operand.vmem [shape: f32[128,128], index: 3, kind: input, shape index: {}]   ;;  %s2980_s5 = inlined_call_operand.vmem [shape: f32[8,128], index: 5, kind: output, shape index: {}]  }
   0x1   :  { %v67_v0 = vld [vmem:[%s2975_s1 + $0x78] sm:$0xff]  ;;  %v66_v2 = vld [vmem:[%s2975_s1 + $0x70] sm:$0xff]  ;;  %v65_v6 = vld [vmem:[%s2975_s1 + $0x68] sm:$0xff] }
   0x2   :  { %v99_v1 = vld [vmem:[%s2975_s1 + $0x178] sm:$0xff]  ;;  %568 = vmatpush.msra.mxu0 %v67_v0  ;;  %v98_v4 = vld [vmem:[%s2975_s1 + $0x170] sm:$0xff]  ;;  %v97_v8 = vld [vmem:[%s2975_s1 + $0x168] sm:$0xff] }
   0x3   :  { %608 = vmatpush.msra.mxu2 %v99_v1  ;;  %v83_v3 = vld [vmem:[%s2975_s1 + $0xf8] sm:$0xff]  ;;  %v82_v7 = vld [vmem:[%s2975_s1 + $0xf0] sm:$0xff]  ;;  %v81_v10 = vld [vmem:[%s2975_s1 + $0xe8] sm:$0xff] }
   0x4   :  { %v115_v5 = vld [vmem:[%s2975_s1 + $0x1f8] sm:$0xff]  ;;  %588 = vmatpush.msra.mxu1 %v83_v3  ;;  %569 = vmatpush.msra.mxu0 %v66_v2  ;;  %v114_v9 = vld [vmem:[%s2975_s1 + $0x1f0] sm:$0xff]  ;;  %v64_v11 = vld [vmem:[%s2975_s1 + $0x60] sm:$0xff] }
   0x5   :  { %628 = vmatpush.msra.mxu3 %v115_v5  ;;  %609 = vmatpush.msra.mxu2 %v98_v4  ;;  %v96_v12 = vld [vmem:[%s2975_s1 + $0x160] sm:$0xff]  ;;  %v113_v13 = vld [vmem:[%s2975_s1 + $0x1e8] sm:$0xff]  ;;  %v63_v16 = vld [vmem:[%s2975_s1 + $0x58] sm:$0xff] }
   0x6   :  { %589 = vmatpush.msra.mxu1 %v82_v7  ;;  %570 = vmatpush.msra.mxu0 %v65_v6  ;;  %v80_v14 = vld [vmem:[%s2975_s1 + $0xe0] sm:$0xff]  ;;  %v95_v17 = vld [vmem:[%s2975_s1 + $0x158] sm:$0xff]  ;;  %v62_v20 = vld [vmem:[%s2975_s1 + $0x50] sm:$0xff] }
   0x7   :  { %629 = vmatpush.msra.mxu3 %v114_v9  ;;  %610 = vmatpush.msra.mxu2 %v97_v8  ;;  %v112_v15 = vld [vmem:[%s2975_s1 + $0x1e0] sm:$0xff]  ;;  %v79_v18 = vld [vmem:[%s2975_s1 + $0xd8] sm:$0xff]  ;;  %v94_v21 = vld [vmem:[%s2975_s1 + $0x150] sm:$0xff] }
   0x8   :  { %590 = vmatpush.msra.mxu1 %v81_v10  ;;  %571 = vmatpush.msra.mxu0 %v64_v11  ;;  %v111_v19 = vld [vmem:[%s2975_s1 + $0x1d8] sm:$0xff]  ;;  %v78_v22 = vld [vmem:[%s2975_s1 + $0xd0] sm:$0xff]  ;;  %v61_v24 = vld [vmem:[%s2975_s1 + $0x48] sm:$0xff] }
   0x9   :  { %630 = vmatpush.msra.mxu3 %v113_v13  ;;  %611 = vmatpush.msra.mxu2 %v96_v12  ;;  %v110_v23 = vld [vmem:[%s2975_s1 + $0x1d0] sm:$0xff]  ;;  %v93_v25 = vld [vmem:[%s2975_s1 + $0x148] sm:$0xff]  ;;  %v60_v28 = vld [vmem:[%s2975_s1 + $0x40] sm:$0xff] }
   0xa   :  { %591 = vmatpush.msra.mxu1 %v80_v14  ;;  %572 = vmatpush.msra.mxu0 %v63_v16  ;;  %v77_v26 = vld [vmem:[%s2975_s1 + $0xc8] sm:$0xff]  ;;  %v92_v29 = vld [vmem:[%s2975_s1 + $0x140] sm:$0xff]  ;;  %v59_v32 = vld [vmem:[%s2975_s1 + $0x38] sm:$0xff] }
   0xb   :  { %631 = vmatpush.msra.mxu3 %v112_v15  ;;  %612 = vmatpush.msra.mxu2 %v95_v17  ;;  %v109_v27 = vld [vmem:[%s2975_s1 + $0x1c8] sm:$0xff]  ;;  %v76_v30 = vld [vmem:[%s2975_s1 + $0xc0] sm:$0xff]  ;;  %v91_v33 = vld [vmem:[%s2975_s1 + $0x138] sm:$0xff] }
   0xc   :  { %592 = vmatpush.msra.mxu1 %v79_v18  ;;  %573 = vmatpush.msra.mxu0 %v62_v20  ;;  %v108_v31 = vld [vmem:[%s2975_s1 + $0x1c0] sm:$0xff]  ;;  %v75_v34 = vld [vmem:[%s2975_s1 + $0xb8] sm:$0xff]  ;;  %v58_v36 = vld [vmem:[%s2975_s1 + $0x30] sm:$0xff] }
   0xd   :  { %632 = vmatpush.msra.mxu3 %v111_v19  ;;  %613 = vmatpush.msra.mxu2 %v94_v21  ;;  %v107_v35 = vld [vmem:[%s2975_s1 + $0x1b8] sm:$0xff]  ;;  %v90_v37 = vld [vmem:[%s2975_s1 + $0x130] sm:$0xff]  ;;  %v57_v40 = vld [vmem:[%s2975_s1 + $0x28] sm:$0xff] }
   0xe   :  { %593 = vmatpush.msra.mxu1 %v78_v22  ;;  %574 = vmatpush.msra.mxu0 %v61_v24  ;;  %v74_v38 = vld [vmem:[%s2975_s1 + $0xb0] sm:$0xff]  ;;  %v89_v41 = vld [vmem:[%s2975_s1 + $0x128] sm:$0xff]  ;;  %v56_v44 = vld [vmem:[%s2975_s1 + $0x20] sm:$0xff] }
   0xf   :  { %633 = vmatpush.msra.mxu3 %v110_v23  ;;  %614 = vmatpush.msra.mxu2 %v93_v25  ;;  %v106_v39 = vld [vmem:[%s2975_s1 + $0x1b0] sm:$0xff]  ;;  %v73_v42 = vld [vmem:[%s2975_s1 + $0xa8] sm:$0xff]  ;;  %v88_v45 = vld [vmem:[%s2975_s1 + $0x120] sm:$0xff] }
  0x10   :  { %594 = vmatpush.msra.mxu1 %v77_v26  ;;  %575 = vmatpush.msra.mxu0 %v60_v28  ;;  %v105_v43 = vld [vmem:[%s2975_s1 + $0x1a8] sm:$0xff]  ;;  %v72_v46 = vld [vmem:[%s2975_s1 + $0xa0] sm:$0xff]  ;;  %v55_v48 = vld [vmem:[%s2975_s1 + $0x18] sm:$0xff] }
  0x11   :  { %634 = vmatpush.msra.mxu3 %v109_v27  ;;  %615 = vmatpush.msra.mxu2 %v92_v29  ;;  %v104_v47 = vld [vmem:[%s2975_s1 + $0x1a0] sm:$0xff]  ;;  %v87_v49 = vld [vmem:[%s2975_s1 + $0x118] sm:$0xff]  ;;  %v54_v52 = vld [vmem:[%s2975_s1 + $0x10] sm:$0xff] }
  0x12   :  { %595 = vmatpush.msra.mxu1 %v76_v30  ;;  %576 = vmatpush.msra.mxu0 %v59_v32  ;;  %v71_v50 = vld [vmem:[%s2975_s1 + $0x98] sm:$0xff]  ;;  %v86_v53 = vld [vmem:[%s2975_s1 + $0x110] sm:$0xff]  ;;  %v53_v56 = vld [vmem:[%s2975_s1 + $0x8] sm:$0xff] }
  0x13   :  { %635 = vmatpush.msra.mxu3 %v108_v31  ;;  %616 = vmatpush.msra.mxu2 %v91_v33  ;;  %v103_v51 = vld [vmem:[%s2975_s1 + $0x198] sm:$0xff]  ;;  %v70_v54 = vld [vmem:[%s2975_s1 + $0x90] sm:$0xff]  ;;  %v85_v57 = vld [vmem:[%s2975_s1 + $0x108] sm:$0xff] }
  0x14   :  { %596 = vmatpush.msra.mxu1 %v75_v34  ;;  %577 = vmatpush.msra.mxu0 %v58_v36  ;;  %v102_v55 = vld [vmem:[%s2975_s1 + $0x190] sm:$0xff]  ;;  %v69_v58 = vld [vmem:[%s2975_s1 + $0x88] sm:$0xff]  ;;  %v52_v60 = vld [vmem:[%s2975_s1] sm:$0xff] }
  0x15   :  { %636 = vmatpush.msra.mxu3 %v107_v35  ;;  %617 = vmatpush.msra.mxu2 %v90_v37  ;;  %v101_v59 = vld [vmem:[%s2975_s1 + $0x188] sm:$0xff]  ;;  %v84_v61 = vld [vmem:[%s2975_s1 + $0x100] sm:$0xff]  ;;  %v131_v62 = vld [vmem:[%s2975_s1 + $0x278] sm:$0xff] }
  0x16   :  { %597 = vmatpush.msra.mxu1 %v74_v38  ;;  %578 = vmatpush.msra.mxu0 %v57_v40  ;;  %v163_v63 = vld [vmem:[%s2975_s1 + $0x378] sm:$0xff]  ;;  %v68_v0 = vld [vmem:[%s2975_s1 + $0x80] sm:$0xff]  ;;  %v130_v2 = vld [vmem:[%s2975_s1 + $0x270] sm:$0xff] }
  0x17   :  { %637 = vmatpush.msra.mxu3 %v106_v39  ;;  %618 = vmatpush.msra.mxu2 %v89_v41  ;;  %v100_v1 = vld [vmem:[%s2975_s1 + $0x180] sm:$0xff]  ;;  %v147_v3 = vld [vmem:[%s2975_s1 + $0x2f8] sm:$0xff]  ;;  %v162_v4 = vld [vmem:[%s2975_s1 + $0x370] sm:$0xff] }
  0x18   :  { %598 = vmatpush.msra.mxu1 %v73_v42  ;;  %579 = vmatpush.msra.mxu0 %v56_v44  ;;  %v179_v5 = vld [vmem:[%s2975_s1 + $0x3f8] sm:$0xff]  ;;  %v129_v6 = vld [vmem:[%s2975_s1 + $0x268] sm:$0xff]  ;;  %v146_v7 = vld [vmem:[%s2975_s1 + $0x2f0] sm:$0xff] }
  0x19   :  { %638 = vmatpush.msra.mxu3 %v105_v43  ;;  %619 = vmatpush.msra.mxu2 %v88_v45  ;;  %v161_v8 = vld [vmem:[%s2975_s1 + $0x368] sm:$0xff]  ;;  %v178_v9 = vld [vmem:[%s2975_s1 + $0x3f0] sm:$0xff]  ;;  %v128_v10 = vld [vmem:[%s2975_s1 + $0x260] sm:$0xff] }
  0x1a   :  { %599 = vmatpush.msra.mxu1 %v72_v46  ;;  %580 = vmatpush.msra.mxu0 %v55_v48  ;;  %v145_v11 = vld [vmem:[%s2975_s1 + $0x2e8] sm:$0xff]  ;;  %v160_v12 = vld [vmem:[%s2975_s1 + $0x360] sm:$0xff]  ;;  %v127_v14 = vld [vmem:[%s2975_s1 + $0x258] sm:$0xff] }
  0x1b   :  { %639 = vmatpush.msra.mxu3 %v104_v47  ;;  %620 = vmatpush.msra.mxu2 %v87_v49  ;;  %v177_v13 = vld [vmem:[%s2975_s1 + $0x3e8] sm:$0xff]  ;;  %v144_v15 = vld [vmem:[%s2975_s1 + $0x2e0] sm:$0xff]  ;;  %v159_v16 = vld [vmem:[%s2975_s1 + $0x358] sm:$0xff] }
  0x1c   :  { %600 = vmatpush.msra.mxu1 %v71_v50  ;;  %581 = vmatpush.msra.mxu0 %v54_v52  ;;  %v176_v17 = vld [vmem:[%s2975_s1 + $0x3e0] sm:$0xff]  ;;  %v126_v18 = vld [vmem:[%s2975_s1 + $0x250] sm:$0xff]  ;;  %v143_v19 = vld [vmem:[%s2975_s1 + $0x2d8] sm:$0xff] }
  0x1d   :  { %640 = vmatpush.msra.mxu3 %v103_v51  ;;  %621 = vmatpush.msra.mxu2 %v86_v53  ;;  %v158_v20 = vld [vmem:[%s2975_s1 + $0x350] sm:$0xff]  ;;  %v175_v21 = vld [vmem:[%s2975_s1 + $0x3d8] sm:$0xff]  ;;  %v125_v22 = vld [vmem:[%s2975_s1 + $0x248] sm:$0xff] }
  0x1e   :  { %601 = vmatpush.msra.mxu1 %v70_v54  ;;  %582 = vmatpush.msra.mxu0 %v53_v56  ;;  %v142_v23 = vld [vmem:[%s2975_s1 + $0x2d0] sm:$0xff]  ;;  %v157_v24 = vld [vmem:[%s2975_s1 + $0x348] sm:$0xff]  ;;  %v124_v26 = vld [vmem:[%s2975_s1 + $0x240] sm:$0xff] }
  0x1f   :  { %641 = vmatpush.msra.mxu3 %v102_v55  ;;  %622 = vmatpush.msra.mxu2 %v85_v57  ;;  %v174_v25 = vld [vmem:[%s2975_s1 + $0x3d0] sm:$0xff]  ;;  %v141_v27 = vld [vmem:[%s2975_s1 + $0x2c8] sm:$0xff]  ;;  %v156_v28 = vld [vmem:[%s2975_s1 + $0x340] sm:$0xff] }
  0x20   :  { %602 = vmatpush.msra.mxu1 %v69_v58  ;;  %583 = vmatpush.msra.mxu0 %v52_v60  ;;  %v173_v29 = vld [vmem:[%s2975_s1 + $0x3c8] sm:$0xff]  ;;  %v123_v30 = vld [vmem:[%s2975_s1 + $0x238] sm:$0xff]  ;;  %v140_v31 = vld [vmem:[%s2975_s1 + $0x2c0] sm:$0xff] }
  0x21   :  { %642 = vmatpush.msra.mxu3 %v101_v59  ;;  %623 = vmatpush.msra.mxu2 %v84_v61  ;;  %v155_v32 = vld [vmem:[%s2975_s1 + $0x338] sm:$0xff]  ;;  %v172_v33 = vld [vmem:[%s2975_s1 + $0x3c0] sm:$0xff]  ;;  %v122_v34 = vld [vmem:[%s2975_s1 + $0x230] sm:$0xff] }
  0x22   :  { %648 = vmatpush.msrb.mxu0 %v131_v62  ;;  %603 = vmatpush.msra.mxu1 %v68_v0  ;;  %v139_v35 = vld [vmem:[%s2975_s1 + $0x2b8] sm:$0xff]  ;;  %v154_v36 = vld [vmem:[%s2975_s1 + $0x330] sm:$0xff]  ;;  %v121_v38 = vld [vmem:[%s2975_s1 + $0x228] sm:$0xff] }
  0x23   :  { %688 = vmatpush.msrb.mxu2 %v163_v63  ;;  %643 = vmatpush.msra.mxu3 %v100_v1  ;;  %v171_v37 = vld [vmem:[%s2975_s1 + $0x3b8] sm:$0xff]  ;;  %v138_v39 = vld [vmem:[%s2975_s1 + $0x2b0] sm:$0xff]  ;;  %v153_v40 = vld [vmem:[%s2975_s1 + $0x328] sm:$0xff] }
  0x24   :  { %649 = vmatpush.msrb.mxu0 %v130_v2  ;;  %668 = vmatpush.msrb.mxu1 %v147_v3  ;;  %v170_v41 = vld [vmem:[%s2975_s1 + $0x3b0] sm:$0xff]  ;;  %v120_v42 = vld [vmem:[%s2975_s1 + $0x220] sm:$0xff]  ;;  %v137_v43 = vld [vmem:[%s2975_s1 + $0x2a8] sm:$0xff] }
  0x25   :  { %689 = vmatpush.msrb.mxu2 %v162_v4  ;;  %708 = vmatpush.msrb.mxu3 %v179_v5  ;;  %v152_v44 = vld [vmem:[%s2975_s1 + $0x320] sm:$0xff]  ;;  %v169_v45 = vld [vmem:[%s2975_s1 + $0x3a8] sm:$0xff]  ;;  %v119_v46 = vld [vmem:[%s2975_s1 + $0x218] sm:$0xff] }
  0x26   :  { %650 = vmatpush.msrb.mxu0 %v129_v6  ;;  %669 = vmatpush.msrb.mxu1 %v146_v7  ;;  %v136_v47 = vld [vmem:[%s2975_s1 + $0x2a0] sm:$0xff]  ;;  %v151_v48 = vld [vmem:[%s2975_s1 + $0x318] sm:$0xff]  ;;  %v118_v50 = vld [vmem:[%s2975_s1 + $0x210] sm:$0xff] }
  0x27   :  { %690 = vmatpush.msrb.mxu2 %v161_v8  ;;  %709 = vmatpush.msrb.mxu3 %v178_v9  ;;  %v168_v49 = vld [vmem:[%s2975_s1 + $0x3a0] sm:$0xff]  ;;  %v135_v51 = vld [vmem:[%s2975_s1 + $0x298] sm:$0xff]  ;;  %v150_v52 = vld [vmem:[%s2975_s1 + $0x310] sm:$0xff] }
  0x28   :  { %651 = vmatpush.msrb.mxu0 %v128_v10  ;;  %670 = vmatpush.msrb.mxu1 %v145_v11  ;;  %v167_v53 = vld [vmem:[%s2975_s1 + $0x398] sm:$0xff]  ;;  %v117_v54 = vld [vmem:[%s2975_s1 + $0x208] sm:$0xff]  ;;  %v134_v55 = vld [vmem:[%s2975_s1 + $0x290] sm:$0xff] }
  0x29   :  { %691 = vmatpush.msrb.mxu2 %v160_v12  ;;  %710 = vmatpush.msrb.mxu3 %v177_v13  ;;  %v149_v56 = vld [vmem:[%s2975_s1 + $0x308] sm:$0xff]  ;;  %v166_v57 = vld [vmem:[%s2975_s1 + $0x390] sm:$0xff]  ;;  %v116_v58 = vld [vmem:[%s2975_s1 + $0x200] sm:$0xff] }
  0x2a   :  { %652 = vmatpush.msrb.mxu0 %v127_v14  ;;  %671 = vmatpush.msrb.mxu1 %v144_v15  ;;  %v133_v59 = vld [vmem:[%s2975_s1 + $0x288] sm:$0xff]  ;;  %v148_v60 = vld [vmem:[%s2975_s1 + $0x300] sm:$0xff]  ;;  %v22_v63 = vld [vmem:[%s2976_s0 + $0x10] sm:$0xff] }
  0x2b   :  { %692 = vmatpush.msrb.mxu2 %v159_v16  ;;  %711 = vmatpush.msrb.mxu3 %v176_v17  ;;  %v165_v61 = vld [vmem:[%s2975_s1 + $0x388] sm:$0xff]  ;;  %v20_v62 = vld [vmem:[%s2976_s0] sm:$0xff]  ;;  %v195_v0 = vld [vmem:[%s2975_s1 + $0x478] sm:$0xff] }
  0x2c   :  { %653 = vmatpush.msrb.mxu0 %v126_v18  ;;  %672 = vmatpush.msrb.mxu1 %v143_v19  ;;  %v227_v1 = vld [vmem:[%s2975_s1 + $0x578] sm:$0xff]  ;;  %v132_v2 = vld [vmem:[%s2975_s1 + $0x280] sm:$0xff]  ;;  %v21_v4 = vld [vmem:[%s2976_s0 + $0x8] sm:$0xff] }
  0x2d   :  { %693 = vmatpush.msrb.mxu2 %v158_v20  ;;  %712 = vmatpush.msrb.mxu3 %v175_v21  ;;  %v164_v3 = vld [vmem:[%s2975_s1 + $0x380] sm:$0xff]  ;;  %v23_v5 = vld [vmem:[%s2976_s0 + $0x18] sm:$0xff]  ;;  %v194_v6 = vld [vmem:[%s2975_s1 + $0x470] sm:$0xff] }
  0x2e   :  { %654 = vmatpush.msrb.mxu0 %v125_v22  ;;  %673 = vmatpush.msrb.mxu1 %v142_v23  ;;  %v211_v7 = vld [vmem:[%s2975_s1 + $0x4f8] sm:$0xff]  ;;  %v226_v8 = vld [vmem:[%s2975_s1 + $0x570] sm:$0xff]  ;;  %v193_v10 = vld [vmem:[%s2975_s1 + $0x468] sm:$0xff] }
  0x2f   :  { %694 = vmatpush.msrb.mxu2 %v157_v24  ;;  %713 = vmatpush.msrb.mxu3 %v174_v25  ;;  %v243_v9 = vld [vmem:[%s2975_s1 + $0x5f8] sm:$0xff]  ;;  %v210_v11 = vld [vmem:[%s2975_s1 + $0x4f0] sm:$0xff]  ;;  %v225_v12 = vld [vmem:[%s2975_s1 + $0x568] sm:$0xff] }
  0x30   :  { %655 = vmatpush.msrb.mxu0 %v124_v26  ;;  %674 = vmatpush.msrb.mxu1 %v141_v27  ;;  %v242_v13 = vld [vmem:[%s2975_s1 + $0x5f0] sm:$0xff]  ;;  %v192_v14 = vld [vmem:[%s2975_s1 + $0x460] sm:$0xff]  ;;  %v209_v15 = vld [vmem:[%s2975_s1 + $0x4e8] sm:$0xff] }
  0x31   :  { %695 = vmatpush.msrb.mxu2 %v156_v28  ;;  %714 = vmatpush.msrb.mxu3 %v173_v29  ;;  %v224_v16 = vld [vmem:[%s2975_s1 + $0x560] sm:$0xff]  ;;  %v241_v17 = vld [vmem:[%s2975_s1 + $0x5e8] sm:$0xff]  ;;  %v26_v18 = vld [vmem:[%s2976_s0 + $0x30] sm:$0xff] }
  0x32   :  { %656 = vmatpush.msrb.mxu0 %v123_v30  ;;  %675 = vmatpush.msrb.mxu1 %v140_v31  ;;  %v191_v19 = vld [vmem:[%s2975_s1 + $0x458] sm:$0xff]  ;;  %v208_v20 = vld [vmem:[%s2975_s1 + $0x4e0] sm:$0xff]  ;;  %v190_v25 = vld [vmem:[%s2975_s1 + $0x450] sm:$0xff] }
  0x33   :  { %696 = vmatpush.msrb.mxu2 %v155_v32  ;;  %715 = vmatpush.msrb.mxu3 %v172_v33  ;;  %v223_v21 = vld [vmem:[%s2975_s1 + $0x558] sm:$0xff]  ;;  %v240_v22 = vld [vmem:[%s2975_s1 + $0x5e0] sm:$0xff]  ;;  %v222_v27 = vld [vmem:[%s2975_s1 + $0x550] sm:$0xff] }
  0x34   :  { %657 = vmatpush.msrb.mxu0 %v122_v34  ;;  %676 = vmatpush.msrb.mxu1 %v139_v35  ;;  %v24_v23 = vld [vmem:[%s2976_s0 + $0x20] sm:$0xff]  ;;  %v27_v24 = vld [vmem:[%s2976_s0 + $0x38] sm:$0xff]  ;;  %v25_v29 = vld [vmem:[%s2976_s0 + $0x28] sm:$0xff] }
  0x35   :  { %697 = vmatpush.msrb.mxu2 %v154_v36  ;;  %716 = vmatpush.msrb.mxu3 %v171_v37  ;;  %v207_v26 = vld [vmem:[%s2975_s1 + $0x4d8] sm:$0xff]  ;;  %v189_v30 = vld [vmem:[%s2975_s1 + $0x448] sm:$0xff]  ;;  %v206_v31 = vld [vmem:[%s2975_s1 + $0x4d0] sm:$0xff] }
  0x36   :  { %658 = vmatpush.msrb.mxu0 %v121_v38  ;;  %677 = vmatpush.msrb.mxu1 %v138_v39  ;;  %v239_v28 = vld [vmem:[%s2975_s1 + $0x5d8] sm:$0xff]  ;;  %v221_v32 = vld [vmem:[%s2975_s1 + $0x548] sm:$0xff]  ;;  %v238_v33 = vld [vmem:[%s2975_s1 + $0x5d0] sm:$0xff] }
  0x37   :  { %698 = vmatpush.msrb.mxu2 %v153_v40  ;;  %717 = vmatpush.msrb.mxu3 %v170_v41  ;;  %v188_v34 = vld [vmem:[%s2975_s1 + $0x440] sm:$0xff]  ;;  %v205_v35 = vld [vmem:[%s2975_s1 + $0x4c8] sm:$0xff]  ;;  %v187_v38 = vld [vmem:[%s2975_s1 + $0x438] sm:$0xff] }
  0x38   :  { %659 = vmatpush.msrb.mxu0 %v120_v42  ;;  %678 = vmatpush.msrb.mxu1 %v137_v43  ;;  %v220_v36 = vld [vmem:[%s2975_s1 + $0x540] sm:$0xff]  ;;  %v237_v37 = vld [vmem:[%s2975_s1 + $0x5c8] sm:$0xff]  ;;  %v219_v40 = vld [vmem:[%s2975_s1 + $0x538] sm:$0xff] }
  0x39   :  { %699 = vmatpush.msrb.mxu2 %v152_v44  ;;  %718 = vmatpush.msrb.mxu3 %v169_v45  ;;  %v204_v39 = vld [vmem:[%s2975_s1 + $0x4c0] sm:$0xff]  ;;  %v186_v42 = vld [vmem:[%s2975_s1 + $0x430] sm:$0xff]  ;;  %v203_v43 = vld [vmem:[%s2975_s1 + $0x4b8] sm:$0xff] }
  0x3a   :  { %660 = vmatpush.msrb.mxu0 %v119_v46  ;;  %679 = vmatpush.msrb.mxu1 %v136_v47  ;;  %v236_v41 = vld [vmem:[%s2975_s1 + $0x5c0] sm:$0xff]  ;;  %v218_v44 = vld [vmem:[%s2975_s1 + $0x530] sm:$0xff]  ;;  %v235_v45 = vld [vmem:[%s2975_s1 + $0x5b8] sm:$0xff] }
  0x3b   :  { %700 = vmatpush.msrb.mxu2 %v151_v48  ;;  %719 = vmatpush.msrb.mxu3 %v168_v49  ;;  %v185_v46 = vld [vmem:[%s2975_s1 + $0x428] sm:$0xff]  ;;  %v202_v47 = vld [vmem:[%s2975_s1 + $0x4b0] sm:$0xff] }
  0x3c   :  { %661 = vmatpush.msrb.mxu0 %v118_v50  ;;  %680 = vmatpush.msrb.mxu1 %v135_v51  ;;  %v217_v48 = vld [vmem:[%s2975_s1 + $0x528] sm:$0xff]  ;;  %v234_v49 = vld [vmem:[%s2975_s1 + $0x5b0] sm:$0xff]  ;;  %v184_v50 = vld [vmem:[%s2975_s1 + $0x420] sm:$0xff] }
  0x3d   :  { %701 = vmatpush.msrb.mxu2 %v150_v52  ;;  %720 = vmatpush.msrb.mxu3 %v167_v53  ;;  %v201_v51 = vld [vmem:[%s2975_s1 + $0x4a8] sm:$0xff]  ;;  %v216_v52 = vld [vmem:[%s2975_s1 + $0x520] sm:$0xff] }
  0x3e   :  { %662 = vmatpush.msrb.mxu0 %v117_v54  ;;  %681 = vmatpush.msrb.mxu1 %v134_v55  ;;  %v233_v53 = vld [vmem:[%s2975_s1 + $0x5a8] sm:$0xff]  ;;  %v183_v54 = vld [vmem:[%s2975_s1 + $0x418] sm:$0xff]  ;;  %v200_v55 = vld [vmem:[%s2975_s1 + $0x4a0] sm:$0xff] }
  0x3f   :  { %702 = vmatpush.msrb.mxu2 %v149_v56  ;;  %721 = vmatpush.msrb.mxu3 %v166_v57  ;;  %v215_v56 = vld [vmem:[%s2975_s1 + $0x518] sm:$0xff]  ;;  %v232_v57 = vld [vmem:[%s2975_s1 + $0x5a0] sm:$0xff] }
  0x40   :  { %663 = vmatpush.msrb.mxu0 %v116_v58  ;;  %682 = vmatpush.msrb.mxu1 %v133_v59  ;;  %v182_v58 = vld [vmem:[%s2975_s1 + $0x410] sm:$0xff]  ;;  %v199_v59 = vld [vmem:[%s2975_s1 + $0x498] sm:$0xff] }
  0x41   :  { %703 = vmatpush.msrb.mxu2 %v148_v60  ;;  %722 = vmatpush.msrb.mxu3 %v165_v61  ;;  %v214_v60 = vld [vmem:[%s2975_s1 + $0x510] sm:$0xff]  ;;  %v231_v61 = vld [vmem:[%s2975_s1 + $0x598] sm:$0xff] }
  0x42   :  { %584 = vmatmul.f32.vlgmr.msra.gmra.mxu0 %v20_v62  ;;  %624 = vmatmul.f32.vlgmr.msra.gmra.mxu2 %v22_v63  ;;  %v181_v62 = vld [vmem:[%s2975_s1 + $0x408] sm:$0xff]  ;;  %v198_v63 = vld [vmem:[%s2975_s1 + $0x490] sm:$0xff] }
  0x43   :  { %728 = vmatpush.msra.mxu0 %v195_v0  ;;  %768 = vmatpush.msra.mxu2 %v227_v1  ;;  %v213_v0 = vld [vmem:[%s2975_s1 + $0x508] sm:$0xff]  ;;  %v230_v1 = vld [vmem:[%s2975_s1 + $0x590] sm:$0xff] }
  0x44   :  { %683 = vmatpush.msrb.mxu1 %v132_v2  ;;  %723 = vmatpush.msrb.mxu3 %v164_v3  ;;  %v180_v2 = vld [vmem:[%s2975_s1 + $0x400] sm:$0xff]  ;;  %v197_v3 = vld [vmem:[%s2975_s1 + $0x488] sm:$0xff] }
  0x45   :  { %604 = vmatmul.f32.vlgmr.msra.gmra.mxu1 %v21_v4  ;;  %644 = vmatmul.f32.vlgmr.msra.gmra.mxu3 %v23_v5  ;;  %v212_v4 = vld [vmem:[%s2975_s1 + $0x500] sm:$0xff]  ;;  %v229_v5 = vld [vmem:[%s2975_s1 + $0x588] sm:$0xff] }
  0x46   :  { %729 = vmatpush.msra.mxu0 %v194_v6  ;;  %748 = vmatpush.msra.mxu1 %v211_v7  ;;  %v28_v6 = vld [vmem:[%s2976_s0 + $0x40] sm:$0xff]  ;;  %v30_v7 = vld [vmem:[%s2976_s0 + $0x50] sm:$0xff] }
  0x47   :  { %769 = vmatpush.msra.mxu2 %v226_v8  ;;  %788 = vmatpush.msra.mxu3 %v243_v9  ;;  %v259_v8 = vld [vmem:[%s2975_s1 + $0x678] sm:$0xff] }
  0x48   :  { %730 = vmatpush.msra.mxu0 %v193_v10  ;;  %749 = vmatpush.msra.mxu1 %v210_v11  ;;  %v291_v9 = vld [vmem:[%s2975_s1 + $0x778] sm:$0xff]  ;;  %v196_v10 = vld [vmem:[%s2975_s1 + $0x480] sm:$0xff] }
  0x49   :  { %770 = vmatpush.msra.mxu2 %v225_v12  ;;  %789 = vmatpush.msra.mxu3 %v242_v13  ;;  %v228_v11 = vld [vmem:[%s2975_s1 + $0x580] sm:$0xff]  ;;  %v29_v12 = vld [vmem:[%s2976_s0 + $0x48] sm:$0xff]  ;;  %v31_v13 = vld [vmem:[%s2976_s0 + $0x58] sm:$0xff] }
  0x4a   :  { %731 = vmatpush.msra.mxu0 %v192_v14  ;;  %750 = vmatpush.msra.mxu1 %v209_v15  ;;  %v258_v14 = vld [vmem:[%s2975_s1 + $0x670] sm:$0xff]  ;;  %v275_v15 = vld [vmem:[%s2975_s1 + $0x6f8] sm:$0xff] }
  0x4b   :  { %771 = vmatpush.msra.mxu2 %v224_v16  ;;  %790 = vmatpush.msra.mxu3 %v241_v17  ;;  %v290_v16 = vld [vmem:[%s2975_s1 + $0x770] sm:$0xff]  ;;  %v307_v17 = vld [vmem:[%s2975_s1 + $0x7f8] sm:$0xff] }
  0x4c   :  { %704 = vmatmul.f32.vlgmr.msrb.gmra.mxu2 %v26_v18  ;;  %732 = vmatpush.msra.mxu0 %v191_v19  ;;  %v257_v18 = vld [vmem:[%s2975_s1 + $0x668] sm:$0xff]  ;;  %v274_v19 = vld [vmem:[%s2975_s1 + $0x6f0] sm:$0xff] }
  0x4d   :  { %751 = vmatpush.msra.mxu1 %v208_v20  ;;  %772 = vmatpush.msra.mxu2 %v223_v21  ;;  %v289_v20 = vld [vmem:[%s2975_s1 + $0x768] sm:$0xff]  ;;  %v306_v21 = vld [vmem:[%s2975_s1 + $0x7f0] sm:$0xff] }
  0x4e   :  { %791 = vmatpush.msra.mxu3 %v240_v22  ;;  %664 = vmatmul.f32.vlgmr.msrb.gmra.mxu0 %v24_v23  ;;  %v256_v22 = vld [vmem:[%s2975_s1 + $0x660] sm:$0xff]  ;;  %v273_v23 = vld [vmem:[%s2975_s1 + $0x6e8] sm:$0xff] }
  0x4f   :  { %724 = vmatmul.f32.vlgmr.msrb.gmra.mxu3 %v27_v24  ;;  %733 = vmatpush.msra.mxu0 %v190_v25  ;;  %v288_v24 = vld [vmem:[%s2975_s1 + $0x760] sm:$0xff]  ;;  %v305_v25 = vld [vmem:[%s2975_s1 + $0x7e8] sm:$0xff] }
  0x50   :  { %752 = vmatpush.msra.mxu1 %v207_v26  ;;  %773 = vmatpush.msra.mxu2 %v222_v27  ;;  %v255_v26 = vld [vmem:[%s2975_s1 + $0x658] sm:$0xff]  ;;  %v272_v27 = vld [vmem:[%s2975_s1 + $0x6e0] sm:$0xff] }
  0x51   :  { %792 = vmatpush.msra.mxu3 %v239_v28  ;;  %684 = vmatmul.f32.vlgmr.msrb.gmra.mxu1 %v25_v29  ;;  %v287_v28 = vld [vmem:[%s2975_s1 + $0x758] sm:$0xff]  ;;  %v304_v29 = vld [vmem:[%s2975_s1 + $0x7e0] sm:$0xff] }
  0x52   :  { %734 = vmatpush.msra.mxu0 %v189_v30  ;;  %753 = vmatpush.msra.mxu1 %v206_v31  ;;  %v254_v30 = vld [vmem:[%s2975_s1 + $0x650] sm:$0xff]  ;;  %v271_v31 = vld [vmem:[%s2975_s1 + $0x6d8] sm:$0xff] }
  0x53   :  { %774 = vmatpush.msra.mxu2 %v221_v32  ;;  %793 = vmatpush.msra.mxu3 %v238_v33  ;;  %v286_v32 = vld [vmem:[%s2975_s1 + $0x750] sm:$0xff]  ;;  %v303_v33 = vld [vmem:[%s2975_s1 + $0x7d8] sm:$0xff] }
  0x54   :  { %735 = vmatpush.msra.mxu0 %v188_v34  ;;  %754 = vmatpush.msra.mxu1 %v205_v35  ;;  %v253_v34 = vld [vmem:[%s2975_s1 + $0x648] sm:$0xff]  ;;  %v270_v35 = vld [vmem:[%s2975_s1 + $0x6d0] sm:$0xff] }
  0x55   :  { %775 = vmatpush.msra.mxu2 %v220_v36  ;;  %794 = vmatpush.msra.mxu3 %v237_v37  ;;  %v285_v36 = vld [vmem:[%s2975_s1 + $0x748] sm:$0xff]  ;;  %v302_v37 = vld [vmem:[%s2975_s1 + $0x7d0] sm:$0xff] }
  0x56   :  { %736 = vmatpush.msra.mxu0 %v187_v38  ;;  %755 = vmatpush.msra.mxu1 %v204_v39  ;;  %v252_v38 = vld [vmem:[%s2975_s1 + $0x640] sm:$0xff]  ;;  %v269_v39 = vld [vmem:[%s2975_s1 + $0x6c8] sm:$0xff] }
  0x57   :  { %776 = vmatpush.msra.mxu2 %v219_v40  ;;  %795 = vmatpush.msra.mxu3 %v236_v41  ;;  %v284_v40 = vld [vmem:[%s2975_s1 + $0x740] sm:$0xff]  ;;  %v301_v41 = vld [vmem:[%s2975_s1 + $0x7c8] sm:$0xff] }
  0x58   :  { %737 = vmatpush.msra.mxu0 %v186_v42  ;;  %756 = vmatpush.msra.mxu1 %v203_v43  ;;  %v251_v42 = vld [vmem:[%s2975_s1 + $0x638] sm:$0xff]  ;;  %v268_v43 = vld [vmem:[%s2975_s1 + $0x6c0] sm:$0xff] }
  0x59   :  { %777 = vmatpush.msra.mxu2 %v218_v44  ;;  %796 = vmatpush.msra.mxu3 %v235_v45  ;;  %v283_v44 = vld [vmem:[%s2975_s1 + $0x738] sm:$0xff]  ;;  %v300_v45 = vld [vmem:[%s2975_s1 + $0x7c0] sm:$0xff] }
  0x5a   :  { %738 = vmatpush.msra.mxu0 %v185_v46  ;;  %757 = vmatpush.msra.mxu1 %v202_v47  ;;  %v250_v46 = vld [vmem:[%s2975_s1 + $0x630] sm:$0xff]  ;;  %v267_v47 = vld [vmem:[%s2975_s1 + $0x6b8] sm:$0xff] }
  0x5b   :  { %778 = vmatpush.msra.mxu2 %v217_v48  ;;  %797 = vmatpush.msra.mxu3 %v234_v49  ;;  %v282_v48 = vld [vmem:[%s2975_s1 + $0x730] sm:$0xff]  ;;  %v299_v49 = vld [vmem:[%s2975_s1 + $0x7b8] sm:$0xff] }
  0x5c   :  { %739 = vmatpush.msra.mxu0 %v184_v50  ;;  %758 = vmatpush.msra.mxu1 %v201_v51  ;;  %v249_v50 = vld [vmem:[%s2975_s1 + $0x628] sm:$0xff]  ;;  %v266_v51 = vld [vmem:[%s2975_s1 + $0x6b0] sm:$0xff] }
  0x5d   :  { %779 = vmatpush.msra.mxu2 %v216_v52  ;;  %798 = vmatpush.msra.mxu3 %v233_v53  ;;  %v281_v52 = vld [vmem:[%s2975_s1 + $0x728] sm:$0xff]  ;;  %v298_v53 = vld [vmem:[%s2975_s1 + $0x7b0] sm:$0xff] }
  0x5e   :  { %740 = vmatpush.msra.mxu0 %v183_v54  ;;  %759 = vmatpush.msra.mxu1 %v200_v55  ;;  %v248_v54 = vld [vmem:[%s2975_s1 + $0x620] sm:$0xff]  ;;  %v265_v55 = vld [vmem:[%s2975_s1 + $0x6a8] sm:$0xff] }
  0x5f   :  { %780 = vmatpush.msra.mxu2 %v215_v56  ;;  %799 = vmatpush.msra.mxu3 %v232_v57  ;;  %v280_v56 = vld [vmem:[%s2975_s1 + $0x720] sm:$0xff]  ;;  %v297_v57 = vld [vmem:[%s2975_s1 + $0x7a8] sm:$0xff] }
  0x60   :  { %741 = vmatpush.msra.mxu0 %v182_v58  ;;  %760 = vmatpush.msra.mxu1 %v199_v59  ;;  %v247_v58 = vld [vmem:[%s2975_s1 + $0x618] sm:$0xff]  ;;  %v264_v59 = vld [vmem:[%s2975_s1 + $0x6a0] sm:$0xff] }
  0x61   :  { %781 = vmatpush.msra.mxu2 %v214_v60  ;;  %800 = vmatpush.msra.mxu3 %v231_v61  ;;  %v279_v60 = vld [vmem:[%s2975_s1 + $0x718] sm:$0xff]  ;;  %v296_v61 = vld [vmem:[%s2975_s1 + $0x7a0] sm:$0xff] }
  0x62   :  { %742 = vmatpush.msra.mxu0 %v181_v62  ;;  %761 = vmatpush.msra.mxu1 %v198_v63  ;;  %v246_v62 = vld [vmem:[%s2975_s1 + $0x610] sm:$0xff]  ;;  %v263_v63 = vld [vmem:[%s2975_s1 + $0x698] sm:$0xff] }
  0x63   :  { %782 = vmatpush.msra.mxu2 %v213_v0  ;;  %801 = vmatpush.msra.mxu3 %v230_v1  ;;  %v278_v0 = vld [vmem:[%s2975_s1 + $0x710] sm:$0xff]  ;;  %v295_v1 = vld [vmem:[%s2975_s1 + $0x798] sm:$0xff] }
  0x64   :  { %743 = vmatpush.msra.mxu0 %v180_v2  ;;  %762 = vmatpush.msra.mxu1 %v197_v3  ;;  %v245_v2 = vld [vmem:[%s2975_s1 + $0x608] sm:$0xff]  ;;  %v262_v3 = vld [vmem:[%s2975_s1 + $0x690] sm:$0xff] }
  0x65   :  { %783 = vmatpush.msra.mxu2 %v212_v4  ;;  %802 = vmatpush.msra.mxu3 %v229_v5  ;;  %v277_v4 = vld [vmem:[%s2975_s1 + $0x708] sm:$0xff]  ;;  %v294_v5 = vld [vmem:[%s2975_s1 + $0x790] sm:$0xff] }
  0x66   :  { %744 = vmatmul.f32.vlgmr.msra.gmra.mxu0 %v28_v6  ;;  %784 = vmatmul.f32.vlgmr.msra.gmra.mxu2 %v30_v7  ;;  %v244_v6 = vld [vmem:[%s2975_s1 + $0x600] sm:$0xff]  ;;  %v261_v7 = vld [vmem:[%s2975_s1 + $0x688] sm:$0xff] }
  0x67   :  { %808 = vmatpush.msrb.mxu0 %v259_v8  ;;  %848 = vmatpush.msrb.mxu2 %v291_v9  ;;  %v276_v8 = vld [vmem:[%s2975_s1 + $0x700] sm:$0xff]  ;;  %v293_v9 = vld [vmem:[%s2975_s1 + $0x788] sm:$0xff] }
  0x68   :  { %763 = vmatpush.msra.mxu1 %v196_v10  ;;  %803 = vmatpush.msra.mxu3 %v228_v11  ;;  %v32_v10 = vld [vmem:[%s2976_s0 + $0x60] sm:$0xff]  ;;  %v34_v11 = vld [vmem:[%s2976_s0 + $0x70] sm:$0xff] }
  0x69   :  { %764 = vmatmul.f32.vlgmr.msra.gmra.mxu1 %v29_v12  ;;  %804 = vmatmul.f32.vlgmr.msra.gmra.mxu3 %v31_v13  ;;  %v323_v12 = vld [vmem:[%s2975_s1 + $0x878] sm:$0xff] }
  0x6a   :  { %809 = vmatpush.msrb.mxu0 %v258_v14  ;;  %828 = vmatpush.msrb.mxu1 %v275_v15  ;;  %v355_v13 = vld [vmem:[%s2975_s1 + $0x978] sm:$0xff]  ;;  %v260_v14 = vld [vmem:[%s2975_s1 + $0x680] sm:$0xff] }
  0x6b   :  { %849 = vmatpush.msrb.mxu2 %v290_v16  ;;  %868 = vmatpush.msrb.mxu3 %v307_v17  ;;  %v292_v15 = vld [vmem:[%s2975_s1 + $0x780] sm:$0xff]  ;;  %v33_v16 = vld [vmem:[%s2976_s0 + $0x68] sm:$0xff]  ;;  %v35_v17 = vld [vmem:[%s2976_s0 + $0x78] sm:$0xff] }
  0x6c   :  { %810 = vmatpush.msrb.mxu0 %v257_v18  ;;  %829 = vmatpush.msrb.mxu1 %v274_v19  ;;  %v322_v18 = vld [vmem:[%s2975_s1 + $0x870] sm:$0xff]  ;;  %v339_v19 = vld [vmem:[%s2975_s1 + $0x8f8] sm:$0xff] }
  0x6d   :  { %850 = vmatpush.msrb.mxu2 %v289_v20  ;;  %869 = vmatpush.msrb.mxu3 %v306_v21  ;;  %v354_v20 = vld [vmem:[%s2975_s1 + $0x970] sm:$0xff]  ;;  %v371_v21 = vld [vmem:[%s2975_s1 + $0x9f8] sm:$0xff] }
  0x6e   :  { %811 = vmatpush.msrb.mxu0 %v256_v22  ;;  %830 = vmatpush.msrb.mxu1 %v273_v23  ;;  %v321_v22 = vld [vmem:[%s2975_s1 + $0x868] sm:$0xff]  ;;  %v338_v23 = vld [vmem:[%s2975_s1 + $0x8f0] sm:$0xff] }
  0x6f   :  { %851 = vmatpush.msrb.mxu2 %v288_v24  ;;  %870 = vmatpush.msrb.mxu3 %v305_v25  ;;  %v353_v24 = vld [vmem:[%s2975_s1 + $0x968] sm:$0xff]  ;;  %v370_v25 = vld [vmem:[%s2975_s1 + $0x9f0] sm:$0xff] }
  0x70   :  { %812 = vmatpush.msrb.mxu0 %v255_v26  ;;  %831 = vmatpush.msrb.mxu1 %v272_v27  ;;  %v320_v26 = vld [vmem:[%s2975_s1 + $0x860] sm:$0xff]  ;;  %v337_v27 = vld [vmem:[%s2975_s1 + $0x8e8] sm:$0xff] }
  0x71   :  { %852 = vmatpush.msrb.mxu2 %v287_v28  ;;  %871 = vmatpush.msrb.mxu3 %v304_v29  ;;  %v352_v28 = vld [vmem:[%s2975_s1 + $0x960] sm:$0xff]  ;;  %v369_v29 = vld [vmem:[%s2975_s1 + $0x9e8] sm:$0xff] }
  0x72   :  { %813 = vmatpush.msrb.mxu0 %v254_v30  ;;  %832 = vmatpush.msrb.mxu1 %v271_v31  ;;  %v319_v30 = vld [vmem:[%s2975_s1 + $0x858] sm:$0xff]  ;;  %v336_v31 = vld [vmem:[%s2975_s1 + $0x8e0] sm:$0xff] }
  0x73   :  { %853 = vmatpush.msrb.mxu2 %v286_v32  ;;  %872 = vmatpush.msrb.mxu3 %v303_v33  ;;  %v351_v32 = vld [vmem:[%s2975_s1 + $0x958] sm:$0xff]  ;;  %v368_v33 = vld [vmem:[%s2975_s1 + $0x9e0] sm:$0xff] }
  0x74   :  { %814 = vmatpush.msrb.mxu0 %v253_v34  ;;  %833 = vmatpush.msrb.mxu1 %v270_v35  ;;  %v318_v34 = vld [vmem:[%s2975_s1 + $0x850] sm:$0xff]  ;;  %v335_v35 = vld [vmem:[%s2975_s1 + $0x8d8] sm:$0xff] }
  0x75   :  { %854 = vmatpush.msrb.mxu2 %v285_v36  ;;  %873 = vmatpush.msrb.mxu3 %v302_v37  ;;  %v350_v36 = vld [vmem:[%s2975_s1 + $0x950] sm:$0xff]  ;;  %v367_v37 = vld [vmem:[%s2975_s1 + $0x9d8] sm:$0xff] }
  0x76   :  { %815 = vmatpush.msrb.mxu0 %v252_v38  ;;  %834 = vmatpush.msrb.mxu1 %v269_v39  ;;  %v317_v38 = vld [vmem:[%s2975_s1 + $0x848] sm:$0xff]  ;;  %v334_v39 = vld [vmem:[%s2975_s1 + $0x8d0] sm:$0xff] }
  0x77   :  { %855 = vmatpush.msrb.mxu2 %v284_v40  ;;  %874 = vmatpush.msrb.mxu3 %v301_v41  ;;  %v349_v40 = vld [vmem:[%s2975_s1 + $0x948] sm:$0xff]  ;;  %v366_v41 = vld [vmem:[%s2975_s1 + $0x9d0] sm:$0xff] }
  0x78   :  { %816 = vmatpush.msrb.mxu0 %v251_v42  ;;  %835 = vmatpush.msrb.mxu1 %v268_v43  ;;  %v316_v42 = vld [vmem:[%s2975_s1 + $0x840] sm:$0xff]  ;;  %v333_v43 = vld [vmem:[%s2975_s1 + $0x8c8] sm:$0xff] }
  0x79   :  { %856 = vmatpush.msrb.mxu2 %v283_v44  ;;  %875 = vmatpush.msrb.mxu3 %v300_v45  ;;  %v348_v44 = vld [vmem:[%s2975_s1 + $0x940] sm:$0xff]  ;;  %v365_v45 = vld [vmem:[%s2975_s1 + $0x9c8] sm:$0xff] }
  0x7a   :  { %817 = vmatpush.msrb.mxu0 %v250_v46  ;;  %836 = vmatpush.msrb.mxu1 %v267_v47  ;;  %v315_v46 = vld [vmem:[%s2975_s1 + $0x838] sm:$0xff]  ;;  %v332_v47 = vld [vmem:[%s2975_s1 + $0x8c0] sm:$0xff] }
  0x7b   :  { %857 = vmatpush.msrb.mxu2 %v282_v48  ;;  %876 = vmatpush.msrb.mxu3 %v299_v49  ;;  %v347_v48 = vld [vmem:[%s2975_s1 + $0x938] sm:$0xff]  ;;  %v364_v49 = vld [vmem:[%s2975_s1 + $0x9c0] sm:$0xff] }
  0x7c   :  { %818 = vmatpush.msrb.mxu0 %v249_v50  ;;  %837 = vmatpush.msrb.mxu1 %v266_v51  ;;  %v314_v50 = vld [vmem:[%s2975_s1 + $0x830] sm:$0xff]  ;;  %v331_v51 = vld [vmem:[%s2975_s1 + $0x8b8] sm:$0xff] }
  0x7d   :  { %858 = vmatpush.msrb.mxu2 %v281_v52  ;;  %877 = vmatpush.msrb.mxu3 %v298_v53  ;;  %v346_v52 = vld [vmem:[%s2975_s1 + $0x930] sm:$0xff]  ;;  %v363_v53 = vld [vmem:[%s2975_s1 + $0x9b8] sm:$0xff] }
  0x7e   :  { %819 = vmatpush.msrb.mxu0 %v248_v54  ;;  %838 = vmatpush.msrb.mxu1 %v265_v55  ;;  %v313_v54 = vld [vmem:[%s2975_s1 + $0x828] sm:$0xff]  ;;  %v330_v55 = vld [vmem:[%s2975_s1 + $0x8b0] sm:$0xff] }
  0x7f   :  { %859 = vmatpush.msrb.mxu2 %v280_v56  ;;  %878 = vmatpush.msrb.mxu3 %v297_v57  ;;  %v345_v56 = vld [vmem:[%s2975_s1 + $0x928] sm:$0xff]  ;;  %v362_v57 = vld [vmem:[%s2975_s1 + $0x9b0] sm:$0xff] }
  0x80   :  { %820 = vmatpush.msrb.mxu0 %v247_v58  ;;  %839 = vmatpush.msrb.mxu1 %v264_v59  ;;  %v312_v58 = vld [vmem:[%s2975_s1 + $0x820] sm:$0xff]  ;;  %v329_v59 = vld [vmem:[%s2975_s1 + $0x8a8] sm:$0xff] }
  0x81   :  { %860 = vmatpush.msrb.mxu2 %v279_v60  ;;  %879 = vmatpush.msrb.mxu3 %v296_v61  ;;  %v344_v60 = vld [vmem:[%s2975_s1 + $0x920] sm:$0xff]  ;;  %v361_v61 = vld [vmem:[%s2975_s1 + $0x9a8] sm:$0xff] }
  0x82   :  { %821 = vmatpush.msrb.mxu0 %v246_v62  ;;  %840 = vmatpush.msrb.mxu1 %v263_v63  ;;  %v311_v62 = vld [vmem:[%s2975_s1 + $0x818] sm:$0xff]  ;;  %v328_v63 = vld [vmem:[%s2975_s1 + $0x8a0] sm:$0xff] }
  0x83   :  { %861 = vmatpush.msrb.mxu2 %v278_v0  ;;  %880 = vmatpush.msrb.mxu3 %v295_v1  ;;  %v343_v0 = vld [vmem:[%s2975_s1 + $0x918] sm:$0xff]  ;;  %v360_v1 = vld [vmem:[%s2975_s1 + $0x9a0] sm:$0xff] }
  0x84   :  { %822 = vmatpush.msrb.mxu0 %v245_v2  ;;  %841 = vmatpush.msrb.mxu1 %v262_v3  ;;  %v310_v2 = vld [vmem:[%s2975_s1 + $0x810] sm:$0xff]  ;;  %v327_v3 = vld [vmem:[%s2975_s1 + $0x898] sm:$0xff] }
  0x85   :  { %862 = vmatpush.msrb.mxu2 %v277_v4  ;;  %881 = vmatpush.msrb.mxu3 %v294_v5  ;;  %v342_v4 = vld [vmem:[%s2975_s1 + $0x910] sm:$0xff]  ;;  %v359_v5 = vld [vmem:[%s2975_s1 + $0x998] sm:$0xff] }
  0x86   :  { %823 = vmatpush.msrb.mxu0 %v244_v6  ;;  %842 = vmatpush.msrb.mxu1 %v261_v7  ;;  %v309_v6 = vld [vmem:[%s2975_s1 + $0x808] sm:$0xff]  ;;  %v326_v7 = vld [vmem:[%s2975_s1 + $0x890] sm:$0xff] }
  0x87   :  { %863 = vmatpush.msrb.mxu2 %v276_v8  ;;  %882 = vmatpush.msrb.mxu3 %v293_v9  ;;  %v341_v8 = vld [vmem:[%s2975_s1 + $0x908] sm:$0xff]  ;;  %v358_v9 = vld [vmem:[%s2975_s1 + $0x990] sm:$0xff] }
  0x88   :  { %824 = vmatmul.f32.vlgmr.msrb.gmra.mxu0 %v32_v10  ;;  %864 = vmatmul.f32.vlgmr.msrb.gmra.mxu2 %v34_v11  ;;  %v308_v10 = vld [vmem:[%s2975_s1 + $0x800] sm:$0xff]  ;;  %v325_v11 = vld [vmem:[%s2975_s1 + $0x888] sm:$0xff] }
  0x89   :  { %888 = vmatpush.msra.mxu0 %v323_v12  ;;  %928 = vmatpush.msra.mxu2 %v355_v13  ;;  %v340_v12 = vld [vmem:[%s2975_s1 + $0x900] sm:$0xff]  ;;  %v357_v13 = vld [vmem:[%s2975_s1 + $0x988] sm:$0xff] }
  0x8a   :  { %843 = vmatpush.msrb.mxu1 %v260_v14  ;;  %883 = vmatpush.msrb.mxu3 %v292_v15  ;;  %v36_v14 = vld [vmem:[%s2976_s0 + $0x80] sm:$0xff]  ;;  %v38_v15 = vld [vmem:[%s2976_s0 + $0x90] sm:$0xff] }
  0x8b   :  { %844 = vmatmul.f32.vlgmr.msrb.gmra.mxu1 %v33_v16  ;;  %884 = vmatmul.f32.vlgmr.msrb.gmra.mxu3 %v35_v17  ;;  %v387_v16 = vld [vmem:[%s2975_s1 + $0xa78] sm:$0xff] }
  0x8c   :  { %889 = vmatpush.msra.mxu0 %v322_v18  ;;  %908 = vmatpush.msra.mxu1 %v339_v19  ;;  %v419_v17 = vld [vmem:[%s2975_s1 + $0xb78] sm:$0xff]  ;;  %v324_v18 = vld [vmem:[%s2975_s1 + $0x880] sm:$0xff] }
  0x8d   :  { %929 = vmatpush.msra.mxu2 %v354_v20  ;;  %948 = vmatpush.msra.mxu3 %v371_v21  ;;  %v356_v19 = vld [vmem:[%s2975_s1 + $0x980] sm:$0xff]  ;;  %v37_v20 = vld [vmem:[%s2976_s0 + $0x88] sm:$0xff]  ;;  %v39_v21 = vld [vmem:[%s2976_s0 + $0x98] sm:$0xff] }
  0x8e   :  { %890 = vmatpush.msra.mxu0 %v321_v22  ;;  %909 = vmatpush.msra.mxu1 %v338_v23  ;;  %v386_v22 = vld [vmem:[%s2975_s1 + $0xa70] sm:$0xff]  ;;  %v403_v23 = vld [vmem:[%s2975_s1 + $0xaf8] sm:$0xff] }
  0x8f   :  { %930 = vmatpush.msra.mxu2 %v353_v24  ;;  %949 = vmatpush.msra.mxu3 %v370_v25  ;;  %v418_v24 = vld [vmem:[%s2975_s1 + $0xb70] sm:$0xff]  ;;  %v435_v25 = vld [vmem:[%s2975_s1 + $0xbf8] sm:$0xff] }
  0x90   :  { %891 = vmatpush.msra.mxu0 %v320_v26  ;;  %910 = vmatpush.msra.mxu1 %v337_v27  ;;  %v385_v26 = vld [vmem:[%s2975_s1 + $0xa68] sm:$0xff]  ;;  %v402_v27 = vld [vmem:[%s2975_s1 + $0xaf0] sm:$0xff] }
  0x91   :  { %931 = vmatpush.msra.mxu2 %v352_v28  ;;  %950 = vmatpush.msra.mxu3 %v369_v29  ;;  %v417_v28 = vld [vmem:[%s2975_s1 + $0xb68] sm:$0xff]  ;;  %v434_v29 = vld [vmem:[%s2975_s1 + $0xbf0] sm:$0xff] }
  0x92   :  { %892 = vmatpush.msra.mxu0 %v319_v30  ;;  %911 = vmatpush.msra.mxu1 %v336_v31  ;;  %v384_v30 = vld [vmem:[%s2975_s1 + $0xa60] sm:$0xff]  ;;  %v401_v31 = vld [vmem:[%s2975_s1 + $0xae8] sm:$0xff] }
  0x93   :  { %932 = vmatpush.msra.mxu2 %v351_v32  ;;  %951 = vmatpush.msra.mxu3 %v368_v33  ;;  %v416_v32 = vld [vmem:[%s2975_s1 + $0xb60] sm:$0xff]  ;;  %v433_v33 = vld [vmem:[%s2975_s1 + $0xbe8] sm:$0xff] }
  0x94   :  { %893 = vmatpush.msra.mxu0 %v318_v34  ;;  %912 = vmatpush.msra.mxu1 %v335_v35  ;;  %v383_v34 = vld [vmem:[%s2975_s1 + $0xa58] sm:$0xff]  ;;  %v400_v35 = vld [vmem:[%s2975_s1 + $0xae0] sm:$0xff] }
  0x95   :  { %933 = vmatpush.msra.mxu2 %v350_v36  ;;  %952 = vmatpush.msra.mxu3 %v367_v37  ;;  %v415_v36 = vld [vmem:[%s2975_s1 + $0xb58] sm:$0xff]  ;;  %v432_v37 = vld [vmem:[%s2975_s1 + $0xbe0] sm:$0xff] }
  0x96   :  { %894 = vmatpush.msra.mxu0 %v317_v38  ;;  %913 = vmatpush.msra.mxu1 %v334_v39  ;;  %v382_v38 = vld [vmem:[%s2975_s1 + $0xa50] sm:$0xff]  ;;  %v399_v39 = vld [vmem:[%s2975_s1 + $0xad8] sm:$0xff] }
  0x97   :  { %934 = vmatpush.msra.mxu2 %v349_v40  ;;  %953 = vmatpush.msra.mxu3 %v366_v41  ;;  %v414_v40 = vld [vmem:[%s2975_s1 + $0xb50] sm:$0xff]  ;;  %v431_v41 = vld [vmem:[%s2975_s1 + $0xbd8] sm:$0xff] }
  0x98   :  { %895 = vmatpush.msra.mxu0 %v316_v42  ;;  %914 = vmatpush.msra.mxu1 %v333_v43  ;;  %v381_v42 = vld [vmem:[%s2975_s1 + $0xa48] sm:$0xff]  ;;  %v398_v43 = vld [vmem:[%s2975_s1 + $0xad0] sm:$0xff] }
  0x99   :  { %935 = vmatpush.msra.mxu2 %v348_v44  ;;  %954 = vmatpush.msra.mxu3 %v365_v45  ;;  %v413_v44 = vld [vmem:[%s2975_s1 + $0xb48] sm:$0xff]  ;;  %v430_v45 = vld [vmem:[%s2975_s1 + $0xbd0] sm:$0xff] }
  0x9a   :  { %896 = vmatpush.msra.mxu0 %v315_v46  ;;  %915 = vmatpush.msra.mxu1 %v332_v47  ;;  %v380_v46 = vld [vmem:[%s2975_s1 + $0xa40] sm:$0xff]  ;;  %v397_v47 = vld [vmem:[%s2975_s1 + $0xac8] sm:$0xff] }
  0x9b   :  { %936 = vmatpush.msra.mxu2 %v347_v48  ;;  %955 = vmatpush.msra.mxu3 %v364_v49  ;;  %v412_v48 = vld [vmem:[%s2975_s1 + $0xb40] sm:$0xff]  ;;  %v429_v49 = vld [vmem:[%s2975_s1 + $0xbc8] sm:$0xff] }
  0x9c   :  { %897 = vmatpush.msra.mxu0 %v314_v50  ;;  %916 = vmatpush.msra.mxu1 %v331_v51  ;;  %v379_v50 = vld [vmem:[%s2975_s1 + $0xa38] sm:$0xff]  ;;  %v396_v51 = vld [vmem:[%s2975_s1 + $0xac0] sm:$0xff] }
  0x9d   :  { %937 = vmatpush.msra.mxu2 %v346_v52  ;;  %956 = vmatpush.msra.mxu3 %v363_v53  ;;  %v411_v52 = vld [vmem:[%s2975_s1 + $0xb38] sm:$0xff]  ;;  %v428_v53 = vld [vmem:[%s2975_s1 + $0xbc0] sm:$0xff] }
  0x9e   :  { %898 = vmatpush.msra.mxu0 %v313_v54  ;;  %917 = vmatpush.msra.mxu1 %v330_v55  ;;  %v378_v54 = vld [vmem:[%s2975_s1 + $0xa30] sm:$0xff]  ;;  %v395_v55 = vld [vmem:[%s2975_s1 + $0xab8] sm:$0xff] }
  0x9f   :  { %938 = vmatpush.msra.mxu2 %v345_v56  ;;  %957 = vmatpush.msra.mxu3 %v362_v57  ;;  %v410_v56 = vld [vmem:[%s2975_s1 + $0xb30] sm:$0xff]  ;;  %v427_v57 = vld [vmem:[%s2975_s1 + $0xbb8] sm:$0xff] }
  0xa0   :  { %899 = vmatpush.msra.mxu0 %v312_v58  ;;  %918 = vmatpush.msra.mxu1 %v329_v59  ;;  %v377_v58 = vld [vmem:[%s2975_s1 + $0xa28] sm:$0xff]  ;;  %v394_v59 = vld [vmem:[%s2975_s1 + $0xab0] sm:$0xff] }
  0xa1   :  { %939 = vmatpush.msra.mxu2 %v344_v60  ;;  %958 = vmatpush.msra.mxu3 %v361_v61  ;;  %v409_v60 = vld [vmem:[%s2975_s1 + $0xb28] sm:$0xff]  ;;  %v426_v61 = vld [vmem:[%s2975_s1 + $0xbb0] sm:$0xff] }
  0xa2   :  { %900 = vmatpush.msra.mxu0 %v311_v62  ;;  %919 = vmatpush.msra.mxu1 %v328_v63  ;;  %v376_v62 = vld [vmem:[%s2975_s1 + $0xa20] sm:$0xff]  ;;  %v393_v63 = vld [vmem:[%s2975_s1 + $0xaa8] sm:$0xff] }
  0xa3   :  { %940 = vmatpush.msra.mxu2 %v343_v0  ;;  %959 = vmatpush.msra.mxu3 %v360_v1  ;;  %v408_v0 = vld [vmem:[%s2975_s1 + $0xb20] sm:$0xff]  ;;  %v425_v1 = vld [vmem:[%s2975_s1 + $0xba8] sm:$0xff] }
  0xa4   :  { %901 = vmatpush.msra.mxu0 %v310_v2  ;;  %920 = vmatpush.msra.mxu1 %v327_v3  ;;  %v375_v2 = vld [vmem:[%s2975_s1 + $0xa18] sm:$0xff]  ;;  %v392_v3 = vld [vmem:[%s2975_s1 + $0xaa0] sm:$0xff] }
  0xa5   :  { %941 = vmatpush.msra.mxu2 %v342_v4  ;;  %960 = vmatpush.msra.mxu3 %v359_v5  ;;  %v407_v4 = vld [vmem:[%s2975_s1 + $0xb18] sm:$0xff]  ;;  %v424_v5 = vld [vmem:[%s2975_s1 + $0xba0] sm:$0xff] }
  0xa6   :  { %902 = vmatpush.msra.mxu0 %v309_v6  ;;  %921 = vmatpush.msra.mxu1 %v326_v7  ;;  %v374_v6 = vld [vmem:[%s2975_s1 + $0xa10] sm:$0xff]  ;;  %v391_v7 = vld [vmem:[%s2975_s1 + $0xa98] sm:$0xff] }
  0xa7   :  { %942 = vmatpush.msra.mxu2 %v341_v8  ;;  %961 = vmatpush.msra.mxu3 %v358_v9  ;;  %v406_v8 = vld [vmem:[%s2975_s1 + $0xb10] sm:$0xff]  ;;  %v423_v9 = vld [vmem:[%s2975_s1 + $0xb98] sm:$0xff] }
  0xa8   :  { %903 = vmatpush.msra.mxu0 %v308_v10  ;;  %922 = vmatpush.msra.mxu1 %v325_v11  ;;  %v373_v10 = vld [vmem:[%s2975_s1 + $0xa08] sm:$0xff]  ;;  %v390_v11 = vld [vmem:[%s2975_s1 + $0xa90] sm:$0xff] }
  0xa9   :  { %943 = vmatpush.msra.mxu2 %v340_v12  ;;  %962 = vmatpush.msra.mxu3 %v357_v13  ;;  %v405_v12 = vld [vmem:[%s2975_s1 + $0xb08] sm:$0xff]  ;;  %v422_v13 = vld [vmem:[%s2975_s1 + $0xb90] sm:$0xff] }
  0xaa   :  { %904 = vmatmul.f32.vlgmr.msra.gmra.mxu0 %v36_v14  ;;  %944 = vmatmul.f32.vlgmr.msra.gmra.mxu2 %v38_v15  ;;  %v372_v14 = vld [vmem:[%s2975_s1 + $0xa00] sm:$0xff]  ;;  %v389_v15 = vld [vmem:[%s2975_s1 + $0xa88] sm:$0xff] }
  0xab   :  { %968 = vmatpush.msrb.mxu0 %v387_v16  ;;  %1008 = vmatpush.msrb.mxu2 %v419_v17  ;;  %v404_v16 = vld [vmem:[%s2975_s1 + $0xb00] sm:$0xff]  ;;  %v421_v17 = vld [vmem:[%s2975_s1 + $0xb88] sm:$0xff] }
  0xac   :  { %923 = vmatpush.msra.mxu1 %v324_v18  ;;  %963 = vmatpush.msra.mxu3 %v356_v19  ;;  %v40_v18 = vld [vmem:[%s2976_s0 + $0xa0] sm:$0xff]  ;;  %v42_v19 = vld [vmem:[%s2976_s0 + $0xb0] sm:$0xff] }
  0xad   :  { %924 = vmatmul.f32.vlgmr.msra.gmra.mxu1 %v37_v20  ;;  %964 = vmatmul.f32.vlgmr.msra.gmra.mxu3 %v39_v21  ;;  %v451_v20 = vld [vmem:[%s2975_s1 + $0xc78] sm:$0xff] }
  0xae   :  { %969 = vmatpush.msrb.mxu0 %v386_v22  ;;  %988 = vmatpush.msrb.mxu1 %v403_v23  ;;  %v483_v21 = vld [vmem:[%s2975_s1 + $0xd78] sm:$0xff]  ;;  %v388_v22 = vld [vmem:[%s2975_s1 + $0xa80] sm:$0xff] }
  0xaf   :  { %1009 = vmatpush.msrb.mxu2 %v418_v24  ;;  %1028 = vmatpush.msrb.mxu3 %v435_v25  ;;  %v420_v23 = vld [vmem:[%s2975_s1 + $0xb80] sm:$0xff]  ;;  %v41_v24 = vld [vmem:[%s2976_s0 + $0xa8] sm:$0xff]  ;;  %v43_v25 = vld [vmem:[%s2976_s0 + $0xb8] sm:$0xff] }
  0xb0   :  { %970 = vmatpush.msrb.mxu0 %v385_v26  ;;  %989 = vmatpush.msrb.mxu1 %v402_v27  ;;  %v450_v26 = vld [vmem:[%s2975_s1 + $0xc70] sm:$0xff]  ;;  %v467_v27 = vld [vmem:[%s2975_s1 + $0xcf8] sm:$0xff] }
  0xb1   :  { %1010 = vmatpush.msrb.mxu2 %v417_v28  ;;  %1029 = vmatpush.msrb.mxu3 %v434_v29  ;;  %v482_v28 = vld [vmem:[%s2975_s1 + $0xd70] sm:$0xff]  ;;  %v499_v29 = vld [vmem:[%s2975_s1 + $0xdf8] sm:$0xff] }
  0xb2   :  { %971 = vmatpush.msrb.mxu0 %v384_v30  ;;  %990 = vmatpush.msrb.mxu1 %v401_v31  ;;  %v449_v30 = vld [vmem:[%s2975_s1 + $0xc68] sm:$0xff]  ;;  %v466_v31 = vld [vmem:[%s2975_s1 + $0xcf0] sm:$0xff] }
  0xb3   :  { %1011 = vmatpush.msrb.mxu2 %v416_v32  ;;  %1030 = vmatpush.msrb.mxu3 %v433_v33  ;;  %v481_v32 = vld [vmem:[%s2975_s1 + $0xd68] sm:$0xff]  ;;  %v498_v33 = vld [vmem:[%s2975_s1 + $0xdf0] sm:$0xff] }
  0xb4   :  { %972 = vmatpush.msrb.mxu0 %v383_v34  ;;  %991 = vmatpush.msrb.mxu1 %v400_v35  ;;  %v448_v34 = vld [vmem:[%s2975_s1 + $0xc60] sm:$0xff]  ;;  %v465_v35 = vld [vmem:[%s2975_s1 + $0xce8] sm:$0xff] }
  0xb5   :  { %1012 = vmatpush.msrb.mxu2 %v415_v36  ;;  %1031 = vmatpush.msrb.mxu3 %v432_v37  ;;  %v480_v36 = vld [vmem:[%s2975_s1 + $0xd60] sm:$0xff]  ;;  %v497_v37 = vld [vmem:[%s2975_s1 + $0xde8] sm:$0xff] }
  0xb6   :  { %973 = vmatpush.msrb.mxu0 %v382_v38  ;;  %992 = vmatpush.msrb.mxu1 %v399_v39  ;;  %v447_v38 = vld [vmem:[%s2975_s1 + $0xc58] sm:$0xff]  ;;  %v464_v39 = vld [vmem:[%s2975_s1 + $0xce0] sm:$0xff] }
  0xb7   :  { %1013 = vmatpush.msrb.mxu2 %v414_v40  ;;  %1032 = vmatpush.msrb.mxu3 %v431_v41  ;;  %v479_v40 = vld [vmem:[%s2975_s1 + $0xd58] sm:$0xff]  ;;  %v496_v41 = vld [vmem:[%s2975_s1 + $0xde0] sm:$0xff] }
  0xb8   :  { %974 = vmatpush.msrb.mxu0 %v381_v42  ;;  %993 = vmatpush.msrb.mxu1 %v398_v43  ;;  %v446_v42 = vld [vmem:[%s2975_s1 + $0xc50] sm:$0xff]  ;;  %v463_v43 = vld [vmem:[%s2975_s1 + $0xcd8] sm:$0xff] }
  0xb9   :  { %1014 = vmatpush.msrb.mxu2 %v413_v44  ;;  %1033 = vmatpush.msrb.mxu3 %v430_v45  ;;  %v478_v44 = vld [vmem:[%s2975_s1 + $0xd50] sm:$0xff]  ;;  %v495_v45 = vld [vmem:[%s2975_s1 + $0xdd8] sm:$0xff] }
  0xba   :  { %975 = vmatpush.msrb.mxu0 %v380_v46  ;;  %994 = vmatpush.msrb.mxu1 %v397_v47  ;;  %v445_v46 = vld [vmem:[%s2975_s1 + $0xc48] sm:$0xff]  ;;  %v462_v47 = vld [vmem:[%s2975_s1 + $0xcd0] sm:$0xff] }
  0xbb   :  { %1015 = vmatpush.msrb.mxu2 %v412_v48  ;;  %1034 = vmatpush.msrb.mxu3 %v429_v49  ;;  %v477_v48 = vld [vmem:[%s2975_s1 + $0xd48] sm:$0xff]  ;;  %v494_v49 = vld [vmem:[%s2975_s1 + $0xdd0] sm:$0xff] }
  0xbc   :  { %976 = vmatpush.msrb.mxu0 %v379_v50  ;;  %995 = vmatpush.msrb.mxu1 %v396_v51  ;;  %v444_v50 = vld [vmem:[%s2975_s1 + $0xc40] sm:$0xff]  ;;  %v461_v51 = vld [vmem:[%s2975_s1 + $0xcc8] sm:$0xff] }
  0xbd   :  { %1016 = vmatpush.msrb.mxu2 %v411_v52  ;;  %1035 = vmatpush.msrb.mxu3 %v428_v53  ;;  %v476_v52 = vld [vmem:[%s2975_s1 + $0xd40] sm:$0xff]  ;;  %v493_v53 = vld [vmem:[%s2975_s1 + $0xdc8] sm:$0xff] }
  0xbe   :  { %977 = vmatpush.msrb.mxu0 %v378_v54  ;;  %996 = vmatpush.msrb.mxu1 %v395_v55  ;;  %v443_v54 = vld [vmem:[%s2975_s1 + $0xc38] sm:$0xff]  ;;  %v460_v55 = vld [vmem:[%s2975_s1 + $0xcc0] sm:$0xff] }
  0xbf   :  { %1017 = vmatpush.msrb.mxu2 %v410_v56  ;;  %1036 = vmatpush.msrb.mxu3 %v427_v57  ;;  %v475_v56 = vld [vmem:[%s2975_s1 + $0xd38] sm:$0xff]  ;;  %v492_v57 = vld [vmem:[%s2975_s1 + $0xdc0] sm:$0xff] }
  0xc0   :  { %978 = vmatpush.msrb.mxu0 %v377_v58  ;;  %997 = vmatpush.msrb.mxu1 %v394_v59  ;;  %v442_v58 = vld [vmem:[%s2975_s1 + $0xc30] sm:$0xff]  ;;  %v459_v59 = vld [vmem:[%s2975_s1 + $0xcb8] sm:$0xff] }
  0xc1   :  { %1018 = vmatpush.msrb.mxu2 %v409_v60  ;;  %1037 = vmatpush.msrb.mxu3 %v426_v61  ;;  %v474_v60 = vld [vmem:[%s2975_s1 + $0xd30] sm:$0xff]  ;;  %v491_v61 = vld [vmem:[%s2975_s1 + $0xdb8] sm:$0xff] }
  0xc2   :  { %979 = vmatpush.msrb.mxu0 %v376_v62  ;;  %998 = vmatpush.msrb.mxu1 %v393_v63  ;;  %v441_v62 = vld [vmem:[%s2975_s1 + $0xc28] sm:$0xff]  ;;  %v458_v63 = vld [vmem:[%s2975_s1 + $0xcb0] sm:$0xff] }
  0xc3   :  { %1019 = vmatpush.msrb.mxu2 %v408_v0  ;;  %1038 = vmatpush.msrb.mxu3 %v425_v1  ;;  %v473_v0 = vld [vmem:[%s2975_s1 + $0xd28] sm:$0xff]  ;;  %v490_v1 = vld [vmem:[%s2975_s1 + $0xdb0] sm:$0xff] }
  0xc4   :  { %980 = vmatpush.msrb.mxu0 %v375_v2  ;;  %999 = vmatpush.msrb.mxu1 %v392_v3  ;;  %v440_v2 = vld [vmem:[%s2975_s1 + $0xc20] sm:$0xff]  ;;  %v457_v3 = vld [vmem:[%s2975_s1 + $0xca8] sm:$0xff] }
  0xc5   :  { %1020 = vmatpush.msrb.mxu2 %v407_v4  ;;  %1039 = vmatpush.msrb.mxu3 %v424_v5  ;;  %v472_v4 = vld [vmem:[%s2975_s1 + $0xd20] sm:$0xff]  ;;  %v489_v5 = vld [vmem:[%s2975_s1 + $0xda8] sm:$0xff] }
  0xc6   :  { %981 = vmatpush.msrb.mxu0 %v374_v6  ;;  %1000 = vmatpush.msrb.mxu1 %v391_v7  ;;  %v439_v6 = vld [vmem:[%s2975_s1 + $0xc18] sm:$0xff]  ;;  %v456_v7 = vld [vmem:[%s2975_s1 + $0xca0] sm:$0xff] }
  0xc7   :  { %1021 = vmatpush.msrb.mxu2 %v406_v8  ;;  %1040 = vmatpush.msrb.mxu3 %v423_v9  ;;  %v471_v8 = vld [vmem:[%s2975_s1 + $0xd18] sm:$0xff]  ;;  %v488_v9 = vld [vmem:[%s2975_s1 + $0xda0] sm:$0xff] }
  0xc8   :  { %982 = vmatpush.msrb.mxu0 %v373_v10  ;;  %1001 = vmatpush.msrb.mxu1 %v390_v11  ;;  %v438_v10 = vld [vmem:[%s2975_s1 + $0xc10] sm:$0xff]  ;;  %v455_v11 = vld [vmem:[%s2975_s1 + $0xc98] sm:$0xff] }
  0xc9   :  { %1022 = vmatpush.msrb.mxu2 %v405_v12  ;;  %1041 = vmatpush.msrb.mxu3 %v422_v13  ;;  %v470_v12 = vld [vmem:[%s2975_s1 + $0xd10] sm:$0xff]  ;;  %v487_v13 = vld [vmem:[%s2975_s1 + $0xd98] sm:$0xff] }
  0xca   :  { %983 = vmatpush.msrb.mxu0 %v372_v14  ;;  %1002 = vmatpush.msrb.mxu1 %v389_v15  ;;  %v437_v14 = vld [vmem:[%s2975_s1 + $0xc08] sm:$0xff]  ;;  %v454_v15 = vld [vmem:[%s2975_s1 + $0xc90] sm:$0xff] }
  0xcb   :  { %1023 = vmatpush.msrb.mxu2 %v404_v16  ;;  %1042 = vmatpush.msrb.mxu3 %v421_v17  ;;  %v469_v16 = vld [vmem:[%s2975_s1 + $0xd08] sm:$0xff]  ;;  %v486_v17 = vld [vmem:[%s2975_s1 + $0xd90] sm:$0xff] }
  0xcc   :  { %984 = vmatmul.f32.vlgmr.msrb.gmra.mxu0 %v40_v18  ;;  %1024 = vmatmul.f32.vlgmr.msrb.gmra.mxu2 %v42_v19  ;;  %v436_v18 = vld [vmem:[%s2975_s1 + $0xc00] sm:$0xff]  ;;  %v453_v19 = vld [vmem:[%s2975_s1 + $0xc88] sm:$0xff] }
  0xcd   :  { %1048 = vmatpush.msra.mxu0 %v451_v20  ;;  %1088 = vmatpush.msra.mxu2 %v483_v21  ;;  %v468_v20 = vld [vmem:[%s2975_s1 + $0xd00] sm:$0xff]  ;;  %v485_v21 = vld [vmem:[%s2975_s1 + $0xd88] sm:$0xff] }
  0xce   :  { %1003 = vmatpush.msrb.mxu1 %v388_v22  ;;  %1043 = vmatpush.msrb.mxu3 %v420_v23  ;;  %v44_v22 = vld [vmem:[%s2976_s0 + $0xc0] sm:$0xff]  ;;  %v46_v23 = vld [vmem:[%s2976_s0 + $0xd0] sm:$0xff] }
  0xcf   :  { %1004 = vmatmul.f32.vlgmr.msrb.gmra.mxu1 %v41_v24  ;;  %1044 = vmatmul.f32.vlgmr.msrb.gmra.mxu3 %v43_v25  ;;  %v515_v24 = vld [vmem:[%s2975_s1 + $0xe78] sm:$0xff] }
  0xd0   :  { %1049 = vmatpush.msra.mxu0 %v450_v26  ;;  %1068 = vmatpush.msra.mxu1 %v467_v27  ;;  %v547_v25 = vld [vmem:[%s2975_s1 + $0xf78] sm:$0xff]  ;;  %v452_v26 = vld [vmem:[%s2975_s1 + $0xc80] sm:$0xff] }
  0xd1   :  { %1089 = vmatpush.msra.mxu2 %v482_v28  ;;  %1108 = vmatpush.msra.mxu3 %v499_v29  ;;  %v484_v27 = vld [vmem:[%s2975_s1 + $0xd80] sm:$0xff]  ;;  %v45_v28 = vld [vmem:[%s2976_s0 + $0xc8] sm:$0xff]  ;;  %v47_v29 = vld [vmem:[%s2976_s0 + $0xd8] sm:$0xff] }
  0xd2   :  { %1050 = vmatpush.msra.mxu0 %v449_v30  ;;  %1069 = vmatpush.msra.mxu1 %v466_v31  ;;  %v514_v30 = vld [vmem:[%s2975_s1 + $0xe70] sm:$0xff]  ;;  %v531_v31 = vld [vmem:[%s2975_s1 + $0xef8] sm:$0xff] }
  0xd3   :  { %1090 = vmatpush.msra.mxu2 %v481_v32  ;;  %1109 = vmatpush.msra.mxu3 %v498_v33  ;;  %v546_v32 = vld [vmem:[%s2975_s1 + $0xf70] sm:$0xff]  ;;  %v563_v33 = vld [vmem:[%s2975_s1 + $0xff8] sm:$0xff] }
  0xd4   :  { %1051 = vmatpush.msra.mxu0 %v448_v34  ;;  %1070 = vmatpush.msra.mxu1 %v465_v35  ;;  %v513_v34 = vld [vmem:[%s2975_s1 + $0xe68] sm:$0xff]  ;;  %v530_v35 = vld [vmem:[%s2975_s1 + $0xef0] sm:$0xff] }
  0xd5   :  { %1091 = vmatpush.msra.mxu2 %v480_v36  ;;  %1110 = vmatpush.msra.mxu3 %v497_v37  ;;  %v545_v36 = vld [vmem:[%s2975_s1 + $0xf68] sm:$0xff]  ;;  %v562_v37 = vld [vmem:[%s2975_s1 + $0xff0] sm:$0xff] }
  0xd6   :  { %1052 = vmatpush.msra.mxu0 %v447_v38  ;;  %1071 = vmatpush.msra.mxu1 %v464_v39  ;;  %v512_v38 = vld [vmem:[%s2975_s1 + $0xe60] sm:$0xff]  ;;  %v529_v39 = vld [vmem:[%s2975_s1 + $0xee8] sm:$0xff] }
  0xd7   :  { %1092 = vmatpush.msra.mxu2 %v479_v40  ;;  %1111 = vmatpush.msra.mxu3 %v496_v41  ;;  %v544_v40 = vld [vmem:[%s2975_s1 + $0xf60] sm:$0xff]  ;;  %v561_v41 = vld [vmem:[%s2975_s1 + $0xfe8] sm:$0xff] }
  0xd8   :  { %1053 = vmatpush.msra.mxu0 %v446_v42  ;;  %1072 = vmatpush.msra.mxu1 %v463_v43  ;;  %v511_v42 = vld [vmem:[%s2975_s1 + $0xe58] sm:$0xff]  ;;  %v528_v43 = vld [vmem:[%s2975_s1 + $0xee0] sm:$0xff] }
  0xd9   :  { %1093 = vmatpush.msra.mxu2 %v478_v44  ;;  %1112 = vmatpush.msra.mxu3 %v495_v45  ;;  %v543_v44 = vld [vmem:[%s2975_s1 + $0xf58] sm:$0xff]  ;;  %v560_v45 = vld [vmem:[%s2975_s1 + $0xfe0] sm:$0xff] }
  0xda   :  { %1054 = vmatpush.msra.mxu0 %v445_v46  ;;  %1073 = vmatpush.msra.mxu1 %v462_v47  ;;  %v510_v46 = vld [vmem:[%s2975_s1 + $0xe50] sm:$0xff]  ;;  %v527_v47 = vld [vmem:[%s2975_s1 + $0xed8] sm:$0xff] }
  0xdb   :  { %1094 = vmatpush.msra.mxu2 %v477_v48  ;;  %1113 = vmatpush.msra.mxu3 %v494_v49  ;;  %v542_v48 = vld [vmem:[%s2975_s1 + $0xf50] sm:$0xff]  ;;  %v559_v49 = vld [vmem:[%s2975_s1 + $0xfd8] sm:$0xff] }
  0xdc   :  { %1055 = vmatpush.msra.mxu0 %v444_v50  ;;  %1074 = vmatpush.msra.mxu1 %v461_v51  ;;  %v509_v50 = vld [vmem:[%s2975_s1 + $0xe48] sm:$0xff]  ;;  %v526_v51 = vld [vmem:[%s2975_s1 + $0xed0] sm:$0xff] }
  0xdd   :  { %1095 = vmatpush.msra.mxu2 %v476_v52  ;;  %1114 = vmatpush.msra.mxu3 %v493_v53  ;;  %v541_v52 = vld [vmem:[%s2975_s1 + $0xf48] sm:$0xff]  ;;  %v558_v53 = vld [vmem:[%s2975_s1 + $0xfd0] sm:$0xff] }
  0xde   :  { %1056 = vmatpush.msra.mxu0 %v443_v54  ;;  %1075 = vmatpush.msra.mxu1 %v460_v55  ;;  %v508_v54 = vld [vmem:[%s2975_s1 + $0xe40] sm:$0xff]  ;;  %v525_v55 = vld [vmem:[%s2975_s1 + $0xec8] sm:$0xff] }
  0xdf   :  { %1096 = vmatpush.msra.mxu2 %v475_v56  ;;  %1115 = vmatpush.msra.mxu3 %v492_v57  ;;  %v540_v56 = vld [vmem:[%s2975_s1 + $0xf40] sm:$0xff]  ;;  %v557_v57 = vld [vmem:[%s2975_s1 + $0xfc8] sm:$0xff] }
  0xe0   :  { %1057 = vmatpush.msra.mxu0 %v442_v58  ;;  %1076 = vmatpush.msra.mxu1 %v459_v59  ;;  %v507_v58 = vld [vmem:[%s2975_s1 + $0xe38] sm:$0xff]  ;;  %v524_v59 = vld [vmem:[%s2975_s1 + $0xec0] sm:$0xff] }
  0xe1   :  { %1097 = vmatpush.msra.mxu2 %v474_v60  ;;  %1116 = vmatpush.msra.mxu3 %v491_v61  ;;  %v539_v60 = vld [vmem:[%s2975_s1 + $0xf38] sm:$0xff]  ;;  %v556_v61 = vld [vmem:[%s2975_s1 + $0xfc0] sm:$0xff] }
  0xe2   :  { %1058 = vmatpush.msra.mxu0 %v441_v62  ;;  %1077 = vmatpush.msra.mxu1 %v458_v63  ;;  %v506_v62 = vld [vmem:[%s2975_s1 + $0xe30] sm:$0xff]  ;;  %v523_v63 = vld [vmem:[%s2975_s1 + $0xeb8] sm:$0xff] }
  0xe3   :  { %1098 = vmatpush.msra.mxu2 %v473_v0  ;;  %1117 = vmatpush.msra.mxu3 %v490_v1  ;;  %v538_v0 = vld [vmem:[%s2975_s1 + $0xf30] sm:$0xff]  ;;  %v555_v1 = vld [vmem:[%s2975_s1 + $0xfb8] sm:$0xff] }
  0xe4   :  { %1059 = vmatpush.msra.mxu0 %v440_v2  ;;  %1078 = vmatpush.msra.mxu1 %v457_v3  ;;  %v505_v2 = vld [vmem:[%s2975_s1 + $0xe28] sm:$0xff]  ;;  %v522_v3 = vld [vmem:[%s2975_s1 + $0xeb0] sm:$0xff] }
  0xe5   :  { %1099 = vmatpush.msra.mxu2 %v472_v4  ;;  %1118 = vmatpush.msra.mxu3 %v489_v5  ;;  %v537_v4 = vld [vmem:[%s2975_s1 + $0xf28] sm:$0xff]  ;;  %v554_v5 = vld [vmem:[%s2975_s1 + $0xfb0] sm:$0xff] }
  0xe6   :  { %1060 = vmatpush.msra.mxu0 %v439_v6  ;;  %1079 = vmatpush.msra.mxu1 %v456_v7  ;;  %v504_v6 = vld [vmem:[%s2975_s1 + $0xe20] sm:$0xff]  ;;  %v521_v7 = vld [vmem:[%s2975_s1 + $0xea8] sm:$0xff] }
  0xe7   :  { %1100 = vmatpush.msra.mxu2 %v471_v8  ;;  %1119 = vmatpush.msra.mxu3 %v488_v9  ;;  %v536_v8 = vld [vmem:[%s2975_s1 + $0xf20] sm:$0xff]  ;;  %v553_v9 = vld [vmem:[%s2975_s1 + $0xfa8] sm:$0xff] }
  0xe8   :  { %1061 = vmatpush.msra.mxu0 %v438_v10  ;;  %1080 = vmatpush.msra.mxu1 %v455_v11  ;;  %v503_v10 = vld [vmem:[%s2975_s1 + $0xe18] sm:$0xff]  ;;  %v520_v11 = vld [vmem:[%s2975_s1 + $0xea0] sm:$0xff] }
  0xe9   :  { %1101 = vmatpush.msra.mxu2 %v470_v12  ;;  %1120 = vmatpush.msra.mxu3 %v487_v13  ;;  %v535_v12 = vld [vmem:[%s2975_s1 + $0xf18] sm:$0xff]  ;;  %v552_v13 = vld [vmem:[%s2975_s1 + $0xfa0] sm:$0xff] }
  0xea   :  { %1062 = vmatpush.msra.mxu0 %v437_v14  ;;  %1081 = vmatpush.msra.mxu1 %v454_v15  ;;  %v502_v14 = vld [vmem:[%s2975_s1 + $0xe10] sm:$0xff]  ;;  %v519_v15 = vld [vmem:[%s2975_s1 + $0xe98] sm:$0xff] }
  0xeb   :  { %1102 = vmatpush.msra.mxu2 %v469_v16  ;;  %1121 = vmatpush.msra.mxu3 %v486_v17  ;;  %v534_v16 = vld [vmem:[%s2975_s1 + $0xf10] sm:$0xff]  ;;  %v551_v17 = vld [vmem:[%s2975_s1 + $0xf98] sm:$0xff] }
  0xec   :  { %1063 = vmatpush.msra.mxu0 %v436_v18  ;;  %1082 = vmatpush.msra.mxu1 %v453_v19  ;;  %v501_v18 = vld [vmem:[%s2975_s1 + $0xe08] sm:$0xff]  ;;  %v518_v19 = vld [vmem:[%s2975_s1 + $0xe90] sm:$0xff] }
  0xed   :  { %1103 = vmatpush.msra.mxu2 %v468_v20  ;;  %1122 = vmatpush.msra.mxu3 %v485_v21  ;;  %v533_v20 = vld [vmem:[%s2975_s1 + $0xf08] sm:$0xff]  ;;  %v550_v21 = vld [vmem:[%s2975_s1 + $0xf90] sm:$0xff] }
  0xee   :  { %1064 = vmatmul.f32.vlgmr.msra.gmra.mxu0 %v44_v22  ;;  %1104 = vmatmul.f32.vlgmr.msra.gmra.mxu2 %v46_v23  ;;  %v500_v22 = vld [vmem:[%s2975_s1 + $0xe00] sm:$0xff]  ;;  %v517_v23 = vld [vmem:[%s2975_s1 + $0xe88] sm:$0xff] }
  0xef   :  { %1128 = vmatpush.msrb.mxu0 %v515_v24  ;;  %1168 = vmatpush.msrb.mxu2 %v547_v25  ;;  %v532_v24 = vld [vmem:[%s2975_s1 + $0xf00] sm:$0xff]  ;;  %v549_v25 = vld [vmem:[%s2975_s1 + $0xf88] sm:$0xff] }
  0xf0   :  { %1083 = vmatpush.msra.mxu1 %v452_v26  ;;  %1123 = vmatpush.msra.mxu3 %v484_v27  ;;  %v48_v26 = vld [vmem:[%s2976_s0 + $0xe0] sm:$0xff]  ;;  %v50_v27 = vld [vmem:[%s2976_s0 + $0xf0] sm:$0xff] }
  0xf1   :  { %1084 = vmatmul.f32.vlgmr.msra.gmra.mxu1 %v45_v28  ;;  %1124 = vmatmul.f32.vlgmr.msra.gmra.mxu3 %v47_v29  ;;  %v516_v28 = vld [vmem:[%s2975_s1 + $0xe80] sm:$0xff] }
  0xf2   :  { %1129 = vmatpush.msrb.mxu0 %v514_v30  ;;  %1148 = vmatpush.msrb.mxu1 %v531_v31  ;;  %v548_v29 = vld [vmem:[%s2975_s1 + $0xf80] sm:$0xff]  ;;  %v49_v30 = vld [vmem:[%s2976_s0 + $0xe8] sm:$0xff]  ;;  %v51_v31 = vld [vmem:[%s2976_s0 + $0xf8] sm:$0xff] }
  0xf3   :  { %1169 = vmatpush.msrb.mxu2 %v546_v32  ;;  %1188 = vmatpush.msrb.mxu3 %v563_v33  ;;  %v1254_v32 = vld [vmem:[%s2977_s2] ss:$0 sm:$0xff]  ;;  %v585_v33 = vpop.f32.mrf.mxu0 }
  0xf4   :  { %1130 = vmatpush.msrb.mxu0 %v513_v34  ;;  %1149 = vmatpush.msrb.mxu1 %v530_v35  ;;  %v586_v34 = vadd.f32 %v1254_v32, %v585_v33  ;;  %v605_v35 = vpop.f32.mrf.mxu1 }
  0xf5   :  { %1170 = vmatpush.msrb.mxu2 %v545_v36  ;;  %1189 = vmatpush.msrb.mxu3 %v562_v37  ;;  %v625_v37 = vpop.f32.mrf.mxu2 }
  0xf6   :  { %1131 = vmatpush.msrb.mxu0 %v512_v38  ;;  %1150 = vmatpush.msrb.mxu1 %v529_v39  ;;  %v606_v36 = vadd.f32 %v605_v35, %v586_v34  ;;  %v645_v39 = vpop.f32.mrf.mxu3 }
  0xf7   :  { %1171 = vmatpush.msrb.mxu2 %v544_v40  ;;  %1190 = vmatpush.msrb.mxu3 %v561_v41 }
  0xf8   :  { %1132 = vmatpush.msrb.mxu0 %v511_v42  ;;  %1151 = vmatpush.msrb.mxu1 %v528_v43  ;;  %v626_v38 = vadd.f32 %v625_v37, %v606_v36 }
  0xf9   :  { %1172 = vmatpush.msrb.mxu2 %v543_v44  ;;  %1191 = vmatpush.msrb.mxu3 %v560_v45 }
  0xfa   :  { %1133 = vmatpush.msrb.mxu0 %v510_v46  ;;  %1152 = vmatpush.msrb.mxu1 %v527_v47  ;;  %v646_v40 = vadd.f32 %v645_v39, %v626_v38 }
  0xfb   :  { %1173 = vmatpush.msrb.mxu2 %v542_v48  ;;  %1192 = vmatpush.msrb.mxu3 %v559_v49  ;;  %v665_v41 = vpop.f32.mrf.mxu0 }
  0xfc   :  { %1134 = vmatpush.msrb.mxu0 %v509_v50  ;;  %1153 = vmatpush.msrb.mxu1 %v526_v51  ;;  %v666_v42 = vadd.f32 %v665_v41, %v646_v40  ;;  %v685_v43 = vpop.f32.mrf.mxu1 }
  0xfd   :  { %1174 = vmatpush.msrb.mxu2 %v541_v52  ;;  %1193 = vmatpush.msrb.mxu3 %v558_v53  ;;  %v705_v45 = vpop.f32.mrf.mxu2  ;;  %v1224_v53 = vld [vmem:[%s2979_s3 + $0x78] sm:$0xff] }
  0xfe   :  { %1135 = vmatpush.msrb.mxu0 %v508_v54  ;;  %1154 = vmatpush.msrb.mxu1 %v525_v55  ;;  %v686_v44 = vadd.f32 %v685_v43, %v666_v42  ;;  %v725_v47 = vpop.f32.mrf.mxu3  ;;  %v1223_v54 = vld [vmem:[%s2979_s3 + $0x70] sm:$0xff] }
  0xff   :  { %1175 = vmatpush.msrb.mxu2 %v540_v56  ;;  %1194 = vmatpush.msrb.mxu3 %v557_v57  ;;  %v1222_v56 = vld [vmem:[%s2979_s3 + $0x68] sm:$0xff] }
 0x100   :  { %1136 = vmatpush.msrb.mxu0 %v507_v58  ;;  %1155 = vmatpush.msrb.mxu1 %v524_v59  ;;  %v706_v46 = vadd.f32 %v705_v45, %v686_v44  ;;  %v1221_v59 = vld [vmem:[%s2979_s3 + $0x60] sm:$0xff] }
 0x101   :  { %1176 = vmatpush.msrb.mxu2 %v539_v60  ;;  %1195 = vmatpush.msrb.mxu3 %v556_v61  ;;  %v1220_v61 = vld [vmem:[%s2979_s3 + $0x58] sm:$0xff] }
 0x102   :  { %1137 = vmatpush.msrb.mxu0 %v506_v62  ;;  %1156 = vmatpush.msrb.mxu1 %v523_v63  ;;  %v726_v49 = vadd.f32 %v725_v47, %v706_v46  ;;  %v1219_v63 = vld [vmem:[%s2979_s3 + $0x50] sm:$0xff] }
 0x103   :  { %1177 = vmatpush.msrb.mxu2 %v538_v0  ;;  %1196 = vmatpush.msrb.mxu3 %v555_v1  ;;  %v745_v48 = vpop.f32.mrf.mxu0 }
 0x104   :  { %1138 = vmatpush.msrb.mxu0 %v505_v2  ;;  %1157 = vmatpush.msrb.mxu1 %v522_v3  ;;  %v746_v50 = vadd.f32 %v745_v48, %v726_v49  ;;  %v765_v51 = vpop.f32.mrf.mxu1  ;;  %v1218_v2 = vld [vmem:[%s2979_s3 + $0x48] sm:$0xff] }
 0x105   :  { %1178 = vmatpush.msrb.mxu2 %v537_v4  ;;  %1197 = vmatpush.msrb.mxu3 %v554_v5  ;;  %v785_v52 = vpop.f32.mrf.mxu2  ;;  %v1217_v4 = vld [vmem:[%s2979_s3 + $0x40] sm:$0xff] }
 0x106   :  { %1139 = vmatpush.msrb.mxu0 %v504_v6  ;;  %1158 = vmatpush.msrb.mxu1 %v521_v7  ;;  %v766_v55 = vadd.f32 %v765_v51, %v746_v50  ;;  %v805_v58 = vpop.f32.mrf.mxu3  ;;  %v1216_v6 = vld [vmem:[%s2979_s3 + $0x38] sm:$0xff]  ;;  %v1255_v50 = vld [vmem:[%s2978_s4] ss:$0 sm:$0xff] }
 0x107   :  { %1179 = vmatpush.msrb.mxu2 %v536_v8  ;;  %1198 = vmatpush.msrb.mxu3 %v553_v9 }
 0x108   :  { %1140 = vmatpush.msrb.mxu0 %v503_v10  ;;  %1159 = vmatpush.msrb.mxu1 %v520_v11  ;;  %v786_v57 = vadd.f32 %v785_v52, %v766_v55 }
 0x109   :  { %1180 = vmatpush.msrb.mxu2 %v535_v12  ;;  %1199 = vmatpush.msrb.mxu3 %v552_v13  ;;  %v1215_v13 = vld [vmem:[%s2979_s3 + $0x30] sm:$0xff] }
 0x10a   :  { %1141 = vmatpush.msrb.mxu0 %v502_v14  ;;  %1160 = vmatpush.msrb.mxu1 %v519_v15  ;;  %v806_v62 = vadd.f32 %v805_v58, %v786_v57 }
 0x10b   :  { %1181 = vmatpush.msrb.mxu2 %v534_v16  ;;  %1200 = vmatpush.msrb.mxu3 %v551_v17  ;;  %v825_v60 = vpop.f32.mrf.mxu0  ;;  %v1214_v16 = vld [vmem:[%s2979_s3 + $0x28] sm:$0xff] }
 0x10c   :  { %1142 = vmatpush.msrb.mxu0 %v501_v18  ;;  %1161 = vmatpush.msrb.mxu1 %v518_v19  ;;  %v826_v0 = vadd.f32 %v825_v60, %v806_v62  ;;  %v845_v1 = vpop.f32.mrf.mxu1  ;;  %v1213_v18 = vld [vmem:[%s2979_s3 + $0x20] sm:$0xff] }
 0x10d   :  { %1182 = vmatpush.msrb.mxu2 %v533_v20  ;;  %1201 = vmatpush.msrb.mxu3 %v550_v21  ;;  %v865_v3 = vpop.f32.mrf.mxu2  ;;  %v1212_v20 = vld [vmem:[%s2979_s3 + $0x18] sm:$0xff] }
 0x10e   :  { %1143 = vmatpush.msrb.mxu0 %v500_v22  ;;  %1162 = vmatpush.msrb.mxu1 %v517_v23  ;;  %v846_v5 = vadd.f32 %v845_v1, %v826_v0  ;;  %v885_v8 = vpop.f32.mrf.mxu3  ;;  %v1211_v23 = vld [vmem:[%s2979_s3 + $0x10] sm:$0xff] }
 0x10f   :  { %1183 = vmatpush.msrb.mxu2 %v532_v24  ;;  %1202 = vmatpush.msrb.mxu3 %v549_v25  ;;  %v1210_v25 = vld [vmem:[%s2979_s3 + $0x8] sm:$0xff] }
 0x110   :  { %1144 = vmatmul.f32.vlgmr.msrb.gmra.mxu0 %v48_v26  ;;  %1184 = vmatmul.f32.vlgmr.msrb.gmra.mxu2 %v50_v27  ;;  %v866_v7 = vadd.f32 %v865_v3, %v846_v5  ;;  %v1209_v27 = vld [vmem:[%s2979_s3] sm:$0xff] }
 0x111   :  { %1163 = vmatpush.msrb.mxu1 %v516_v28  ;;  %1203 = vmatpush.msrb.mxu3 %v548_v29 }
 0x112   :  { %1164 = vmatmul.f32.vlgmr.msrb.gmra.mxu1 %v49_v30  ;;  %1204 = vmatmul.f32.vlgmr.msrb.gmra.mxu3 %v51_v31  ;;  %v886_v10 = vadd.f32 %v885_v8, %v866_v7 }
 0x113   :  { %1229 = vmatpush.msra.mxu0 %v1224_v53 }
 0x115   :  { %1230 = vmatpush.msra.mxu0 %v1223_v54 }
 0x117   :  { %1231 = vmatpush.msra.mxu0 %v1222_v56 }
 0x119   :  { %1232 = vmatpush.msra.mxu0 %v1221_v59 }
 0x11b   :  { %1233 = vmatpush.msra.mxu0 %v1220_v61 }
 0x11d   :  { %1234 = vmatpush.msra.mxu0 %v1219_v63 }
 0x11f   :  { %1235 = vmatpush.msra.mxu0 %v1218_v2 }
 0x121   :  { %1236 = vmatpush.msra.mxu0 %v1217_v4 }
 0x123   :  { %1237 = vmatpush.msra.mxu0 %v1216_v6 }
 0x125   :  { %1238 = vmatpush.msra.mxu0 %v1215_v13 }
 0x127   :  { %v905_v9 = vpop.f32.mrf.mxu0  ;;  %1239 = vmatpush.msra.mxu0 %v1214_v16 }
 0x128   :  { %v906_v11 = vadd.f32 %v905_v9, %v886_v10 }
 0x129   :  { %1240 = vmatpush.msra.mxu0 %v1213_v18 }
 0x12a   :  { %v925_v12 = vpop.f32.mrf.mxu1 }
 0x12b   :  { %v926_v15 = vadd.f32 %v925_v12, %v906_v11  ;;  %1241 = vmatpush.msra.mxu0 %v1212_v20 }
 0x12d   :  { %v945_v14 = vpop.f32.mrf.mxu2  ;;  %1242 = vmatpush.msra.mxu0 %v1211_v23 }
 0x12e   :  { %v946_v17 = vadd.f32 %v945_v14, %v926_v15 }
 0x12f   :  { %1243 = vmatpush.msra.mxu0 %v1210_v25 }
 0x130   :  { %v965_v19 = vpop.f32.mrf.mxu3 }
 0x131   :  { %v966_v22 = vadd.f32 %v965_v19, %v946_v17  ;;  %1244 = vmatpush.msra.mxu0 %v1209_v27 }
 0x149   :  { %v985_v21 = vpop.f32.mrf.mxu0 }
 0x14a   :  { %v986_v24 = vadd.f32 %v985_v21, %v966_v22 }
 0x14c   :  { %v1005_v26 = vpop.f32.mrf.mxu1 }
 0x14d   :  { %v1006_v29 = vadd.f32 %v1005_v26, %v986_v24 }
 0x14f   :  { %v1025_v28 = vpop.f32.mrf.mxu2 }
 0x150   :  { %v1026_v30 = vadd.f32 %v1025_v28, %v1006_v29 }
 0x152   :  { %v1045_v31 = vpop.f32.mrf.mxu3 }
 0x153   :  { %v1046_v33 = vadd.f32 %v1045_v31, %v1026_v30 }
 0x16b   :  { %v1065_v32 = vpop.f32.mrf.mxu0 }
 0x16c   :  { %v1066_v34 = vadd.f32 %v1065_v32, %v1046_v33 }
 0x16e   :  { %v1085_v35 = vpop.f32.mrf.mxu1 }
 0x16f   :  { %v1086_v37 = vadd.f32 %v1085_v35, %v1066_v34 }
 0x171   :  { %v1105_v36 = vpop.f32.mrf.mxu2 }
 0x172   :  { %v1106_v38 = vadd.f32 %v1105_v36, %v1086_v37 }
 0x174   :  { %v1125_v39 = vpop.f32.mrf.mxu3 }
 0x175   :  { %v1126_v40 = vadd.f32 %v1125_v39, %v1106_v38 }
 0x18d   :  { %v1145_v41 = vpop.f32.mrf.mxu0 }
 0x18e   :  { %v1146_v42 = vadd.f32 %v1145_v41, %v1126_v40 }
 0x18f   :  { %v1165_v43 = vpop.f32.mrf.mxu1 }
 0x190   :  { %v1166_v44 = vadd.f32 %v1165_v43, %v1146_v42 }
 0x193   :  { %v1185_v45 = vpop.f32.mrf.mxu2 }
 0x194   :  { %v1186_v46 = vadd.f32 %v1185_v45, %v1166_v44 }
 0x195   :  { %v1205_v47 = vpop.f32.mrf.mxu3 }
 0x196   :  { %v1206_v48 = vadd.f32 %v1205_v47, %v1186_v46 }
 0x198   :  { %v1208_v49 = vmax.f32 %v1206_v48, 0.0 }
 0x19a   :  { %1245 = vmatmul.f32.vlgmr.msra.gmra.mxu0 %v1208_v49 }
 0x217   :  { %v1246_v51 = vpop.f32.mrf.mxu0 }
 0x218   :  { %v1247_v52 = vadd.f32 %v1255_v50, %v1246_v51 }
 0x21a   :  { %1249 = vst [vmem:[%s2980_s5] sm:$0xff] %v1247_v52 }

// kernel: cnn_forward.2
= control target key start
LH: loop header
LB: loop body
LE: loop exit
PB: predicated region body
PF: predicated region fallthrough
CT: control target
= control target key end

     0   :  { %v148_v0 = vlaneseq  ;;  %s4039_s24 = smov 12   ;;  %s4040_s29 = smov 24   ;;  %vm1188_vm2 = vcmask 1043456   ;;  %vm856_vm3 = vcmask 97280   ;;  %vm921_vm4 = vcmask 195584   ;;  %s7116_s0 = inlined_call_operand.vmem [shape: f32[512,12], index: 0, kind: input, shape index: {}]   ;;  %s7117_s1 = inlined_call_operand.vmem [shape: f32[36,32], index: 1, kind: input, shape index: {}]   ;;  %s7118_s2 = inlined_call_operand.vmem [shape: f32[1,32], index: 2, kind: input, shape index: {}]   ;;  %s7119_s3 = inlined_call_operand.vmem [shape: f32[96,64], index: 3, kind: input, shape index: {}]   ;;  %s7120_s4 = inlined_call_operand.vmem [shape: f32[1,64], index: 4, kind: input, shape index: {}]   ;;  %s7121_s5 = inlined_call_operand.vmem [shape: f32[512,64], index: 5, kind: output, shape index: {}]  }
   0x1   :  { %v4076_v1 = vld [vmem:[%s7116_s0 + $0x10] sm:$0xff]  ;;  %v4081_v2 = vld [vmem:[%s7116_s0 + $0x8] sm:$0xff]  ;;  %v4086_v3 = vld [vmem:[%s7116_s0] sm:$0xff]  ;;  %vm995_vm5 = vcmask 293888   ;;  %s4041_s16 = smov 32   ;;  %vm3192_vm8 = vcmask 261120  }
   0x2   :  { %412 = vrot.lane.b32.xlu2 %v4076_v1, %s4039_s24  ;;  %410 = vrot.lane.b32.xlu1 %v4081_v2, %s4039_s24  ;;  %v4095_v4 = vld [vmem:[%s7116_s0 + $0x18] sm:$0xff]  ;;  %v217_v5 = vrot.slane %v4076_v1, 1  ;;  %v216_v6 = vrot.slane %v4081_v2, 1  ;;  %v4101_v7 = vshrl.u32 %v148_v0, 7  ;;  %v215_v9 = vrot.slane %v4086_v3, 1  ;;  %v4117_v13 = vld [vmem:[%s7116_s0 + $0x20] sm:$0xff] }
   0x3   :  { %408 = vrot.lane.b32.xlu0 %v4086_v3, %s4039_s24  ;;  %v218_v8 = vrot.slane %v4095_v4, 1  ;;  %v219_v14 = vrot.slane %v4117_v13, 1  ;;  %v4128_v16 = vld [vmem:[%s7116_s0 + $0x28] sm:$0xff]  ;;  %v4133_v17 = vld [vmem:[%s7116_s0 + $0x30] sm:$0xff]  ;;  %v4149_v22 = vld [vmem:[%s7116_s0 + $0x38] sm:$0xff]  ;;  %v86_v41 = vrot.slane %v4076_v1, 7 }
   0x4   :  { %vm279_vm0 = vcmp.lt.s32.totalorder %v4101_v7, 7  ;;  %v220_v18 = vrot.slane %v4128_v16, 1  ;;  %v221_v19 = vrot.slane %v4133_v17, 1  ;;  %v222_v23 = vrot.slane %v4149_v22, 1  ;;  %v4161_v25 = vld [vmem:[%s7116_s0 + $0x108] sm:$0xff]  ;;  %v4166_v26 = vld [vmem:[%s7116_s0 + $0x110] sm:$0xff] }
   0x5   :  { %v340_v10 = vsel %vm279_vm0, %v217_v5, %v218_v8  ;;  %v341_v11 = vsel %vm279_vm0, %v216_v6, %v217_v5  ;;  %v342_v12 = vsel %vm279_vm0, %v215_v9, %v216_v6  ;;  %v339_v15 = vsel %vm279_vm0, %v218_v8, %v219_v14  ;;  %v4171_v27 = vld [vmem:[%s7116_s0 + $0x40] sm:$0xff]  ;;  %v4190_v33 = vld [vmem:[%s7116_s0 + $0x48] sm:$0xff]  ;;  %v4202_v36 = vld [vmem:[%s7116_s0 + $0x50] sm:$0xff] }
   0x6   :  { %v337_v20 = vsel %vm279_vm0, %v220_v18, %v221_v19  ;;  %v338_v21 = vsel %vm279_vm0, %v219_v14, %v220_v18  ;;  %v336_v24 = vsel %vm279_vm0, %v221_v19, %v222_v23  ;;  %v248_v28 = vrot.slane %v4161_v25, 1  ;;  %v4207_v37 = vld [vmem:[%s7116_s0 + $0x118] sm:$0xff]  ;;  %v4224_v43 = vld [vmem:[%s7116_s0 + $0x120] sm:$0xff]  ;;  %v4244_v48 = vld [vmem:[%s7116_s0 + $0x128] sm:$0xff] }
   0x7   :  { %v249_v29 = vrot.slane %v4166_v26, 1  ;;  %v223_v30 = vrot.slane %v4171_v27, 1  ;;  %v224_v34 = vrot.slane %v4190_v33, 1  ;;  %v225_v38 = vrot.slane %v4202_v36, 1  ;;  %v4249_v49 = vld [vmem:[%s7116_s0 + $0x58] sm:$0xff]  ;;  %v4265_v54 = vld [vmem:[%s7116_s0 + $0x60] sm:$0xff] }
   0x8   :  { %v250_v39 = vrot.slane %v4207_v37, 1  ;;  %v85_v44 = vrot.slane %v4081_v2, 7  ;;  %v251_v45 = vrot.slane %v4224_v43, 1  ;;  %vm150_vm1 = vcmp.lt.s32.totalorder %v4101_v7, 1  ;;  %v4278_v58 = vld [vmem:[%s7116_s0 + $0x68] sm:$0xff]  ;;  %v4283_v59 = vld [vmem:[%s7116_s0 + $0x130] sm:$0xff] }
   0x9   :  { %v309_v31 = vsel %vm279_vm0, %v248_v28, %v249_v29  ;;  %v335_v32 = vsel %vm279_vm0, %v222_v23, %v223_v30  ;;  %v334_v35 = vsel %vm279_vm0, %v223_v30, %v224_v34  ;;  %v333_v40 = vsel %vm279_vm0, %v224_v34, %v225_v38  ;;  %v990_v63 = vld [vmem:[%s7117_s1 + $0x20] sm:$0xf]  ;;  %v989_v0 = vld [vmem:[%s7117_s1 + $0x18] sm:$0xff]  ;;  %v988_v8 = vld [vmem:[%s7117_s1 + $0x10] sm:$0xff] }
   0xa   :  { %668 = vrot.lane.b32.xlu2 %v340_v10, %s4040_s29  ;;  %666 = vrot.lane.b32.xlu1 %v341_v11, %s4040_s29  ;;  %v308_v42 = vsel %vm279_vm0, %v249_v29, %v250_v39  ;;  %v4237_v46 = vsel %vm150_vm1, %v85_v44, %v86_v41  ;;  %v307_v47 = vsel %vm279_vm0, %v250_v39, %v251_v45  ;;  %v252_v50 = vrot.slane %v4244_v48, 1  ;;  %v4311_v6 = vld [vmem:[%s7116_s0 + $0x138] sm:$0xff]  ;;  %v987_v11 = vld [vmem:[%s7117_s1 + $0x8] sm:$0xff] }
   0xb   :  { %664 = vrot.lane.b32.xlu0 %v342_v12, %s4040_s29  ;;  %v226_v51 = vrot.slane %v4249_v49, 1  ;;  %v227_v55 = vrot.slane %v4265_v54, 1  ;;  %v84_v57 = vrot.slane %v4086_v3, 7  ;;  %v228_v60 = vrot.slane %v4278_v58, 1  ;;  %3872 = vmatpush.msk.msra.mxu0 %vm1188_vm2, %v990_v63  ;;  %v986_v14 = vld [vmem:[%s7117_s1] sm:$0xff]  ;;  %v4339_v19 = vld [vmem:[%s7116_s0 + $0x70] sm:$0xff] }
   0xc   :  { %v306_v52 = vsel %vm279_vm0, %v251_v45, %v252_v50  ;;  %v253_v61 = vrot.slane %v4283_v59, 1  ;;  %4001 = vmatpush.msk.msra.mxu3 %vm1188_vm2, %v990_v63  ;;  %v254_v10 = vrot.slane %v4311_v6, 1  ;;  %v4334_v18 = vld [vmem:[%s7116_s0 + $0x140] sm:$0xff]  ;;  %v229_v23 = vrot.slane %v4339_v19, 1  ;;  %v4357_v30 = vld [vmem:[%s7116_s0 + $0x78] sm:$0xff] }
   0xd   :  { %v332_v53 = vsel %vm279_vm0, %v225_v38, %v226_v51  ;;  %v331_v56 = vsel %vm279_vm0, %v226_v51, %v227_v55  ;;  %v4296_v62 = vsel %vm150_vm1, %v84_v57, %v85_v44  ;;  %v330_v2 = vsel %vm279_vm0, %v227_v55, %v228_v60  ;;  %1204 = vmatpush.msra.mxu0 %v989_v0  ;;  %v4376_v38 = vld [vmem:[%s7116_s0 + $0x148] sm:$0xff]  ;;  %v4386_v39 = vld [vmem:[%s7116_s0 + $0x1f8] sm:$0xff] }
   0xe   :  { %v305_v5 = vsel %vm279_vm0, %v252_v50, %v253_v61  ;;  %4002 = vmatpush.msra.mxu3 %v989_v0  ;;  %v329_v29 = vsel %vm279_vm0, %v228_v60, %v229_v23  ;;  %v256_v45 = vrot.slane %v4376_v38, 1  ;;  %v7123_v50 = vrot.slane %v4386_v39, 7 }
   0xf   :  { %1205 = vmatpush.msra.mxu0 %v988_v8  ;;  %vm3257_vm9 = vcmask 523264   ;;  %vm3338_vm12 = vcmask 785408  }
  0x10   :  { %4003 = vmatpush.msra.mxu3 %v988_v8  ;;  %v214_v55 = vsel %vm150_vm1, %v7123_v50, %v84_v57  ;;  %v4428_v8 = vld [vmem:[%s7116_s0 + $0x88] sm:$0xff] }
  0x11   :  { %1206 = vmatpush.msra.mxu0 %v987_v11 }
  0x12   :  { %416 = vrot.lane.b32.xlu2 %v4117_v13, %s4039_s24  ;;  %670 = vrot.lane.b32.xlu1 %v339_v15, %s4040_s29  ;;  %v304_v15 = vsel %vm279_vm0, %v253_v61, %v254_v10 }
  0x13   :  { %414 = vrot.lane.b32.xlu0 %v4095_v4, %s4039_s24  ;;  %4004 = vmatpush.msra.mxu3 %v987_v11 }
  0x14   :  { %1207 = vmatpush.msra.mxu0 %v986_v14 }
  0x15   :  { %4005 = vmatpush.msra.mxu3 %v986_v14 }
  0x1a   :  { %674 = vrot.lane.b32.xlu2 %v337_v20, %s4040_s29  ;;  %418 = vrot.lane.b32.xlu1 %v4128_v16, %s4039_s24  ;;  %v255_v20 = vrot.slane %v4334_v18, 1 }
  0x1b   :  { %672 = vrot.lane.b32.xlu0 %v338_v21, %s4040_s29 }
  0x22   :  { %422 = vrot.lane.b32.xlu2 %v4149_v22, %s4039_s24  ;;  %676 = vrot.lane.b32.xlu1 %v336_v24, %s4040_s29  ;;  %v303_v24 = vsel %vm279_vm0, %v254_v10, %v255_v20 }
  0x23   :  { %420 = vrot.lane.b32.xlu0 %v4133_v17, %s4039_s24 }
  0x2a   :  { %730 = vrot.lane.b32.xlu2 %v309_v31, %s4040_s29  ;;  %474 = vrot.lane.b32.xlu1 %v4161_v25, %s4039_s24  ;;  %v230_v31 = vrot.slane %v4357_v30, 1 }
  0x2b   :  { %678 = vrot.lane.b32.xlu0 %v335_v32, %s4040_s29 }
  0x2c   :  { %v328_v34 = vsel %vm279_vm0, %v229_v23, %v230_v31 }
  0x32   :  { %476 = vrot.lane.b32.xlu2 %v4166_v26, %s4039_s24  ;;  %680 = vrot.lane.b32.xlu1 %v334_v35, %s4040_s29  ;;  %v4371_v35 = vld [vmem:[%s7116_s0 + $0x80] sm:$0xff] }
  0x33   :  { %424 = vrot.lane.b32.xlu0 %v4171_v27, %s4039_s24 }
  0x3a   :  { %682 = vrot.lane.b32.xlu2 %v333_v40, %s4040_s29  ;;  %426 = vrot.lane.b32.xlu1 %v4190_v33, %s4039_s24  ;;  %v231_v40 = vrot.slane %v4371_v35, 1 }
  0x3b   :  { %732 = vrot.lane.b32.xlu0 %v308_v42, %s4040_s29 }
  0x3c   :  { %v327_v51 = vsel %vm279_vm0, %v230_v31, %v231_v40 }
  0x42   :  { %428 = vrot.lane.b32.xlu2 %v4202_v36, %s4039_s24  ;;  %734 = vrot.lane.b32.xlu1 %v307_v47, %s4040_s29 }
  0x43   :  { %478 = vrot.lane.b32.xlu0 %v4207_v37, %s4039_s24 }
  0x4a   :  { %736 = vrot.lane.b32.xlu2 %v306_v52, %s4040_s29  ;;  %480 = vrot.lane.b32.xlu1 %v4224_v43, %s4039_s24  ;;  %v302_v52 = vsel %vm279_vm0, %v255_v20, %v256_v45 }
  0x4b   :  { %684 = vrot.lane.b32.xlu0 %v332_v53, %s4040_s29  ;;  %v4400_v53 = vld [vmem:[%s7116_s0 + $0x150] sm:$0xff] }
  0x52   :  { %482 = vrot.lane.b32.xlu2 %v4244_v48, %s4039_s24  ;;  %686 = vrot.lane.b32.xlu1 %v331_v56, %s4040_s29  ;;  %v257_v56 = vrot.slane %v4400_v53, 1 }
  0x53   :  { %430 = vrot.lane.b32.xlu0 %v4249_v49, %s4039_s24 }
  0x54   :  { %v301_v57 = vsel %vm279_vm0, %v256_v45, %v257_v56 }
  0x5a   :  { %688 = vrot.lane.b32.xlu2 %v330_v2, %s4040_s29  ;;  %432 = vrot.lane.b32.xlu1 %v4265_v54, %s4039_s24 }
  0x5b   :  { %738 = vrot.lane.b32.xlu0 %v305_v5, %s4040_s29  ;;  %v4423_v5 = vld [vmem:[%s7116_s0 + $0x158] sm:$0xff] }
  0x5c   :  { %v4324_v12 = vpop.permute.xlu2 %412  ;;  %v258_v10 = vrot.slane %v4423_v5, 1 }
  0x62   :  { %434 = vrot.lane.b32.xlu2 %v4278_v58, %s4039_s24  ;;  %740 = vrot.lane.b32.xlu1 %v304_v15, %s4040_s29  ;;  %v232_v15 = vrot.slane %v4428_v8, 1 }
  0x63   :  { %484 = vrot.lane.b32.xlu0 %v4283_v59, %s4039_s24 }
  0x64   :  { %v4347_v21 = vpop.permute.xlu2 %668  ;;  %v326_v31 = vsel %vm279_vm0, %v231_v40, %v232_v15  ;;  %v87_v40 = vrot.slane %v4095_v4, 7  ;;  %v4473_v4 = vld [vmem:[%s7116_s0 + $0x98] sm:$0xff] }
  0x6a   :  { %742 = vrot.lane.b32.xlu2 %v303_v24, %s4040_s29  ;;  %486 = vrot.lane.b32.xlu1 %v4311_v6, %s4039_s24 }
  0x6b   :  { %690 = vrot.lane.b32.xlu0 %v329_v29, %s4040_s29  ;;  %v300_v29 = vsel %vm279_vm0, %v257_v56, %v258_v10  ;;  %v88_v56 = vrot.slane %v4117_v13, 7 }
  0x6c   :  { %v4364_v32 = vpop.permute.xlu2 %416 }
  0x6d   :  { %v210_v13 = vsel %vm150_vm1, %v87_v40, %v88_v56 }
  0x72   :  { %488 = vrot.lane.b32.xlu2 %v4334_v18, %s4039_s24  ;;  %692 = vrot.lane.b32.xlu1 %v328_v34, %s4040_s29  ;;  %v4448_v34 = vld [vmem:[%s7116_s0 + $0x90] sm:$0xff] }
  0x73   :  { %436 = vrot.lane.b32.xlu0 %v4339_v19, %s4039_s24 }
  0x74   :  { %v4389_v42 = vpop.permute.xlu2 %674  ;;  %v411_v44 = vpop.permute.xlu1 %410 }
  0x75   :  { %v409_v47 = vpop.permute.xlu0 %408  ;;  %v858_v20 = vsel %vm856_vm3, %v4296_v62, %v411_v44  ;;  %v859_v62 = vsel %vm856_vm3, %v4237_v46, %v4324_v12  ;;  %v233_v44 = vrot.slane %v4448_v34, 1  ;;  %v211_v46 = vsel %vm150_vm1, %v86_v41, %v87_v40  ;;  %v4478_v12 = vld [vmem:[%s7116_s0 + $0x160] sm:$0xff] }
  0x76   :  { %v857_v63 = vsel %vm856_vm3, %v214_v55, %v409_v47  ;;  %v234_v41 = vrot.slane %v4473_v4, 1 }
  0x77   :  { %v325_v55 = vsel %vm279_vm0, %v232_v15, %v233_v44 }
  0x7a   :  { %694 = vrot.lane.b32.xlu2 %v327_v51, %s4040_s29  ;;  %438 = vrot.lane.b32.xlu1 %v4357_v30, %s4039_s24 }
  0x7b   :  { %744 = vrot.lane.b32.xlu0 %v302_v52, %s4040_s29  ;;  %v924_v52 = vsel %vm921_vm4, %v859_v62, %v4347_v21  ;;  %v4490_v21 = vld [vmem:[%s7116_s0 + $0x100] sm:$0xff]  ;;  %v89_v62 = vrot.slane %v4128_v16, 7 }
  0x7c   :  { %v4413_v60 = vpop.permute.xlu2 %422  ;;  %v667_v61 = vpop.permute.xlu1 %666 }
  0x7d   :  { %v665_v0 = vpop.permute.xlu0 %664  ;;  %v923_v24 = vsel %vm921_vm4, %v858_v20, %v667_v61  ;;  %v7124_v20 = vrot.slane %v4490_v21, 7  ;;  %v209_v16 = vsel %vm150_vm1, %v88_v56, %v89_v62 }
  0x7e   :  { %v922_v2 = vsel %vm921_vm4, %v857_v63, %v665_v0  ;;  %v259_v0 = vrot.slane %v4478_v12, 1 }
  0x7f   :  { %3873 = vmatmul.msk.f32.vlgmr.msra.gmra.mxu0 %vm995_vm5, %v922_v2 }
  0x82   :  { %440 = vrot.lane.b32.xlu2 %v4371_v35, %s4039_s24  ;;  %746 = vrot.lane.b32.xlu1 %v301_v57, %s4040_s29  ;;  %v117_v57 = vrot.slane %v4161_v25, 7 }
  0x83   :  { %490 = vrot.lane.b32.xlu0 %v4376_v38, %s4039_s24 }
  0x84   :  { %v731_v11 = vpop.permute.xlu2 %730  ;;  %v671_v14 = vpop.permute.xlu1 %670 }
  0x85   :  { %v415_v23 = vpop.permute.xlu0 %414 }
  0x86   :  { %v860_v1 = vsel %vm856_vm3, %v211_v46, %v415_v23  ;;  %v324_v23 = vsel %vm279_vm0, %v233_v44, %v234_v41 }
  0x87   :  { %3874 = vmatmul.msk.f32.gmra.mxu0 %vm995_vm5, %v923_v24  ;;  %v925_v15 = vsel %vm921_vm4, %v860_v1, %v671_v14  ;;  %v299_v24 = vsel %vm279_vm0, %v258_v10, %v259_v0  ;;  %v181_v14 = vsel %vm150_vm1, %v7124_v20, %v117_v57 }
  0x8a   :  { %748 = vrot.lane.b32.xlu2 %v300_v29, %s4040_s29  ;;  %492 = vrot.lane.b32.xlu1 %v4400_v53, %s4039_s24  ;;  %v4509_v29 = vld [vmem:[%s7116_s0 + $0x168] sm:$0xff] }
  0x8b   :  { %696 = vrot.lane.b32.xlu0 %v326_v31, %s4040_s29  ;;  %v861_v31 = vsel %vm856_vm3, %v210_v13, %v4364_v32  ;;  %v260_v10 = vrot.slane %v4509_v29, 1 }
  0x8c   :  { %v4459_v45 = vpop.permute.xlu2 %476  ;;  %v419_v47 = vpop.permute.xlu1 %418 }
  0x8d   :  { %v673_v51 = vpop.permute.xlu0 %672  ;;  %v298_v32 = vsel %vm279_vm0, %v259_v0, %v260_v10  ;;  %v90_v0 = vrot.slane %v4133_v17, 7 }
  0x8e   :  { %v926_v46 = vsel %vm921_vm4, %v861_v31, %v673_v51  ;;  %v4542_v51 = vld [vmem:[%s7116_s0 + $0xa0] sm:$0xff] }
  0x8f   :  { %3875 = vmatmul.msk.f32.gmra.mxu0 %vm995_vm5, %v924_v52  ;;  %v208_v17 = vsel %vm150_vm1, %v89_v62, %v90_v0 }
  0x92   :  { %494 = vrot.lane.b32.xlu2 %v4423_v5, %s4039_s24  ;;  %698 = vrot.lane.b32.xlu1 %v325_v55, %s4040_s29 }
  0x93   :  { %442 = vrot.lane.b32.xlu0 %v4428_v8, %s4039_s24 }
  0x94   :  { %v4493_v61 = vpop.permute.xlu2 %682  ;;  %v677_v63 = vpop.permute.xlu1 %676 }
  0x95   :  { %v421_v2 = vpop.permute.xlu0 %420 }
  0x97   :  { %3876 = vmatmul.msk.f32.gmra.mxu0 %vm995_vm5, %v925_v15  ;;  %v4537_v15 = vld [vmem:[%s7116_s0 + $0x170] sm:$0xff] }
  0x98   :  { %v261_v56 = vrot.slane %v4537_v15, 1 }
  0x9a   :  { %700 = vrot.lane.b32.xlu2 %v324_v23, %s4040_s29  ;;  %444 = vrot.lane.b32.xlu1 %v4448_v34, %s4039_s24  ;;  %v118_v23 = vrot.slane %v4166_v26, 7 }
  0x9b   :  { %750 = vrot.lane.b32.xlu0 %v299_v24, %s4040_s29 }
  0x9c   :  { %v4523_v44 = vpop.permute.xlu2 %428  ;;  %v475_v40 = vpop.permute.xlu1 %474 }
  0x9d   :  { %v890_v52 = vsel %vm856_vm3, %v181_v14, %v475_v40  ;;  %v679_v55 = vpop.permute.xlu0 %678  ;;  %v235_v14 = vrot.slane %v4542_v51, 1 }
  0x9e   :  { %v955_v1 = vsel %vm921_vm4, %v890_v52, %v731_v11  ;;  %v862_v11 = vsel %vm856_vm3, %v209_v16, %v419_v47  ;;  %v297_v47 = vsel %vm279_vm0, %v260_v10, %v261_v56  ;;  %v180_v52 = vsel %vm150_vm1, %v117_v57, %v118_v23 }
  0x9f   :  { %3877 = vmatmul.msk.f32.gmra.mxu0 %vm995_vm5, %v926_v46  ;;  %3906 = vmatmul.msk.f32.vlgmr.msra.gmra.mxu3 %vm995_vm5, %v955_v1  ;;  %v927_v40 = vsel %vm921_vm4, %v862_v11, %v4389_v42  ;;  %v323_v26 = vsel %vm279_vm0, %v234_v41, %v235_v14  ;;  %v4570_v46 = vld [vmem:[%s7116_s0 + $0xa8] sm:$0xff]  ;;  %v891_v42 = vsel %vm856_vm3, %v180_v52, %v4459_v45  ;;  %v91_v41 = vrot.slane %v4149_v22, 7 }
  0xa0   :  { %v863_v57 = vsel %vm856_vm3, %v208_v17, %v421_v2  ;;  %v236_v10 = vrot.slane %v4570_v46, 1  ;;  %v119_v2 = vrot.slane %v4207_v37, 7 }
  0xa1   :  { %v928_v16 = vsel %vm921_vm4, %v863_v57, %v677_v63  ;;  %v207_v22 = vsel %vm150_vm1, %v90_v0, %v91_v41  ;;  %v4600_v63 = vld [vmem:[%s7116_s0 + $0x178] sm:$0xff]  ;;  %v120_v57 = vrot.slane %v4224_v43, 7  ;;  %v4631_v43 = vld [vmem:[%s7116_s0 + $0x180] sm:$0xff] }
  0xa2   :  { %446 = vrot.lane.b32.xlu2 %v4473_v4, %s4039_s24  ;;  %752 = vrot.lane.b32.xlu1 %v298_v32, %s4040_s29  ;;  %v322_v45 = vsel %vm279_vm0, %v235_v14, %v236_v10  ;;  %v864_v37 = vsel %vm856_vm3, %v207_v22, %v4413_v60  ;;  %v179_v0 = vsel %vm150_vm1, %v118_v23, %v119_v2 }
  0xa3   :  { %496 = vrot.lane.b32.xlu0 %v4478_v12, %s4039_s24 }
  0xa4   :  { %v4553_v13 = vpop.permute.xlu2 %736  ;;  %v681_v24 = vpop.permute.xlu1 %680 }
  0xa5   :  { %v425_v31 = vpop.permute.xlu0 %424 }
  0xa7   :  { %3878 = vmatmul.msk.f32.gmra.mxu0 %vm995_vm5, %v927_v40  ;;  %v4595_v40 = vld [vmem:[%s7116_s0 + $0xb0] sm:$0xff] }
  0xa8   :  { %v237_v14 = vrot.slane %v4595_v40, 1 }
  0xaa   :  { %754 = vrot.lane.b32.xlu2 %v297_v47, %s4040_s29  ;;  %498 = vrot.lane.b32.xlu1 %v4509_v29, %s4039_s24  ;;  %v92_v47 = vrot.slane %v4171_v27, 7 }
  0xab   :  { %702 = vrot.lane.b32.xlu0 %v323_v26, %s4040_s29  ;;  %v262_v26 = vrot.slane %v4600_v63, 1 }
  0xac   :  { %v4581_v62 = vpop.permute.xlu2 %482  ;;  %v427_v1 = vpop.permute.xlu1 %426  ;;  %v206_v27 = vsel %vm150_vm1, %v91_v41, %v92_v47  ;;  %v263_v41 = vrot.slane %v4631_v43, 1 }
  0xad   :  { %v733_v32 = vpop.permute.xlu0 %732 }
  0xae   :  { %v956_v11 = vsel %vm921_vm4, %v891_v42, %v733_v32  ;;  %v929_v32 = vsel %vm921_vm4, %v864_v37, %v679_v55  ;;  %v178_v55 = vsel %vm150_vm1, %v119_v2, %v120_v57 }
  0xaf   :  { %3879 = vmatmul.msk.f32.gmra.mxu0 %vm995_vm5, %v928_v16  ;;  %3907 = vmatmul.msk.f32.gmra.mxu3 %vm995_vm5, %v956_v11  ;;  %v321_v16 = vsel %vm279_vm0, %v236_v10, %v237_v14  ;;  %v296_v11 = vsel %vm279_vm0, %v261_v56, %v262_v26  ;;  %v865_v10 = vsel %vm856_vm3, %v206_v27, %v425_v31  ;;  %v93_v56 = vrot.slane %v4190_v33, 7  ;;  %v4657_v33 = vld [vmem:[%s7116_s0 + $0x188] sm:$0xff] }
  0xb0   :  { %v295_v31 = vsel %vm279_vm0, %v262_v26, %v263_v41  ;;  %v94_v26 = vrot.slane %v4202_v36, 7 }
  0xb1   :  { %v205_v2 = vsel %vm150_vm1, %v92_v47, %v93_v56  ;;  %v264_v47 = vrot.slane %v4657_v33, 1 }
  0xb2   :  { %500 = vrot.lane.b32.xlu2 %v4537_v15, %s4039_s24  ;;  %704 = vrot.lane.b32.xlu1 %v322_v45, %s4040_s29 }
  0xb3   :  { %448 = vrot.lane.b32.xlu0 %v4542_v51, %s4039_s24 }
  0xb4   :  { %v4613_v52 = vpop.permute.xlu2 %688  ;;  %v735_v17 = vpop.permute.xlu1 %734 }
  0xb5   :  { %v479_v42 = vpop.permute.xlu0 %478 }
  0xb6   :  { %v892_v60 = vsel %vm856_vm3, %v179_v0, %v479_v42 }
  0xb7   :  { %3880 = vmatmul.msk.f32.gmra.mxu0 %vm995_vm5, %v929_v32  ;;  %v957_v23 = vsel %vm921_vm4, %v892_v60, %v735_v17  ;;  %v930_v17 = vsel %vm921_vm4, %v865_v10, %v681_v24  ;;  %v4662_v24 = vld [vmem:[%s7116_s0 + $0xb8] sm:$0xff]  ;;  %v121_v60 = vrot.slane %v4244_v48, 7  ;;  %v4690_v10 = vld [vmem:[%s7116_s0 + $0xc0] sm:$0xff] }
  0xb8   :  { %3908 = vmatmul.msk.f32.gmra.mxu3 %vm995_vm5, %v957_v23 }
  0xb9   :  { %v177_v36 = vsel %vm150_vm1, %v120_v57, %v121_v60  ;;  %v95_v57 = vrot.slane %v4249_v49, 7 }
  0xba   :  { %706 = vrot.lane.b32.xlu2 %v321_v16, %s4040_s29  ;;  %450 = vrot.lane.b32.xlu1 %v4570_v46, %s4039_s24  ;;  %v238_v16 = vrot.slane %v4662_v24, 1 }
  0xbb   :  { %756 = vrot.lane.b32.xlu0 %v296_v11, %s4040_s29  ;;  %v203_v49 = vsel %vm150_vm1, %v94_v26, %v95_v57 }
  0xbc   :  { %v4642_v45 = vpop.permute.xlu2 %434  ;;  %v481_v22 = vpop.permute.xlu1 %480  ;;  %v320_v48 = vsel %vm279_vm0, %v237_v14, %v238_v16  ;;  %v239_v14 = vrot.slane %v4690_v10, 1 }
  0xbd   :  { %v893_v37 = vsel %vm856_vm3, %v178_v55, %v481_v22  ;;  %v685_v0 = vpop.permute.xlu0 %684  ;;  %v204_v55 = vsel %vm150_vm1, %v93_v56, %v94_v26  ;;  %v96_v26 = vrot.slane %v4265_v54, 7 }
  0xbe   :  { %v958_v42 = vsel %vm921_vm4, %v893_v37, %v4553_v13  ;;  %v866_v13 = vsel %vm856_vm3, %v205_v2, %v427_v1  ;;  %v294_v1 = vsel %vm279_vm0, %v263_v41, %v264_v47  ;;  %v894_v41 = vsel %vm856_vm3, %v177_v36, %v4581_v62 }
  0xbf   :  { %3881 = vmatmul.msk.f32.gmra.mxu0 %vm995_vm5, %v930_v17  ;;  %v931_v11 = vsel %vm921_vm4, %v866_v13, %v4493_v61  ;;  %v867_v61 = vsel %vm856_vm3, %v204_v55, %v4523_v44  ;;  %v319_v44 = vsel %vm279_vm0, %v238_v16, %v239_v14  ;;  %v122_v62 = vrot.slane %v4283_v59, 7 }
  0xc0   :  { %3909 = vmatmul.msk.f32.gmra.mxu3 %vm995_vm5, %v958_v42  ;;  %v932_v17 = vsel %vm921_vm4, %v867_v61, %v685_v0  ;;  %v4721_v0 = vld [vmem:[%s7116_s0 + $0x190] sm:$0xff]  ;;  %v123_v36 = vrot.slane %v4311_v6, 7  ;;  %v202_v54 = vsel %vm150_vm1, %v95_v57, %v96_v26  ;;  %v4751_v6 = vld [vmem:[%s7116_s0 + $0x198] sm:$0xff] }
  0xc1   :  { %v176_v2 = vsel %vm150_vm1, %v121_v60, %v122_v62  ;;  %v266_v57 = vrot.slane %v4751_v6, 1 }
  0xc2   :  { %452 = vrot.lane.b32.xlu2 %v4595_v40, %s4039_s24  ;;  %758 = vrot.lane.b32.xlu1 %v295_v31, %s4040_s29  ;;  %v4716_v31 = vld [vmem:[%s7116_s0 + $0xc8] sm:$0xff] }
  0xc3   :  { %502 = vrot.lane.b32.xlu0 %v4600_v63, %s4039_s24  ;;  %v240_v13 = vrot.slane %v4716_v31, 1 }
  0xc4   :  { %v4673_v32 = vpop.permute.xlu2 %742  ;;  %v687_v23 = vpop.permute.xlu1 %686 }
  0xc5   :  { %v431_v27 = vpop.permute.xlu0 %430  ;;  %v318_v61 = vsel %vm279_vm0, %v239_v14, %v240_v13 }
  0xc6   :  { %v868_v59 = vsel %vm856_vm3, %v203_v49, %v431_v27 }
  0xc7   :  { %3882 = vmatmul.msk.f32.gmra.mxu0 %vm995_vm5, %v931_v11 }
  0xca   :  { %760 = vrot.lane.b32.xlu2 %v294_v1, %s4040_s29  ;;  %504 = vrot.lane.b32.xlu1 %v4631_v43, %s4039_s24  ;;  %v265_v1 = vrot.slane %v4721_v0, 1 }
  0xcb   :  { %708 = vrot.lane.b32.xlu0 %v320_v48, %s4040_s29  ;;  %v933_v48 = vsel %vm921_vm4, %v868_v59, %v687_v23  ;;  %v175_v23 = vsel %vm150_vm1, %v122_v62, %v123_v36  ;;  %v4778_v59 = vld [vmem:[%s7116_s0 + $0x1a0] sm:$0xff] }
  0xcc   :  { %v4702_v56 = vpop.permute.xlu2 %488  ;;  %v433_v22 = vpop.permute.xlu1 %432 }
  0xcd   :  { %v739_v37 = vpop.permute.xlu0 %738  ;;  %v869_v14 = vsel %vm856_vm3, %v202_v54, %v433_v22  ;;  %v292_v22 = vsel %vm279_vm0, %v265_v1, %v266_v57 }
  0xce   :  { %v959_v42 = vsel %vm921_vm4, %v894_v41, %v739_v37  ;;  %v293_v41 = vsel %vm279_vm0, %v264_v47, %v265_v1  ;;  %v97_v47 = vrot.slane %v4278_v58, 7  ;;  %v934_v49 = vsel %vm921_vm4, %v869_v14, %v4613_v52  ;;  %v4783_v52 = vld [vmem:[%s7116_s0 + $0xd0] sm:$0xff] }
  0xcf   :  { %3883 = vmatmul.msk.f32.gmra.mxu0 %vm995_vm5, %v932_v17  ;;  %3910 = vmatmul.msk.f32.gmra.mxu3 %vm995_vm5, %v959_v42 }
  0xd0   :  { %v201_v58 = vsel %vm150_vm1, %v96_v26, %v97_v47  ;;  %v124_v26 = vrot.slane %v4334_v18, 7 }
  0xd2   :  { %506 = vrot.lane.b32.xlu2 %v4657_v33, %s4039_s24  ;;  %710 = vrot.lane.b32.xlu1 %v319_v44, %s4040_s29 }
  0xd3   :  { %454 = vrot.lane.b32.xlu0 %v4662_v24, %s4039_s24 }
  0xd4   :  { %v4733_v16 = vpop.permute.xlu2 %694  ;;  %v741_v11 = vpop.permute.xlu1 %740 }
  0xd5   :  { %v485_v55 = vpop.permute.xlu0 %484 }
  0xd6   :  { %v895_v27 = vsel %vm856_vm3, %v176_v2, %v485_v55  ;;  %v267_v2 = vrot.slane %v4778_v59, 1  ;;  %v98_v55 = vrot.slane %v4339_v19, 7  ;;  %v4811_v19 = vld [vmem:[%s7116_s0 + $0xd8] sm:$0xff] }
  0xd7   :  { %3884 = vmatmul.msk.f32.gmra.mxu0 %vm995_vm5, %v933_v48  ;;  %v960_v60 = vsel %vm921_vm4, %v895_v27, %v741_v11  ;;  %v241_v27 = vrot.slane %v4783_v52, 1 }
  0xd8   :  { %3911 = vmatmul.msk.f32.gmra.mxu3 %vm995_vm5, %v960_v60  ;;  %v200_v18 = vsel %vm150_vm1, %v97_v47, %v98_v55 }
  0xd9   :  { %v317_v54 = vsel %vm279_vm0, %v240_v13, %v241_v27  ;;  %v99_v13 = vrot.slane %v4357_v30, 7 }
  0xda   :  { %712 = vrot.lane.b32.xlu2 %v318_v61, %s4040_s29  ;;  %456 = vrot.lane.b32.xlu1 %v4690_v10, %s4039_s24  ;;  %v174_v61 = vsel %vm150_vm1, %v123_v36, %v124_v26 }
  0xdb   :  { %762 = vrot.lane.b32.xlu0 %v293_v41, %s4040_s29  ;;  %v897_v41 = vsel %vm856_vm3, %v174_v61, %v4702_v56  ;;  %v199_v30 = vsel %vm150_vm1, %v98_v55, %v99_v13  ;;  %v126_v61 = vrot.slane %v4400_v53, 7 }
  0xdc   :  { %v4762_v37 = vpop.permute.xlu2 %440  ;;  %v487_v17 = vpop.permute.xlu1 %486 }
  0xdd   :  { %v896_v42 = vsel %vm856_vm3, %v175_v23, %v487_v17  ;;  %v691_v44 = vpop.permute.xlu0 %690  ;;  %v242_v23 = vrot.slane %v4811_v19, 1 }
  0xde   :  { %v961_v62 = vsel %vm921_vm4, %v896_v42, %v4673_v32  ;;  %v870_v32 = vsel %vm856_vm3, %v201_v58, %v4642_v45  ;;  %v291_v45 = vsel %vm279_vm0, %v266_v57, %v267_v2 }
  0xdf   :  { %3885 = vmatmul.msk.f32.gmra.mxu0 %vm995_vm5, %v934_v49  ;;  %v935_v60 = vsel %vm921_vm4, %v870_v32, %v691_v44  ;;  %v316_v56 = vsel %vm279_vm0, %v241_v27, %v242_v23  ;;  %v125_v44 = vrot.slane %v4376_v38, 7  ;;  %v4836_v49 = vld [vmem:[%s7116_s0 + $0xe0] sm:$0xff]  ;;  %v100_v32 = vrot.slane %v4371_v35, 7 }
  0xe0   :  { %3912 = vmatmul.msk.f32.gmra.mxu3 %vm995_vm5, %v961_v62  ;;  %v4841_v62 = vld [vmem:[%s7116_s0 + $0x1a8] sm:$0xff]  ;;  %v243_v58 = vrot.slane %v4836_v49, 1 }
  0xe1   :  { %v268_v27 = vrot.slane %v4841_v62, 1 }
  0xe2   :  { %458 = vrot.lane.b32.xlu2 %v4716_v31, %s4039_s24  ;;  %764 = vrot.lane.b32.xlu1 %v292_v22, %s4040_s29  ;;  %v173_v22 = vsel %vm150_vm1, %v124_v26, %v125_v44  ;;  %v315_v35 = vsel %vm279_vm0, %v242_v23, %v243_v58 }
  0xe3   :  { %508 = vrot.lane.b32.xlu0 %v4721_v0, %s4039_s24 }
  0xe4   :  { %v4794_v11 = vpop.permute.xlu2 %748  ;;  %v693_v1 = vpop.permute.xlu1 %692 }
  0xe5   :  { %v437_v48 = vpop.permute.xlu0 %436 }
  0xe6   :  { %v871_v36 = vsel %vm856_vm3, %v200_v18, %v437_v48  ;;  %v198_v18 = vsel %vm150_vm1, %v99_v13, %v100_v32 }
  0xe7   :  { %3886 = vmatmul.msk.f32.gmra.mxu0 %vm995_vm5, %v935_v60  ;;  %v936_v17 = vsel %vm921_vm4, %v871_v36, %v693_v1  ;;  %v873_v53 = vsel %vm856_vm3, %v198_v18, %v4762_v37 }
  0xea   :  { %766 = vrot.lane.b32.xlu2 %v291_v45, %s4040_s29  ;;  %510 = vrot.lane.b32.xlu1 %v4751_v6, %s4039_s24 }
  0xeb   :  { %714 = vrot.lane.b32.xlu0 %v317_v54, %s4040_s29  ;;  %v290_v54 = vsel %vm279_vm0, %v267_v2, %v268_v27 }
  0xec   :  { %v4822_v14 = vpop.permute.xlu2 %494  ;;  %v439_v57 = vpop.permute.xlu1 %438 }
  0xed   :  { %v745_v47 = vpop.permute.xlu0 %744  ;;  %v872_v38 = vsel %vm856_vm3, %v199_v30, %v439_v57  ;;  %v4904_v30 = vld [vmem:[%s7116_s0 + $0xe8] sm:$0xff] }
  0xee   :  { %v962_v42 = vsel %vm921_vm4, %v897_v41, %v745_v47  ;;  %v937_v45 = vsel %vm921_vm4, %v872_v38, %v4733_v16  ;;  %v4872_v16 = vld [vmem:[%s7116_s0 + $0x1b0] sm:$0xff]  ;;  %v172_v41 = vsel %vm150_vm1, %v125_v44, %v126_v61  ;;  %v4899_v44 = vld [vmem:[%s7116_s0 + $0x1b8] sm:$0xff]  ;;  %v127_v38 = vrot.slane %v4423_v5, 7 }
  0xef   :  { %3887 = vmatmul.msk.f32.gmra.mxu0 %vm995_vm5, %v936_v17  ;;  %3913 = vmatmul.msk.f32.gmra.mxu3 %vm995_vm5, %v962_v42  ;;  %v269_v2 = vrot.slane %v4872_v16, 1 }
  0xf0   :  { %v171_v5 = vsel %vm150_vm1, %v126_v61, %v127_v38 }
  0xf1   :  { %v289_v42 = vsel %vm279_vm0, %v268_v27, %v269_v2  ;;  %v244_v27 = vrot.slane %v4904_v30, 1 }
  0xf2   :  { %512 = vrot.lane.b32.xlu2 %v4778_v59, %s4039_s24  ;;  %716 = vrot.lane.b32.xlu1 %v316_v56, %s4040_s29  ;;  %v101_v56 = vrot.slane %v4428_v8, 7 }
  0xf3   :  { %460 = vrot.lane.b32.xlu0 %v4783_v52, %s4039_s24  ;;  %v314_v18 = vsel %vm279_vm0, %v243_v58, %v244_v27 }
  0xf4   :  { %v4853_v1 = vpop.permute.xlu2 %700  ;;  %v747_v55 = vpop.permute.xlu1 %746  ;;  %v197_v8 = vsel %vm150_vm1, %v100_v32, %v101_v56 }
  0xf5   :  { %v491_v48 = vpop.permute.xlu0 %490 }
  0xf6   :  { %v898_v60 = vsel %vm856_vm3, %v173_v22, %v491_v48 }
  0xf7   :  { %3888 = vmatmul.msk.f32.gmra.mxu0 %vm995_vm5, %v937_v45  ;;  %v963_v26 = vsel %vm921_vm4, %v898_v60, %v747_v55 }
  0xf8   :  { %3914 = vmatmul.msk.f32.gmra.mxu3 %vm995_vm5, %v963_v26  ;;  %v102_v26 = vrot.slane %v4448_v34, 7  ;;  %v900_v34 = vsel %vm856_vm3, %v171_v5, %v4822_v14  ;;  %v129_v5 = vrot.slane %v4509_v29, 7 }
  0xfa   :  { %718 = vrot.lane.b32.xlu2 %v315_v35, %s4040_s29  ;;  %462 = vrot.lane.b32.xlu1 %v4811_v19, %s4039_s24  ;;  %v196_v61 = vsel %vm150_vm1, %v101_v56, %v102_v26  ;;  %v4965_v56 = vld [vmem:[%s7116_s0 + $0x1c0] sm:$0xff] }
  0xfb   :  { %768 = vrot.lane.b32.xlu0 %v290_v54, %s4040_s29  ;;  %v4933_v54 = vld [vmem:[%s7116_s0 + $0xf0] sm:$0xff] }
  0xfc   :  { %v4883_v36 = vpop.f32.mrf.mxu0  ;;  %v4885_v23 = vpop.permute.xlu2 %446  ;;  %v245_v58 = vrot.slane %v4933_v54, 1 }
  0xfd   :  { %v493_v13 = vpop.permute.xlu1 %492  ;;  %v697_v57 = vpop.permute.xlu0 %696 }
  0xfe   :  { %v899_v47 = vsel %vm856_vm3, %v172_v41, %v493_v13  ;;  %v938_v17 = vsel %vm921_vm4, %v873_v53, %v697_v57 }
  0xff   :  { %3889 = vmatmul.msk.f32.gmra.mxu0 %vm995_vm5, %v938_v17  ;;  %v964_v37 = vsel %vm921_vm4, %v899_v47, %v4794_v11  ;;  %v270_v11 = vrot.slane %v4899_v44, 1  ;;  %v313_v17 = vsel %vm279_vm0, %v244_v27, %v245_v58 }
 0x100   :  { %3915 = vmatmul.msk.f32.gmra.mxu3 %vm995_vm5, %v964_v37  ;;  %v128_v37 = vrot.slane %v4478_v12, 7 }
 0x101   :  { %v288_v32 = vsel %vm279_vm0, %v269_v2, %v270_v11 }
 0x102   :  { %464 = vrot.lane.b32.xlu2 %v4836_v49, %s4039_s24  ;;  %770 = vrot.lane.b32.xlu1 %v289_v42, %s4040_s29  ;;  %v4960_v42 = vld [vmem:[%s7116_s0 + $0xf8] sm:$0xff]  ;;  %v170_v12 = vsel %vm150_vm1, %v127_v38, %v128_v37 }
 0x103   :  { %514 = vrot.lane.b32.xlu0 %v4841_v62, %s4039_s24 }
 0x104   :  { %v4915_v22 = vpop.f32.mrf.mxu0  ;;  %v4917_v55 = vpop.permute.xlu2 %754 }
 0x105   :  { %v699_v48 = vpop.permute.xlu1 %698  ;;  %v443_v60 = vpop.permute.xlu0 %442 }
 0x106   :  { %v874_v45 = vsel %vm856_vm3, %v197_v8, %v443_v60  ;;  %v103_v8 = vrot.slane %v4473_v4, 7  ;;  %v271_v60 = vrot.slane %v4965_v56, 1 }
 0x107   :  { %v939_v35 = vsel %vm921_vm4, %v874_v45, %v699_v48 }
 0x108   :  { %3890 = vmatmul.msk.f32.gmra.mxu0 %vm995_vm5, %v939_v35  ;;  %v195_v4 = vsel %vm150_vm1, %v102_v26, %v103_v8  ;;  %v169_v26 = vsel %vm150_vm1, %v128_v37, %v129_v5  ;;  %v104_v37 = vrot.slane %v4542_v51, 7 }
 0x109   :  { %v876_v29 = vsel %vm856_vm3, %v195_v4, %v4885_v23 }
 0x10a   :  { %772 = vrot.lane.b32.xlu2 %v288_v32, %s4040_s29  ;;  %516 = vrot.lane.b32.xlu1 %v4872_v16, %s4039_s24 }
 0x10b   :  { %720 = vrot.lane.b32.xlu0 %v314_v18, %s4040_s29 }
 0x10c   :  { %v4944_v53 = vpop.f32.mrf.mxu0  ;;  %v4946_v41 = vpop.permute.xlu2 %500 }
 0x10d   :  { %v445_v2 = vpop.permute.xlu1 %444  ;;  %v751_v13 = vpop.permute.xlu0 %750 }
 0x10e   :  { %v875_v57 = vsel %vm856_vm3, %v196_v61, %v445_v2  ;;  %v965_v47 = vsel %vm921_vm4, %v900_v34, %v751_v13  ;;  %v287_v34 = vsel %vm279_vm0, %v270_v11, %v271_v60  ;;  %v4994_v61 = vld [vmem:[%s7116_s0 + $0x1c8] sm:$0xff] }
 0x10f   :  { %3916 = vmatmul.msk.f32.gmra.mxu3 %vm995_vm5, %v965_v47  ;;  %v940_v14 = vsel %vm921_vm4, %v875_v57, %v4853_v1  ;;  %v246_v1 = vrot.slane %v4960_v42, 1  ;;  %v272_v11 = vrot.slane %v4994_v61, 1 }
 0x110   :  { %3891 = vmatmul.msk.f32.gmra.mxu0 %vm995_vm5, %v940_v14 }
 0x111   :  { %v312_v38 = vsel %vm279_vm0, %v245_v58, %v246_v1 }
 0x112   :  { %518 = vrot.lane.b32.xlu2 %v4899_v44, %s4039_s24  ;;  %722 = vrot.lane.b32.xlu1 %v313_v17, %s4040_s29  ;;  %v286_v17 = vsel %vm279_vm0, %v271_v60, %v272_v11  ;;  %v130_v60 = vrot.slane %v4537_v15, 7 }
 0x113   :  { %466 = vrot.lane.b32.xlu0 %v4904_v30, %s4039_s24 }
 0x114   :  { %v4976_v27 = vpop.f32.mrf.mxu0  ;;  %v4978_v48 = vpop.permute.xlu2 %706  ;;  %v168_v15 = vsel %vm150_vm1, %v129_v5, %v130_v60 }
 0x115   :  { %v753_v45 = vpop.permute.xlu1 %752  ;;  %v497_v35 = vpop.permute.xlu0 %496 }
 0x116   :  { %v901_v32 = vsel %vm856_vm3, %v170_v12, %v497_v35  ;;  %v5021_v12 = vld [vmem:[%s7116_s0 + $0x1d0] sm:$0xff] }
 0x117   :  { %v966_v18 = vsel %vm921_vm4, %v901_v32, %v753_v45  ;;  %v273_v51 = vrot.slane %v5021_v12, 1  ;;  %v247_v32 = vrot.slane %v4490_v21, 1 }
 0x118   :  { %3917 = vmatmul.msk.f32.gmra.mxu3 %vm995_vm5, %v966_v18 }
 0x11a   :  { %724 = vrot.lane.b32.xlu2 %v312_v38, %s4040_s29  ;;  %468 = vrot.lane.b32.xlu1 %v4933_v54, %s4039_s24 }
 0x11b   :  { %774 = vrot.lane.b32.xlu0 %v287_v34, %s4040_s29  ;;  %v105_v34 = vrot.slane %v4570_v46, 7  ;;  %v903_v46 = vsel %vm856_vm3, %v168_v15, %v4946_v41 }
 0x11c   :  { %v5005_v58 = vpop.f32.mrf.mxu0  ;;  %v5007_v2 = vpop.permute.xlu2 %452 }
 0x11d   :  { %v499_v13 = vpop.permute.xlu1 %498  ;;  %v703_v57 = vpop.permute.xlu0 %702 }
 0x11e   :  { %v902_v47 = vsel %vm856_vm3, %v169_v26, %v499_v13  ;;  %v941_v14 = vsel %vm921_vm4, %v876_v29, %v703_v57  ;;  %v311_v26 = vsel %vm279_vm0, %v246_v1, %v247_v32  ;;  %v5062_v1 = vld [vmem:[%s7118_s2] ss:$0 sm:$0xff] }
 0x11f   :  { %3892 = vmatmul.msk.f32.gmra.mxu0 %vm995_vm5, %v941_v14  ;;  %v967_v23 = vsel %vm921_vm4, %v902_v47, %v4917_v55  ;;  %v194_v55 = vsel %vm150_vm1, %v103_v8, %v104_v37  ;;  %v285_v8 = vsel %vm279_vm0, %v272_v11, %v273_v51  ;;  %v193_v11 = vsel %vm150_vm1, %v104_v37, %v105_v34 }
 0x120   :  { %3918 = vmatmul.msk.f32.gmra.mxu3 %vm995_vm5, %v967_v23 }
 0x122   :  { %470 = vrot.lane.b32.xlu2 %v4960_v42, %s4039_s24  ;;  %776 = vrot.lane.b32.xlu1 %v286_v17, %s4040_s29  ;;  %v1308_v13 = vpop.f32.mrf.mxu3  ;;  %v131_v17 = vrot.slane %v4600_v63, 7  ;;  %v5084_v63 = vld [vmem:[%s7116_s0 + $0x1e0] sm:$0xff] }
 0x123   :  { %520 = vrot.lane.b32.xlu0 %v4965_v56, %s4039_s24 }
 0x124   :  { %v5032_v45 = vpop.f32.mrf.mxu0  ;;  %v5034_v35 = vpop.permute.xlu2 %760  ;;  %v167_v25 = vsel %vm150_vm1, %v130_v60, %v131_v17  ;;  %v132_v60 = vrot.slane %v4631_v43, 7 }
 0x125   :  { %v705_v18 = vpop.permute.xlu1 %704  ;;  %v449_v38 = vpop.permute.xlu0 %448 }
 0x126   :  { %v877_v4 = vsel %vm856_vm3, %v194_v55, %v449_v38  ;;  %v1309_v55 = vadd.f32 %v5062_v1, %v1308_v13  ;;  %v5079_v38 = vld [vmem:[%s7116_s0 + $0x1d8] sm:$0xff] }
 0x127   :  { %v942_v29 = vsel %vm921_vm4, %v877_v4, %v705_v18  ;;  %v310_v18 = vsel %vm279_vm0, %v247_v32, %v248_v28  ;;  %v274_v32 = vrot.slane %v5079_v38, 1 }
 0x128   :  { %3893 = vmatmul.msk.f32.gmra.mxu0 %vm995_vm5, %v942_v29  ;;  %v5091_v28 = vmax.f32 %v1309_v55, 0.0  ;;  %v275_v29 = vrot.slane %v5084_v63, 1 }
 0x129   :  { %v284_v43 = vsel %vm279_vm0, %v273_v51, %v274_v32 }
 0x12a   :  { %778 = vrot.lane.b32.xlu2 %v285_v8, %s4040_s29  ;;  %522 = vrot.lane.b32.xlu1 %v4994_v61, %s4039_s24  ;;  %v106_v8 = vrot.slane %v4595_v40, 7  ;;  %v283_v40 = vsel %vm279_vm0, %v274_v32, %v275_v29 }
 0x12b   :  { %726 = vrot.lane.b32.xlu0 %v311_v26, %s4040_s29 }
 0x12c   :  { %v5055_v5 = vpop.f32.mrf.mxu0  ;;  %v5057_v57 = vpop.permute.xlu2 %506  ;;  %v192_v55 = vsel %vm150_vm1, %v105_v34, %v106_v8 }
 0x12d   :  { %v451_v47 = vpop.permute.xlu1 %450  ;;  %v757_v14 = vpop.permute.xlu0 %756  ;;  %v879_v34 = vsel %vm856_vm3, %v192_v55, %v5007_v2  ;;  %v107_v55 = vrot.slane %v4662_v24, 7 }
 0x12e   :  { %v878_v23 = vsel %vm856_vm3, %v193_v11, %v451_v47  ;;  %v968_v41 = vsel %vm921_vm4, %v903_v46, %v757_v14  ;;  %v7122_v14 = vrot.slane %v5091_v28, 7 }
 0x12f   :  { %3919 = vmatmul.msk.f32.gmra.mxu3 %vm995_vm5, %v968_v41  ;;  %v943_v37 = vsel %vm921_vm4, %v878_v23, %v4978_v48 }
 0x130   :  { %3894 = vmatmul.msk.f32.gmra.mxu0 %vm995_vm5, %v943_v37  ;;  %v5120_v37 = vld [vmem:[%s7116_s0 + $0x1e8] sm:$0xff] }
 0x132   :  { %v1311_v4 = vpop.f32.mrf.mxu3  ;;  %524 = vrot.lane.b32.xlu2 %v5021_v12, %s4039_s24  ;;  %728 = vrot.lane.b32.xlu1 %v310_v18, %s4040_s29 }
 0x133   :  { %v1312_v48 = vadd.f32 %v5062_v1, %v1311_v4  ;;  %472 = vrot.lane.b32.xlu0 %v4490_v21, %s4039_s24  ;;  %v166_v4 = vsel %vm150_vm1, %v131_v17, %v132_v60 }
 0x134   :  { %v5099_v15 = vpop.permute.xlu2 %712  ;;  %v5104_v11 = vpop.f32.mrf.mxu0 }
 0x135   :  { %v5101_v26 = vmax.f32 %v1312_v48, 0.0  ;;  %v759_v13 = vpop.permute.xlu1 %758  ;;  %v503_v46 = vpop.permute.xlu0 %502 }
 0x136   :  { %v904_v47 = vsel %vm856_vm3, %v167_v25, %v503_v46  ;;  %v276_v25 = vrot.slane %v5120_v37, 1 }
 0x137   :  { %v2458_v23 = vrot.slane %v5101_v26, 7  ;;  %v969_v41 = vsel %vm921_vm4, %v904_v47, %v759_v13 }
 0x138   :  { %3920 = vmatmul.msk.f32.gmra.mxu3 %vm995_vm5, %v969_v41  ;;  %v282_v17 = vsel %vm279_vm0, %v275_v29, %v276_v25  ;;  %v191_v29 = vsel %vm150_vm1, %v106_v8, %v107_v55 }
 0x139   :  { %v5126_v18 = vsel %vm150_vm1, %v7122_v14, %v2458_v23  ;;  %v108_v14 = vrot.slane %v4690_v10, 7 }
 0x13a   :  { %782 = vrot.lane.b32.xlu2 %v283_v40, %s4040_s29  ;;  %526 = vrot.lane.b32.xlu1 %v5079_v38, %s4039_s24 }
 0x13b   :  { %780 = vrot.lane.b32.xlu0 %v284_v43, %s4040_s29  ;;  %v1314_v51 = vpop.f32.mrf.mxu3 }
 0x13c   :  { %v1315_v48 = vadd.f32 %v5062_v1, %v1314_v51  ;;  %v5138_v32 = vpop.permute.xlu2 %458  ;;  %v5151_v51 = vpop.f32.mrf.mxu0 }
 0x13d   :  { %v505_v13 = vpop.permute.xlu1 %504  ;;  %v709_v46 = vpop.permute.xlu0 %708 }
 0x13e   :  { %v5140_v47 = vmax.f32 %v1315_v48, 0.0  ;;  %v905_v41 = vsel %vm856_vm3, %v166_v4, %v505_v13  ;;  %v944_v2 = vsel %vm921_vm4, %v879_v34, %v709_v46  ;;  %v5157_v34 = vld [vmem:[%s7116_s0 + $0x1f0] sm:$0xff]  ;;  %v278_v48 = vrot.slane %v4386_v39, 1 }
 0x13f   :  { %3895 = vmatmul.msk.f32.gmra.mxu0 %vm995_vm5, %v944_v2  ;;  %v970_v40 = vsel %vm921_vm4, %v905_v41, %v5034_v35  ;;  %v277_v4 = vrot.slane %v5157_v34, 1  ;;  %v133_v13 = vrot.slane %v4657_v33, 7 }
 0x140   :  { %v2459_v43 = vrot.slane %v5140_v47, 7  ;;  %3921 = vmatmul.msk.f32.gmra.mxu3 %vm995_vm5, %v970_v40 }
 0x141   :  { %v280_v50 = vsel %vm279_vm0, %v277_v4, %v278_v48  ;;  %v165_v33 = vsel %vm150_vm1, %v132_v60, %v133_v13 }
 0x142   :  { %530 = vrot.lane.b32.xlu2 %v5120_v37, %s4039_s24  ;;  %784 = vrot.lane.b32.xlu1 %v282_v17, %s4040_s29  ;;  %v5164_v35 = vsel %vm150_vm1, %v2458_v23, %v2459_v43  ;;  %v906_v60 = vsel %vm856_vm3, %v165_v33, %v5057_v57  ;;  %v1210_v57 = vadd.f32 %v5062_v1, %v4883_v36 }
 0x143   :  { %528 = vrot.lane.b32.xlu0 %v5084_v63, %s4039_s24  ;;  %v1317_v24 = vpop.f32.mrf.mxu3 }
 0x144   :  { %v1318_v46 = vadd.f32 %v5062_v1, %v1317_v24  ;;  %v5174_v41 = vpop.permute.xlu2 %766  ;;  %v5189_v20 = vpop.f32.mrf.mxu0  ;;  %v5229_v36 = vmax.f32 %v1210_v57, 0.0 }
 0x145   :  { %v711_v2 = vpop.permute.xlu1 %710  ;;  %v455_v23 = vpop.permute.xlu0 %454 }
 0x146   :  { %v5176_v40 = vmax.f32 %v1318_v46, 0.0  ;;  %v880_v17 = vsel %vm856_vm3, %v191_v29, %v455_v23  ;;  %v281_v46 = vsel %vm279_vm0, %v276_v25, %v277_v4  ;;  %v190_v29 = vsel %vm150_vm1, %v107_v55, %v108_v14  ;;  %7145 = vst [vmem:[#allocation3_spill] sm:$0xff] %v5229_v36 }
 0x147   :  { %v945_v8 = vsel %vm921_vm4, %v880_v17, %v711_v2  ;;  %v1216_v4 = vadd.f32 %v5062_v1, %v4944_v53  ;;  %v134_v53 = vrot.slane %v4721_v0, 7  ;;  %v7125_v57 = vrot.slane %v5229_v36, 1 }
 0x148   :  { %v2460_v24 = vrot.slane %v5176_v40, 7  ;;  %3896 = vmatmul.msk.f32.gmra.mxu0 %vm995_vm5, %v945_v8 }
 0x149   :  { %v5224_v33 = vmax.f32 %v1216_v4, 0.0  ;;  %v164_v0 = vsel %vm150_vm1, %v133_v13, %v134_v53 }
 0x14a   :  { %788 = vrot.lane.b32.xlu2 %v280_v50, %s4040_s29  ;;  %532 = vrot.lane.b32.xlu1 %v5157_v34, %s4039_s24  ;;  %v5196_v10 = vsel %vm150_vm1, %v2459_v43, %v2460_v24  ;;  %v1213_v50 = vadd.f32 %v5062_v1, %v4915_v22  ;;  %v343_v22 = vsel %vm279_vm0, %v278_v48, %v215_v9  ;;  %v4036_v9 = vld [vmem:[%s7116_s0 + $0x1f8] sm:$0xff]  ;;  %s4042_s0 = smov 64  }
 0x14b   :  { %786 = vrot.lane.b32.xlu0 %v281_v46, %s4040_s29 }
 0x14c   :  { %v5203_v25 = vpop.permute.xlu2 %512  ;;  %v5222_v8 = vmax.f32 %v1213_v50, 0.0  ;;  %v5239_v48 = vpop.f32.mrf.mxu0 }
 0x14d   :  { %v457_v2 = vpop.permute.xlu1 %456  ;;  %v763_v23 = vpop.permute.xlu0 %762 }
 0x14e   :  { %v881_v43 = vsel %vm856_vm3, %v190_v29, %v457_v2  ;;  %v971_v17 = vsel %vm921_vm4, %v906_v60, %v763_v23  ;;  %7144 = vst [vmem:[#allocation2_spill] sm:$0xff] %v5222_v8  ;;  %v2553_v2 = vrot.slane %v5222_v8, 1  ;;  %v7127_v23 = vrot.slane %v5224_v33, 1 }
 0x14f   :  { %3922 = vmatmul.msk.f32.gmra.mxu3 %vm995_vm5, %v971_v17  ;;  %v946_v55 = vsel %vm921_vm4, %v881_v43, %v5099_v15  ;;  %v109_v15 = vrot.slane %v4716_v31, 7  ;;  %v135_v17 = vrot.slane %v4751_v6, 7 }
 0x150   :  { %3897 = vmatmul.msk.f32.gmra.mxu0 %vm995_vm5, %v946_v55  ;;  %v2677_v6 = vsel %vm279_vm0, %v2553_v2, %v7127_v23 }
 0x151   :  { %v189_v55 = vsel %vm150_vm1, %v108_v14, %v109_v15 }
 0x152   :  { %v1320_v46 = vpop.f32.mrf.mxu3  ;;  %2810 = vrot.lane.b32.xlu2 %v5091_v28, %s4041_s16  ;;  %790 = vrot.lane.b32.xlu1 %v343_v22, %s4040_s29  ;;  %v2678_v22 = vsel %vm279_vm0, %v7125_v57, %v2553_v2  ;;  %v882_v14 = vsel %vm856_vm3, %v189_v55, %v5138_v32  ;;  %v1503_v2 = vadd.s32 312, %v4101_v7 }
 0x153   :  { %v1321_v3 = vadd.f32 %v5062_v1, %v1320_v46  ;;  %534 = vrot.lane.b32.xlu0 %v4036_v9, %s4039_s24  ;;  %v163_v9 = vsel %vm150_vm1, %v134_v53, %v135_v17 }
 0x154   :  { %v5241_v60 = vpop.permute.xlu2 %718  ;;  %v1805_v57 = vand.u32 63, %v1503_v2 }
 0x155   :  { %v5243_v29 = vmax.f32 %v1321_v3, 0.0  ;;  %v765_v50 = vpop.permute.xlu1 %764  ;;  %v509_v4 = vpop.permute.xlu0 %508 }
 0x156   :  { %v907_v43 = vsel %vm856_vm3, %v164_v0, %v509_v4  ;;  %vm2335_vm6 = vcmp.lt.s32.totalorder %v1805_v57, 60 }
 0x157   :  { %v2461_v13 = vrot.slane %v5243_v29, 7  ;;  %v972_v31 = vsel %vm921_vm4, %v907_v43, %v765_v50  ;;  %v5279_v43 = vpop.f32.mrf.mxu0 }
 0x158   :  { %3923 = vmatmul.msk.f32.gmra.mxu3 %vm995_vm5, %v972_v31 }
 0x159   :  { %v5265_v46 = vsel %vm150_vm1, %v2460_v24, %v2461_v13 }
 0x15a   :  { %3000 = vrot.lane.b32.xlu1 %v2678_v22, %s4042_s0  ;;  %3002 = vrot.lane.b32.xlu2 %v2677_v6, %s4042_s0  ;;  %v2586_v22 = vrot.slane %v5101_v26, 1  ;;  %v110_v6 = vrot.slane %v4783_v52, 7 }
 0x15b   :  { %v1323_v3 = vpop.f32.mrf.mxu3  ;;  %2744 = vrot.lane.b32.xlu0 %v5229_v36, %s4041_s16 }
 0x15c   :  { %v1324_v0 = vadd.f32 %v5062_v1, %v1323_v3  ;;  %v5276_v50 = vpop.permute.xlu2 %464 }
 0x15d   :  { %v511_v24 = vpop.permute.xlu1 %510  ;;  %v715_v4 = vpop.permute.xlu0 %714 }
 0x15e   :  { %v5281_v31 = vmax.f32 %v1324_v0, 0.0  ;;  %v908_v32 = vsel %vm856_vm3, %v163_v9, %v511_v24  ;;  %v947_v55 = vsel %vm921_vm4, %v882_v14, %v715_v4  ;;  %v7126_v0 = vrot.slane %v5091_v28, 1 }
 0x15f   :  { %3898 = vmatmul.msk.f32.gmra.mxu0 %vm995_vm5, %v947_v55  ;;  %v973_v53 = vsel %vm921_vm4, %v908_v32, %v5174_v41  ;;  %v188_v9 = vsel %vm150_vm1, %v109_v15, %v110_v6  ;;  %v136_v24 = vrot.slane %v4778_v59, 7  ;;  %v111_v15 = vrot.slane %v4811_v19, 7  ;;  %v5321_v57 = vpop.f32.mrf.mxu0 }
 0x160   :  { %v2462_v3 = vrot.slane %v5281_v31, 7  ;;  %3924 = vmatmul.msk.f32.gmra.mxu3 %vm995_vm5, %v973_v53  ;;  %v2645_v14 = vsel %vm279_vm0, %v7126_v0, %v2586_v22  ;;  %v2587_v53 = vrot.slane %v5140_v47, 1  ;;  %v1219_v0 = vadd.f32 %v5062_v1, %v4976_v27 }
 0x162   :  { %2746 = vrot.lane.b32.xlu1 %v5222_v8, %s4041_s16  ;;  %2748 = vrot.lane.b32.xlu2 %v5224_v33, %s4041_s16  ;;  %v5303_v52 = vsel %vm150_vm1, %v2461_v13, %v2462_v3  ;;  %v2644_v27 = vsel %vm279_vm0, %v2586_v22, %v2587_v53  ;;  %v187_v22 = vsel %vm150_vm1, %v110_v6, %v111_v15 }
 0x163   :  { %v1326_v41 = vpop.f32.mrf.mxu3  ;;  %3066 = vrot.lane.b32.xlu0 %v2645_v14, %s4042_s0 }
 0x164   :  { %v1327_v4 = vadd.f32 %v5062_v1, %v1326_v41  ;;  %v5310_v2 = vpop.permute.xlu2 %772  ;;  %v162_v41 = vsel %vm150_vm1, %v135_v17, %v136_v24 }
 0x165   :  { %v717_v32 = vpop.permute.xlu1 %716  ;;  %v461_v55 = vpop.permute.xlu0 %460  ;;  %v909_v17 = vsel %vm856_vm3, %v162_v41, %v5203_v25  ;;  %v1225_v25 = vadd.f32 %v5062_v1, %v5032_v45 }
 0x166   :  { %v1440_v14 = vmax.f32 %v1327_v4, 0.0  ;;  %v883_v23 = vsel %vm856_vm3, %v188_v9, %v461_v55  ;;  %v7146_v9 = vrot.slane %v5176_v40, 1 }
 0x167   :  { %v948_v59 = vsel %vm921_vm4, %v883_v23, %v717_v32  ;;  %v5333_v23 = vmax.f32 %v1219_v0, 0.0  ;;  %v1222_v32 = vadd.f32 %v5062_v1, %v5005_v58  ;;  %v5365_v45 = vmax.f32 %v1225_v25, 0.0  ;;  %v5367_v41 = vpop.f32.mrf.mxu0 }
 0x168   :  { %v5323_v8 = vsel %vm2335_vm6, %v1440_v14, 0.0  ;;  %3899 = vmatmul.msk.f32.gmra.mxu0 %vm995_vm5, %v948_v59  ;;  %v2643_v19 = vsel %vm279_vm0, %v2587_v53, %v7146_v9  ;;  %v137_v59 = vrot.slane %v4841_v62, 7 }
 0x169   :  { %v7129_v13 = vrot.slane %v5323_v8, 7  ;;  %v2555_v14 = vrot.slane %v5333_v23, 1  ;;  %v5363_v58 = vmax.f32 %v1222_v32, 0.0  ;;  %v2557_v25 = vrot.slane %v5365_v45, 1 }
 0x16a   :  { %3068 = vrot.lane.b32.xlu1 %v2644_v27, %s4042_s0  ;;  %3070 = vrot.lane.b32.xlu2 %v2643_v19, %s4042_s0  ;;  %v7147_v27 = vrot.slane %v5224_v33, 1  ;;  %v161_v62 = vsel %vm150_vm1, %v136_v24, %v137_v59 }
 0x16b   :  { %2812 = vrot.lane.b32.xlu0 %v5101_v26, %s4041_s16  ;;  %v5347_v4 = vsel %vm150_vm1, %v2462_v3, %v7129_v13  ;;  %v2556_v32 = vrot.slane %v5363_v58, 1 }
 0x16c   :  { %v5349_v0 = vpop.permute.xlu2 %518  ;;  %v2676_v9 = vsel %vm279_vm0, %v7147_v27, %v2555_v14 }
 0x16d   :  { %v463_v55 = vpop.permute.xlu1 %462  ;;  %v769_v53 = vpop.permute.xlu0 %768  ;;  %v2674_v24 = vsel %vm279_vm0, %v2556_v32, %v2557_v25 }
 0x16e   :  { %v884_v26 = vsel %vm856_vm3, %v187_v22, %v463_v55  ;;  %v974_v6 = vsel %vm921_vm4, %v909_v17, %v769_v53  ;;  %v138_v55 = vrot.slane %v4872_v16, 7 }
 0x16f   :  { %3925 = vmatmul.msk.f32.gmra.mxu3 %vm995_vm5, %v974_v6  ;;  %v949_v3 = vsel %vm921_vm4, %v884_v26, %v5241_v60  ;;  %v112_v60 = vrot.slane %v4836_v49, 7  ;;  %v2675_v49 = vsel %vm279_vm0, %v2555_v14, %v2556_v32  ;;  %v5405_v6 = vpop.f32.mrf.mxu0 }
 0x170   :  { %3900 = vmatmul.msk.f32.gmra.mxu0 %vm995_vm5, %v949_v3 }
 0x171   :  { %v186_v26 = vsel %vm150_vm1, %v111_v15, %v112_v60  ;;  %v160_v15 = vsel %vm150_vm1, %v137_v59, %v138_v55  ;;  %v7148_v59 = vrot.slane %v5176_v40, 1 }
 0x172   :  { %2814 = vrot.lane.b32.xlu1 %v5140_v47, %s4041_s16  ;;  %2816 = vrot.lane.b32.xlu2 %v5176_v40, %s4041_s16  ;;  %v885_v16 = vsel %vm856_vm3, %v186_v26, %v5276_v50  ;;  %v2590_v40 = vrot.slane %v5281_v31, 1 }
 0x173   :  { %3004 = vrot.lane.b32.xlu0 %v2676_v9, %s4042_s0 }
 0x174   :  { %v5381_v19 = vpop.permute.xlu2 %724 }
 0x175   :  { %v771_v17 = vpop.permute.xlu1 %770  ;;  %v515_v22 = vpop.permute.xlu0 %514 }
 0x176   :  { %v910_v47 = vsel %vm856_vm3, %v161_v62, %v515_v22  ;;  %v113_v22 = vrot.slane %v4904_v30, 7  ;;  %v139_v30 = vrot.slane %v4899_v44, 7 }
 0x177   :  { %v975_v53 = vsel %vm921_vm4, %v910_v47, %v771_v17  ;;  %v2589_v17 = vrot.slane %v5243_v29, 1 }
 0x178   :  { %3926 = vmatmul.msk.f32.gmra.mxu3 %vm995_vm5, %v975_v53  ;;  %v2591_v53 = vrot.slane %v5323_v8, 1 }
 0x179   :  { %v2642_v32 = vsel %vm279_vm0, %v7148_v59, %v2589_v17 }
 0x17a   :  { %3006 = vrot.lane.b32.xlu1 %v2675_v49, %s4042_s0  ;;  %3008 = vrot.lane.b32.xlu2 %v2674_v24, %s4042_s0  ;;  %v1228_v24 = vadd.f32 %v5062_v1, %v5055_v5  ;;  %v2640_v5 = vsel %vm279_vm0, %v2590_v40, %v2591_v53 }
 0x17b   :  { %2750 = vrot.lane.b32.xlu0 %v5333_v23, %s4041_s16 }
 0x17c   :  { %v5407_v14 = vpop.permute.xlu2 %470 }
 0x17d   :  { %v517_v3 = vpop.permute.xlu1 %516  ;;  %v721_v27 = vpop.permute.xlu0 %720 }
 0x17e   :  { %v911_v9 = vsel %vm856_vm3, %v160_v15, %v517_v3  ;;  %v950_v62 = vsel %vm921_vm4, %v885_v16, %v721_v27  ;;  %v5435_v16 = vpop.f32.mrf.mxu0  ;;  %v1471_v3 = vadd.s32 56, %v4101_v7  ;;  %v159_v27 = vsel %vm150_vm1, %v138_v55, %v139_v30 }
 0x17f   :  { %3901 = vmatmul.msk.f32.gmra.mxu0 %vm995_vm5, %v950_v62  ;;  %v976_v50 = vsel %vm921_vm4, %v911_v9, %v5310_v2  ;;  %v185_v2 = vsel %vm150_vm1, %v112_v60, %v113_v22  ;;  %v114_v60 = vrot.slane %v4933_v54, 7  ;;  %v2641_v9 = vsel %vm279_vm0, %v2589_v17, %v2590_v40 }
 0x180   :  { %3927 = vmatmul.msk.f32.gmra.mxu3 %vm995_vm5, %v976_v50  ;;  %v5450_v62 = vmax.f32 %v1228_v24, 0.0  ;;  %v1231_v54 = vadd.f32 %v5062_v1, %v5104_v11  ;;  %v1329_v50 = vpop.f32.mrf.mxu3  ;;  %v1581_v55 = vand.u32 63, %v1471_v3  ;;  %v912_v59 = vsel %vm856_vm3, %v159_v27, %v5349_v0 }
 0x181   :  { %v184_v17 = vsel %vm150_vm1, %v113_v22, %v114_v60  ;;  %v1234_v11 = vadd.f32 %v5062_v1, %v5151_v51  ;;  %v140_v22 = vrot.slane %v4965_v56, 7  ;;  %v115_v27 = vrot.slane %v4960_v42, 7 }
 0x182   :  { %2752 = vrot.lane.b32.xlu1 %v5363_v58, %s4041_s16  ;;  %2754 = vrot.lane.b32.xlu2 %v5365_v45, %s4041_s16  ;;  %vm2303_vm7 = vcmp.lt.s32.totalorder %v1581_v55, 60 }
 0x183   :  { %3072 = vrot.lane.b32.xlu0 %v2642_v32, %s4042_s0  ;;  %v5476_v51 = vmax.f32 %v1234_v11, 0.0  ;;  %v158_v56 = vsel %vm150_vm1, %v139_v30, %v140_v22  ;;  %v183_v30 = vsel %vm150_vm1, %v114_v60, %v115_v27 }
 0x184   :  { %v5429_v47 = vpop.permute.xlu2 %778 }
 0x185   :  { %v723_v26 = vpop.permute.xlu1 %722  ;;  %v467_v49 = vpop.permute.xlu0 %466 }
 0x186   :  { %v886_v15 = vsel %vm856_vm3, %v185_v2, %v467_v49  ;;  %v1408_v49 = vmax.f32 %v1231_v54, 0.0 }
 0x187   :  { %v951_v44 = vsel %vm921_vm4, %v886_v15, %v723_v26  ;;  %v2558_v26 = vrot.slane %v5450_v62, 1  ;;  %v5473_v15 = vpop.f32.mrf.mxu0 }
 0x188   :  { %3902 = vmatmul.msk.f32.gmra.mxu0 %vm995_vm5, %v951_v44  ;;  %v5478_v3 = vsel %vm2303_vm7, %v1408_v49, 0.0 }
 0x189   :  { %v2673_v44 = vsel %vm279_vm0, %v2557_v25, %v2558_v26  ;;  %v7130_v25 = vrot.slane %v5476_v51, 1 }
 0x18a   :  { %3074 = vrot.lane.b32.xlu1 %v2641_v9, %s4042_s0  ;;  %3076 = vrot.lane.b32.xlu2 %v2640_v5, %s4042_s0  ;;  %v2559_v5 = vrot.slane %v5478_v3, 1 }
 0x18b   :  { %2818 = vrot.lane.b32.xlu0 %v5243_v29, %s4041_s16 }
 0x18c   :  { %v5462_v32 = vpop.permute.xlu2 %524  ;;  %v2672_v42 = vsel %vm279_vm0, %v2558_v26, %v2559_v5 }
 0x18d   :  { %v469_v2 = vpop.permute.xlu1 %468  ;;  %v775_v40 = vpop.permute.xlu0 %774 }
 0x18e   :  { %v887_v24 = vsel %vm856_vm3, %v184_v17, %v469_v2  ;;  %v977_v0 = vsel %vm921_vm4, %v912_v59, %v775_v40  ;;  %v141_v17 = vrot.slane %v4994_v61, 7  ;;  %v2671_v2 = vsel %vm279_vm0, %v2559_v5, %v7130_v25 }
 0x18f   :  { %3928 = vmatmul.msk.f32.gmra.mxu3 %vm995_vm5, %v977_v0  ;;  %v952_v29 = vsel %vm921_vm4, %v887_v24, %v5381_v19  ;;  %v5491_v19 = vpop.f32.mrf.mxu3  ;;  %v5511_v40 = vpop.f32.mrf.mxu0  ;;  %v888_v61 = vsel %vm856_vm3, %v183_v30, %v5407_v14  ;;  %v7149_v5 = vrot.slane %v4490_v21, 7  ;;  %v143_v21 = vrot.slane %v5079_v38, 7 }
 0x190   :  { %3903 = vmatmul.msk.f32.gmra.mxu0 %vm995_vm5, %v952_v29  ;;  %v157_v60 = vsel %vm150_vm1, %v140_v22, %v141_v17 }
 0x192   :  { %2820 = vrot.lane.b32.xlu1 %v5281_v31, %s4041_s16  ;;  %2822 = vrot.lane.b32.xlu2 %v5323_v8, %s4041_s16  ;;  %v1330_v31 = vadd.f32 %v5062_v1, %v1329_v50 }
 0x193   :  { %3010 = vrot.lane.b32.xlu0 %v2673_v44, %s4042_s0 }
 0x194   :  { %v783_v9 = vpop.permute.xlu2 %782  ;;  %v5509_v50 = vmax.f32 %v1330_v31, 0.0 }
 0x195   :  { %v777_v54 = vpop.permute.xlu1 %776  ;;  %v521_v55 = vpop.permute.xlu0 %520 }
 0x196   :  { %v913_v59 = vsel %vm856_vm3, %v158_v56, %v521_v55  ;;  %v7131_v0 = vrot.slane %v5509_v50, 1 }
 0x197   :  { %v978_v11 = vsel %vm921_vm4, %v913_v59, %v777_v54  ;;  %v5522_v29 = vpop.f32.mrf.mxu3  ;;  %v182_v54 = vsel %vm150_vm1, %v115_v27, %v7149_v5  ;;  %v5544_v55 = vpop.f32.mrf.mxu0 }
 0x198   :  { %3929 = vmatmul.msk.f32.gmra.mxu3 %vm995_vm5, %v978_v11  ;;  %v2639_v22 = vsel %vm279_vm0, %v2591_v53, %v7131_v0 }
 0x19a   :  { %3012 = vrot.lane.b32.xlu1 %v2672_v42, %s4042_s0  ;;  %3014 = vrot.lane.b32.xlu2 %v2671_v2, %s4042_s0 }
 0x19b   :  { %2756 = vrot.lane.b32.xlu0 %v5450_v62, %s4041_s16 }
 0x19c   :  { %v531_v26 = vpop.permute.xlu2 %530 }
 0x19d   :  { %v523_v49 = vpop.permute.xlu1 %522  ;;  %v727_v24 = vpop.permute.xlu0 %726 }
 0x19e   :  { %v914_v44 = vsel %vm856_vm3, %v157_v60, %v523_v49  ;;  %v953_v56 = vsel %vm921_vm4, %v888_v61, %v727_v24 }
 0x19f   :  { %3904 = vmatmul.msk.f32.gmra.mxu0 %vm995_vm5, %v953_v56  ;;  %v979_v14 = vsel %vm921_vm4, %v914_v44, %v5429_v47  ;;  %v142_v47 = vrot.slane %v5021_v12, 7  ;;  %v5546_v30 = vpop.f32.mrf.mxu3  ;;  %v5556_v27 = vpop.f32.mrf.mxu0  ;;  %v144_v56 = vrot.slane %v5084_v63, 7 }
 0x1a0   :  { %3930 = vmatmul.msk.f32.gmra.mxu3 %vm995_vm5, %v979_v14 }
 0x1a1   :  { %v156_v2 = vsel %vm150_vm1, %v141_v17, %v142_v47  ;;  %v155_v24 = vsel %vm150_vm1, %v142_v47, %v143_v21  ;;  %v154_v47 = vsel %vm150_vm1, %v143_v21, %v144_v56 }
 0x1a2   :  { %2758 = vrot.lane.b32.xlu1 %v5478_v3, %s4041_s16  ;;  %v915_v12 = vsel %vm856_vm3, %v156_v2, %v5462_v32 }
 0x1a3   :  { %3078 = vrot.lane.b32.xlu0 %v2639_v22, %s4042_s0 }
 0x1a4   :  { %v789_v31 = vpop.permute.xlu2 %788 }
 0x1a5   :  { %v729_v59 = vpop.permute.xlu1 %728  ;;  %v473_v11 = vpop.permute.xlu0 %472 }
 0x1a6   :  { %v889_v53 = vsel %vm856_vm3, %v182_v54, %v473_v11  ;;  %v145_v11 = vrot.slane %v5120_v37, 7  ;;  %v146_v37 = vrot.slane %v5157_v34, 7 }
 0x1a7   :  { %v954_v42 = vsel %vm921_vm4, %v889_v53, %v729_v59  ;;  %v5564_v17 = vpop.f32.mrf.mxu3  ;;  %v5571_v54 = vpop.f32.mrf.mxu0 }
 0x1a8   :  { %3905 = vmatmul.msk.f32.gmra.mxu0 %vm995_vm5, %v954_v42 }
 0x1ac   :  { %v5558_v61 = vpop.permute.xlu2 %2810 }
 0x1ad   :  { %v527_v60 = vpop.permute.xlu1 %526  ;;  %v781_v49 = vpop.permute.xlu0 %780 }
 0x1ae   :  { %v980_v44 = vsel %vm921_vm4, %v915_v12, %v781_v49  ;;  %v916_v38 = vsel %vm856_vm3, %v155_v24, %v527_v60  ;;  %v153_v12 = vsel %vm150_vm1, %v144_v56, %v145_v11 }
 0x1af   :  { %3931 = vmatmul.msk.f32.gmra.mxu3 %vm995_vm5, %v980_v44  ;;  %v981_v14 = vsel %vm921_vm4, %v916_v38, %v783_v9  ;;  %v5578_v53 = vpop.f32.mrf.mxu3  ;;  %v5586_v21 = vpop.f32.mrf.mxu0  ;;  %v918_v60 = vsel %vm856_vm3, %v153_v12, %v531_v26 }
 0x1b0   :  { %7150 = vst [vmem:[#allocation4_spill] sm:$0xff] %v5586_v21 }
 0x1b4   :  { %v5568_v32 = vpop.permute.xlu2 %3002 }
 0x1b5   :  { %v785_v22 = vpop.permute.xlu1 %784  ;;  %v529_v5 = vpop.permute.xlu0 %528 }
 0x1b6   :  { %v917_v59 = vsel %vm856_vm3, %v154_v47, %v529_v5 }
 0x1b7   :  { %3932 = vmatmul.msk.f32.gmra.mxu3 %vm995_vm5, %v981_v14  ;;  %v982_v42 = vsel %vm921_vm4, %v917_v59, %v785_v22  ;;  %v5589_v49 = vpop.f32.mrf.mxu3  ;;  %v152_v22 = vsel %vm150_vm1, %v145_v11, %v146_v37  ;;  %v7152_v11 = vrot.slane %v4386_v39, 7 }
 0x1b9   :  { %v151_v12 = vsel %vm150_vm1, %v146_v37, %v7152_v11 }
 0x1bc   :  { %v5580_v63 = vpop.permute.xlu2 %2748  ;;  %v5596_v56 = vpop.f32.mrf.mxu0 }
 0x1bd   :  { %v533_v9 = vpop.permute.xlu1 %532  ;;  %v787_v2 = vpop.permute.xlu0 %786  ;;  %7151 = vst [vmem:[#allocation5_spill] sm:$0xff] %v5596_v56 }
 0x1be   :  { %v983_v24 = vsel %vm921_vm4, %v918_v60, %v787_v2  ;;  %v919_v5 = vsel %vm856_vm3, %v152_v22, %v533_v9 }
 0x1bf   :  { %3933 = vmatmul.msk.f32.gmra.mxu3 %vm995_vm5, %v982_v42  ;;  %v5599_v47 = vpop.f32.mrf.mxu3  ;;  %v984_v34 = vsel %vm921_vm4, %v919_v5, %v789_v31 }
 0x1c4   :  { %v3071_v44 = vpop.permute.xlu2 %3070 }
 0x1c5   :  { %v791_v38 = vpop.permute.xlu1 %790  ;;  %v535_v14 = vpop.permute.xlu0 %534 }
 0x1c6   :  { %v920_v9 = vsel %vm856_vm3, %v151_v12, %v535_v14  ;;  %v5614_v60 = vpop.f32.mrf.mxu0 }
 0x1c7   :  { %3934 = vmatmul.msk.f32.gmra.mxu3 %vm995_vm5, %v983_v24  ;;  %7153 = vst [vmem:[#allocation6_spill] sm:$0xff] %v5614_v60  ;;  %v985_v31 = vsel %vm921_vm4, %v920_v9, %v791_v38 }
 0x1cc   :  { %v2817_v26 = vpop.permute.xlu2 %2816 }
 0x1cd   :  { %v5602_v59 = vpop.permute.xlu0 %2744  ;;  %v5604_v42 = vpop.permute.xlu1 %3000  ;;  %v3229_v2 = vsel %vm3192_vm8, %v5196_v10, %v2817_v26 }
 0x1ce   :  { %v5623_v10 = vpop.f32.mrf.mxu3  ;;  %v5626_v39 = vpop.f32.mrf.mxu0 }
 0x1cf   :  { %3935 = vmatmul.msk.f32.gmra.mxu3 %vm995_vm5, %v984_v34  ;;  %7155 = vst [vmem:[#allocation8_spill] sm:$0xff] %v5626_v39 }
 0x1d4   :  { %v5616_v24 = vpop.permute.xlu2 %3008 }
 0x1d5   :  { %v5619_v22 = vpop.permute.xlu0 %3066  ;;  %v5621_v5 = vpop.permute.xlu1 %2746 }
 0x1d6   :  { %7154 = vst [vmem:[#allocation7_spill] sm:$0xff] %v5619_v22  ;;  %v5630_v34 = vpop.f32.mrf.mxu3 }
 0x1d7   :  { %3936 = vmatmul.msk.f32.gmra.mxu3 %vm995_vm5, %v985_v31 }
 0x1dc   :  { %v5628_v37 = vpop.permute.xlu2 %2754  ;;  %v5637_v12 = vpop.f32.mrf.mxu0 }
 0x1dd   :  { %v2813_v26 = vpop.permute.xlu0 %2812  ;;  %v3069_v14 = vpop.permute.xlu1 %3068  ;;  %7157 = vst [vmem:[#allocation10_spill] sm:$0xff] %v5637_v12 }
 0x1de   :  { %v3227_v11 = vsel %vm3192_vm8, %v5126_v18, %v2813_v26  ;;  %v5643_v0 = vpop.f32.mrf.mxu3 }
 0x1df   :  { %v5635_v38 = vsel %vm3257_vm9, %v3227_v11, %v3069_v14 }
 0x1e0   :  { %7156 = vst [vmem:[#allocation9_spill] sm:$0xff] %v5635_v38 }
 0x1e4   :  { %v3077_v9 = vpop.permute.xlu2 %3076 }
 0x1e5   :  { %v5639_v13 = vpop.permute.xlu0 %3004  ;;  %v2815_v31 = vpop.permute.xlu1 %2814 }
 0x1e6   :  { %v3228_v25 = vsel %vm3192_vm8, %v5164_v35, %v2815_v31  ;;  %v5654_v14 = vpop.f32.mrf.mxu0  ;;  %v5658_v12 = vpop.f32.mrf.mxu3 }
 0x1e7   :  { %v5646_v39 = vsel %vm3257_vm9, %v3228_v25, %v3071_v44  ;;  %7160 = vst [vmem:[#allocation13_spill] sm:$0xff] %v5654_v14 }
 0x1e8   :  { %7158 = vst [vmem:[#allocation11_spill] sm:$0xff] %v5646_v39 }
 0x1ec   :  { %v2823_v60 = vpop.permute.xlu2 %2822 }
 0x1ed   :  { %v5648_v18 = vpop.permute.xlu0 %2750  ;;  %v5652_v26 = vsel %vm3192_vm8, %v5347_v4, %v2823_v60  ;;  %v5656_v11 = vpop.permute.xlu1 %3006 }
 0x1ee   :  { %7159 = vst [vmem:[#allocation12_spill] sm:$0xff] %v5652_v26  ;;  %v5665_v25 = vpop.f32.mrf.mxu0 }
 0x1ef   :  { %7162 = vst [vmem:[#allocation15_spill] sm:$0xff] %v5665_v25 }
 0x1f2   :  { %v5667_v44 = vpop.f32.mrf.mxu3 }
 0x1f5   :  { %v3073_v38 = vpop.permute.xlu0 %3072  ;;  %v5660_v35 = vpop.permute.xlu1 %2752 }
 0x1f6   :  { %v5663_v31 = vsel %vm3257_vm9, %v3229_v2, %v3073_v38 }
 0x1f7   :  { %7161 = vst [vmem:[#allocation14_spill] sm:$0xff] %v5663_v31 }
 0x1fb   :  { %v5676_v56 = vpop.f32.mrf.mxu3 }
 0x1fc   :  { %v5674_v26 = vpop.f32.mrf.mxu0 }
 0x1fd   :  { %v2819_v39 = vpop.permute.xlu0 %2818  ;;  %v3075_v60 = vpop.permute.xlu1 %3074  ;;  %7164 = vst [vmem:[#allocation17_spill] sm:$0xff] %v5674_v26 }
 0x1fe   :  { %v3230_v4 = vsel %vm3192_vm8, %v5265_v46, %v2819_v39 }
 0x1ff   :  { %v5672_v14 = vsel %vm3257_vm9, %v3230_v4, %v3075_v60  ;;  %v1495_v4 = vadd.s32 248, %v4101_v7 }
 0x200   :  { %7163 = vst [vmem:[#allocation16_spill] sm:$0xff] %v5672_v14 }
 0x201   :  { %v1749_v60 = vand.u32 63, %v1495_v4 }
 0x203   :  { %v5685_v31 = vpop.f32.mrf.mxu3  ;;  %vm2327_vm10 = vcmp.lt.s32.totalorder %v1749_v60, 60 }
 0x205   :  { %v2821_v22 = vpop.permute.xlu1 %2820  ;;  %v5683_v25 = vpop.f32.mrf.mxu0 }
 0x206   :  { %v3231_v2 = vsel %vm3192_vm8, %v5303_v52, %v2821_v22  ;;  %7166 = vst [vmem:[#allocation19_spill] sm:$0xff] %v5683_v25 }
 0x207   :  { %v5681_v38 = vsel %vm3257_vm9, %v3231_v2, %v3077_v9  ;;  %v1333_v9 = vadd.f32 %v5062_v1, %v5491_v19 }
 0x208   :  { %7165 = vst [vmem:[#allocation18_spill] sm:$0xff] %v5681_v38 }
 0x209   :  { %v5702_v4 = vmax.f32 %v1333_v9, 0.0 }
 0x20b   :  { %7169 = vst [vmem:[#allocation22_spill] sm:$0xff] %v5702_v4 }
 0x20d   :  { %v5687_v46 = vpop.f32.mrf.mxu0 }
 0x212   :  { %v5689_v39 = vpop.f32.mrf.mxu3 }
 0x213   :  { %7167 = vst [vmem:[#allocation20_spill] sm:$0xff] %v5689_v39  ;;  %v2593_v39 = vrot.slane %v5702_v4, 1 }
 0x21b   :  { %v5693_v52 = vpop.f32.mrf.mxu3 }
 0x21c   :  { %v1302_v26 = vpop.f32.mrf.mxu0  ;;  %7168 = vst [vmem:[#allocation21_spill] sm:$0xff] %v5693_v52 }
 0x21d   :  { %v1303_v14 = vadd.f32 %v5062_v1, %v1302_v26 }
 0x21f   :  { %v1432_v21 = vmax.f32 %v1303_v14, 0.0 }
 0x221   :  { %v5695_v22 = vsel %vm2327_vm10, %v1432_v21, 0.0 }
 0x222   :  { %2806 = vrot.lane.b32.xlu2 %v5695_v22, %s4041_s16  ;;  %v7133_v26 = vrot.slane %v5695_v22, 7  ;;  %v7132_v14 = vrot.slane %v5695_v22, 1 }
 0x223   :  { %v5706_v60 = vpop.f32.mrf.mxu3 }
 0x224   :  { %7170 = vst [vmem:[#allocation23_spill] sm:$0xff] %v5706_v60  ;;  %v7172_v60 = vrot.slane %v5091_v28, 7 }
 0x225   :  { %v1305_v2 = vpop.f32.mrf.mxu0 }
 0x226   :  { %v1306_v25 = vadd.f32 %v5062_v1, %v1305_v2  ;;  %v7171_v2 = vrot.slane %v5091_v28, 1  ;;  %v1237_v28 = vadd.f32 %v5062_v1, %v5189_v20 }
 0x228   :  { %v1433_v38 = vmax.f32 %v1306_v25, 0.0  ;;  %v5752_v20 = vmax.f32 %v1237_v28, 0.0  ;;  %v3328_v28 = vld [vmem:[%s7119_s3 + $0x30] sm:$0xff] }
 0x22a   :  { %v2456_v21 = vrot.slane %v1433_v38, 7  ;;  %v2584_v52 = vrot.slane %v1433_v38, 1  ;;  %2808 = vrot.lane.b32.xlu1 %v1433_v38, %s4041_s16 }
 0x22c   :  { %v2647_v19 = vsel %vm279_vm0, %v7132_v14, %v2584_v52  ;;  %v2646_v25 = vsel %vm279_vm0, %v2584_v52, %v7171_v2  ;;  %v5721_v9 = vsel %vm150_vm1, %v7133_v26, %v2456_v21  ;;  %v5727_v38 = vsel %vm150_vm1, %v2456_v21, %v7172_v60  ;;  %v3333_v52 = vld [vmem:[%s7119_s3 + $0x58] sm:$0xff]  ;;  %v3332_v2 = vld [vmem:[%s7119_s3 + $0x50] sm:$0xff]  ;;  %v3331_v14 = vld [vmem:[%s7119_s3 + $0x48] sm:$0xff] }
 0x22d   :  { %3062 = vrot.lane.b32.xlu0 %v2647_v19, %s4042_s0  ;;  %3064 = vrot.lane.b32.xlu2 %v2646_v25, %s4042_s0  ;;  %v1336_v60 = vadd.f32 %v5062_v1, %v5522_v29  ;;  %v7173_v21 = vrot.slane %v5509_v50, 1  ;;  %v3327_v26 = vld [vmem:[%s7119_s3 + $0x28] sm:$0xff] }
 0x22e   :  { %3535 = vmatpush.msra.mxu1 %v3333_v52  ;;  %4006 = vmatpush.msra.mxu2 %v3333_v52 }
 0x22f   :  { %4007 = vmatpush.msrb.mxu3 %v3333_v52  ;;  %v2638_v19 = vsel %vm279_vm0, %v7173_v21, %v2593_v39  ;;  %v5754_v29 = vmax.f32 %v1336_v60, 0.0  ;;  %v3330_v52 = vld [vmem:[%s7119_s3 + $0x40] sm:$0xff]  ;;  %v1240_v21 = vadd.f32 %v5062_v1, %v5239_v48 }
 0x230   :  { %3536 = vmatpush.msra.mxu1 %v3332_v2  ;;  %4008 = vmatpush.msra.mxu2 %v3332_v2 }
 0x231   :  { %4009 = vmatpush.msrb.mxu3 %v3332_v2  ;;  %7175 = vst [vmem:[#allocation25_spill] sm:$0xff] %v5754_v29  ;;  %v3329_v2 = vld [vmem:[%s7119_s3 + $0x38] sm:$0xff]  ;;  %v2594_v48 = vrot.slane %v5754_v29, 1  ;;  %v5773_v60 = vmax.f32 %v1240_v21, 0.0 }
 0x232   :  { %v5746_v25 = vpop.f32.mrf.mxu3  ;;  %3080 = vrot.lane.b32.xlu1 %v2638_v19, %s4042_s0  ;;  %3537 = vmatpush.msra.mxu1 %v3331_v14 }
 0x233   :  { %7174 = vst [vmem:[#allocation24_spill] sm:$0xff] %v5746_v25  ;;  %4010 = vmatpush.msra.mxu2 %v3331_v14  ;;  %4011 = vmatpush.msrb.mxu3 %v3331_v14  ;;  %v2561_v14 = vrot.slane %v5752_v20, 1  ;;  %v2637_v21 = vsel %vm279_vm0, %v2593_v39, %v2594_v48  ;;  %v1243_v39 = vadd.f32 %v5062_v1, %v5279_v43 }
 0x234   :  { %3538 = vmatpush.msra.mxu1 %v3330_v52 }
 0x235   :  { %2824 = vrot.lane.b32.xlu0 %v5509_v50, %s4041_s16  ;;  %2760 = vrot.lane.b32.xlu2 %v5476_v51, %s4041_s16  ;;  %v5815_v43 = vmax.f32 %v1243_v39, 0.0 }
 0x236   :  { %4012 = vmatpush.msra.mxu2 %v3330_v52  ;;  %4013 = vmatpush.msrb.mxu3 %v3330_v52  ;;  %v7177_v52 = vrot.slane %v5476_v51, 1 }
 0x237   :  { %3539 = vmatpush.msra.mxu1 %v3329_v2 }
 0x238   :  { %4014 = vmatpush.msra.mxu2 %v3329_v2  ;;  %4015 = vmatpush.msrb.mxu3 %v3329_v2  ;;  %v2670_v25 = vsel %vm279_vm0, %v7177_v52, %v2561_v14  ;;  %v3326_v2 = vld [vmem:[%s7119_s3 + $0x20] sm:$0xff]  ;;  %v1339_v52 = vadd.f32 %v5062_v1, %v5546_v30 }
 0x239   :  { %3540 = vmatpush.msra.mxu1 %v3328_v28  ;;  %v3322_v1 = vld [vmem:[%s7119_s3] sm:$0xff] }
 0x23a   :  { %v5775_v19 = vpop.f32.mrf.mxu3  ;;  %2826 = vrot.lane.b32.xlu1 %v5702_v4, %s4041_s16  ;;  %4016 = vmatpush.msra.mxu2 %v3328_v28  ;;  %v2562_v4 = vrot.slane %v5773_v60, 1  ;;  %v5817_v30 = vmax.f32 %v1339_v52, 0.0 }
 0x23b   :  { %7176 = vst [vmem:[#allocation26_spill] sm:$0xff] %v5775_v19  ;;  %4017 = vmatpush.msrb.mxu3 %v3328_v28  ;;  %3541 = vmatpush.msra.mxu1 %v3327_v26  ;;  %v3325_v28 = vld [vmem:[%s7119_s3 + $0x18] sm:$0xff]  ;;  %v3323_v19 = vld [vmem:[%s7119_s3 + $0x8] sm:$0xff] }
 0x23c   :  { %4018 = vmatpush.msra.mxu2 %v3327_v26  ;;  %7179 = vst [vmem:[#allocation28_spill] sm:$0xff] %v5817_v30  ;;  %v2595_v39 = vrot.slane %v5817_v30, 1 }
 0x23d   :  { %3016 = vrot.lane.b32.xlu0 %v2670_v25, %s4042_s0  ;;  %3082 = vrot.lane.b32.xlu2 %v2637_v21, %s4042_s0  ;;  %v3324_v25 = vld [vmem:[%s7119_s3 + $0x10] sm:$0xff]  ;;  %v2669_v21 = vsel %vm279_vm0, %v2561_v14, %v2562_v4  ;;  %v5822_v14 = vld [vmem:[%s7118_s2] ss:$0 sm:$0xff] }
 0x23e   :  { %3542 = vmatpush.msra.mxu1 %v3326_v2  ;;  %4019 = vmatpush.msrb.mxu3 %v3327_v26 }
 0x23f   :  { %4020 = vmatpush.msra.mxu2 %v3326_v2 }
 0x240   :  { %3543 = vmatpush.msra.mxu1 %v3325_v28  ;;  %4021 = vmatpush.msrb.mxu3 %v3326_v2  ;;  %v1342_v2 = vadd.f32 %v5822_v14, %v5564_v17  ;;  %v2636_v17 = vsel %vm279_vm0, %v2594_v48, %v2595_v39 }
 0x241   :  { %4022 = vmatpush.msra.mxu2 %v3325_v28 }
 0x242   :  { %v5809_v26 = vpop.f32.mrf.mxu3  ;;  %3018 = vrot.lane.b32.xlu1 %v2669_v21, %s4042_s0  ;;  %3544 = vmatpush.msra.mxu1 %v3324_v25  ;;  %v5832_v52 = vmax.f32 %v1342_v2, 0.0  ;;  %v1345_v2 = vadd.f32 %v5822_v14, %v5578_v53 }
 0x243   :  { %7178 = vst [vmem:[#allocation27_spill] sm:$0xff] %v5809_v26  ;;  %4023 = vmatpush.msrb.mxu3 %v3325_v28  ;;  %4024 = vmatpush.msra.mxu2 %v3324_v25  ;;  %v2563_v28 = vrot.slane %v5815_v43, 1 }
 0x244   :  { %3545 = vmatpush.msra.mxu1 %v3323_v19  ;;  %7180 = vst [vmem:[#allocation29_spill] sm:$0xff] %v5832_v52  ;;  %v5856_v48 = vmax.f32 %v1345_v2, 0.0 }
 0x245   :  { %2762 = vrot.lane.b32.xlu0 %v5752_v20, %s4041_s16  ;;  %2828 = vrot.lane.b32.xlu2 %v5754_v29, %s4041_s16  ;;  %v2596_v29 = vrot.slane %v5832_v52, 1 }
 0x246   :  { %3546 = vmatpush.msra.mxu1 %v3322_v1  ;;  %4025 = vmatpush.msrb.mxu3 %v3324_v25  ;;  %v2668_v25 = vsel %vm279_vm0, %v2562_v4, %v2563_v28  ;;  %v2597_v53 = vrot.slane %v5856_v48, 1 }
 0x247   :  { %4026 = vmatpush.msra.mxu2 %v3323_v19 }
 0x248   :  { %4027 = vmatpush.msrb.mxu3 %v3323_v19  ;;  %v1246_v19 = vadd.f32 %v5822_v14, %v5321_v57 }
 0x249   :  { %4028 = vmatpush.msra.mxu2 %v3322_v1 }
 0x24a   :  { %v5834_v21 = vpop.f32.mrf.mxu3  ;;  %2764 = vrot.lane.b32.xlu1 %v5773_v60, %s4041_s16  ;;  %4029 = vmatpush.msrb.mxu3 %v3322_v1  ;;  %v2635_v1 = vsel %vm279_vm0, %v2595_v39, %v2596_v29  ;;  %v5854_v4 = vmax.f32 %v1246_v19, 0.0 }
 0x24b   :  { %7181 = vst [vmem:[#allocation30_spill] sm:$0xff] %v5834_v21 }
 0x24c   :  { %v2564_v57 = vrot.slane %v5854_v4, 1 }
 0x24d   :  { %3084 = vrot.lane.b32.xlu0 %v2636_v17, %s4042_s0  ;;  %3020 = vrot.lane.b32.xlu2 %v2668_v25, %s4042_s0  ;;  %v1527_v17 = vadd.s32 504, %v4101_v7  ;;  %v1249_v25 = vadd.f32 %v5822_v14, %v5367_v41 }
 0x24e   :  { %v2667_v41 = vsel %vm279_vm0, %v2563_v28, %v2564_v57 }
 0x24f   :  { %v1973_v39 = vand.u32 63, %v1527_v17  ;;  %v5867_v19 = vmax.f32 %v1249_v25, 0.0  ;;  %v1511_v17 = vadd.s32 376, %v4101_v7 }
 0x251   :  { %vm2359_vm11 = vcmp.lt.s32.totalorder %v1973_v39, 60  ;;  %v1348_v39 = vadd.f32 %v5822_v14, %v5589_v49  ;;  %v1861_v49 = vand.u32 63, %v1511_v17 }
 0x252   :  { %v5851_v21 = vpop.f32.mrf.mxu3  ;;  %3086 = vrot.lane.b32.xlu1 %v2635_v1, %s4042_s0 }
 0x253   :  { %7182 = vst [vmem:[#allocation31_spill] sm:$0xff] %v5851_v21  ;;  %v2634_v21 = vsel %vm279_vm0, %v2596_v29, %v2597_v53  ;;  %v1252_v29 = vadd.f32 %v5822_v14, %v5405_v6  ;;  %vm2343_vm13 = vcmp.lt.s32.totalorder %v1861_v49, 60 }
 0x255   :  { %2830 = vrot.lane.b32.xlu0 %v5817_v30, %s4041_s16  ;;  %2766 = vrot.lane.b32.xlu2 %v5815_v43, %s4041_s16  ;;  %v2565_v30 = vrot.slane %v5867_v19, 1 }
 0x25a   :  { %v1398_v2 = vpop.f32.mrf.mxu3  ;;  %2832 = vrot.lane.b32.xlu1 %v5832_v52, %s4041_s16  ;;  %v5900_v52 = vmax.f32 %v1348_v39, 0.0  ;;  %v1479_v39 = vadd.s32 120, %v4101_v7 }
 0x25b   :  { %v1399_v1 = vadd.f32 %v5822_v14, %v1398_v2  ;;  %v2424_v2 = vrot.slane %v5229_v36, 7  ;;  %v7183_v36 = vld [vmem:[#allocation2_spill] sm:$0xff] }
 0x25c   :  { %v2425_v6 = vrot.slane %v7183_v36, 7 }
 0x25d   :  { %v1464_v26 = vmax.f32 %v1399_v1, 0.0  ;;  %3022 = vrot.lane.b32.xlu0 %v2667_v41, %s4042_s0  ;;  %3088 = vrot.lane.b32.xlu2 %v2634_v21, %s4042_s0  ;;  %v2666_v1 = vsel %vm279_vm0, %v2564_v57, %v2565_v30  ;;  %v1351_v21 = vadd.f32 %v5822_v14, %v5599_v47  ;;  %v5904_v47 = vmax.f32 %v1252_v29, 0.0 }
 0x25e   :  { %v2550_v36 = vsel %vm150_vm1, %v2424_v2, %v2425_v6 }
 0x25f   :  { %v5880_v25 = vsel %vm2359_vm11, %v1464_v26, 0.0  ;;  %v2566_v17 = vrot.slane %v5904_v47, 1 }
 0x260   :  { %v7140_v28 = vrot.slane %v5880_v25, 7 }
 0x262   :  { %3024 = vrot.lane.b32.xlu1 %v2666_v1, %s4042_s0  ;;  %v2551_v26 = vsel %vm150_vm1, %v7140_v28, %v2424_v2  ;;  %v1448_v1 = vmax.f32 %v1351_v21, 0.0  ;;  %v1255_v2 = vadd.f32 %v5822_v14, %v5435_v16 }
 0x263   :  { %v3193_v41 = vsel %vm3192_vm8, %v2551_v26, %v5602_v59  ;;  %v2598_v59 = vrot.slane %v5900_v52, 1 }
 0x264   :  { %v3258_v57 = vsel %vm3257_vm9, %v3193_v41, %v5604_v42  ;;  %v3194_v42 = vsel %vm3192_vm8, %v2550_v36, %v5621_v5  ;;  %v5918_v29 = vsel %vm2343_vm13, %v1448_v1, 0.0  ;;  %v2665_v5 = vsel %vm279_vm0, %v2565_v30, %v2566_v17 }
 0x265   :  { %2768 = vrot.lane.b32.xlu0 %v5854_v4, %s4041_s16  ;;  %3937 = vmatmul.msk.f32.vlgmr.msra.gmra.mxu1 %vm3338_vm12, %v3258_v57  ;;  %v2633_v21 = vsel %vm279_vm0, %v2597_v53, %v2598_v59  ;;  %v3259_v26 = vsel %vm3257_vm9, %v3194_v42, %v5568_v32  ;;  %v2599_v49 = vrot.slane %v5918_v29, 1  ;;  %v2426_v41 = vrot.slane %v5224_v33, 7 }
 0x266   :  { %2834 = vrot.lane.b32.xlu2 %v5856_v48, %s4041_s16  ;;  %v1637_v57 = vand.u32 63, %v1479_v39  ;;  %v1416_v53 = vmax.f32 %v1255_v2, 0.0  ;;  %v1354_v32 = vadd.f32 %v5822_v14, %v5623_v10  ;;  %v2427_v33 = vrot.slane %v5333_v23, 7 }
 0x267   :  { %v2632_v16 = vsel %vm279_vm0, %v2598_v59, %v2599_v49  ;;  %v2549_v1 = vsel %vm150_vm1, %v2425_v6, %v2426_v41  ;;  %v1258_v10 = vadd.f32 %v5822_v14, %v5473_v15 }
 0x268   :  { %vm2311_vm14 = vcmp.lt.s32.totalorder %v1637_v57, 60  ;;  %v3195_v30 = vsel %vm3192_vm8, %v2549_v1, %v5580_v63  ;;  %v5951_v59 = vmax.f32 %v1354_v32, 0.0  ;;  %v5958_v63 = vpop.permute.xlu2 %3014  ;;  %v1360_v1 = vadd.f32 %v5822_v14, %v5643_v0 }
 0x269   :  { %v3260_v36 = vsel %vm3257_vm9, %v3195_v30, %v5639_v13  ;;  %v5947_v42 = vsel %vm2311_vm14, %v1416_v53, 0.0  ;;  %v2548_v13 = vsel %vm150_vm1, %v2426_v41, %v2427_v33  ;;  %v5963_v6 = vmax.f32 %v1258_v10, 0.0  ;;  %v3011_v53 = vpop.permute.xlu0 %3010 }
 0x26a   :  { %2770 = vrot.lane.b32.xlu1 %v5867_v19, %s4041_s16  ;;  %v2567_v23 = vrot.slane %v5947_v42, 1  ;;  %v2600_v15 = vrot.slane %v5951_v59, 1  ;;  %v3196_v39 = vsel %vm3192_vm8, %v2548_v13, %v5648_v18  ;;  %v2430_v10 = vrot.slane %v5450_v62, 7 }
 0x26b   :  { %v3261_v2 = vsel %vm3257_vm9, %v3196_v39, %v5656_v11  ;;  %v1261_v11 = vadd.f32 %v5822_v14, %v5511_v40  ;;  %v2429_v40 = vrot.slane %v5365_v45, 7  ;;  %v1264_v62 = vadd.f32 %v5822_v14, %v5544_v55 }
 0x26c   :  { %v2631_v41 = vsel %vm279_vm0, %v2599_v49, %v2600_v15  ;;  %v1300_v55 = vadd.f32 %v5822_v14, %v5687_v46 }
 0x26d   :  { %3090 = vrot.lane.b32.xlu0 %v2633_v21, %s4042_s0  ;;  %3938 = vmatmul.msk.f32.gmra.mxu1 %vm3338_vm12, %v3259_v26  ;;  %v2428_v21 = vrot.slane %v5363_v58, 7  ;;  %v2664_v26 = vsel %vm279_vm0, %v2566_v17, %v2567_v23  ;;  %v1357_v58 = vadd.f32 %v5822_v14, %v5630_v34 }
 0x26e   :  { %3026 = vrot.lane.b32.xlu2 %v2665_v5, %s4042_s0  ;;  %v2568_v5 = vrot.slane %v5963_v6, 1 }
 0x26f   :  { %v2547_v17 = vsel %vm150_vm1, %v2427_v33, %v2428_v21  ;;  %v5994_v32 = vmax.f32 %v1357_v58, 0.0  ;;  %v6012_v33 = vmax.f32 %v1360_v1, 0.0  ;;  %v2546_v0 = vsel %vm150_vm1, %v2428_v21, %v2429_v40 }
 0x270   :  { %v3197_v57 = vsel %vm3192_vm8, %v2547_v17, %v5660_v35  ;;  %v2663_v49 = vsel %vm279_vm0, %v2567_v23, %v2568_v5  ;;  %v3198_v45 = vsel %vm3192_vm8, %v2546_v0, %v5628_v37  ;;  %v2431_v58 = vrot.slane %v5478_v3, 7 }
 0x271   :  { %v3262_v34 = vsel %vm3257_vm9, %v3197_v57, %v5616_v24  ;;  %v2601_v30 = vrot.slane %v5994_v32, 1  ;;  %v3263_v13 = vsel %vm3257_vm9, %v3198_v45, %v3011_v53  ;;  %v2602_v39 = vrot.slane %v6012_v33, 1 }
 0x272   :  { %3092 = vrot.lane.b32.xlu1 %v2632_v16, %s4042_s0  ;;  %v5998_v16 = vmax.f32 %v1261_v11, 0.0  ;;  %v6043_v17 = vmax.f32 %v1264_v62, 0.0  ;;  %v6062_v1 = vmax.f32 %v1300_v55, 0.0  ;;  %v1372_v3 = vadd.f32 %v5822_v14, %v5685_v31 }
 0x273   :  { %v2630_v23 = vsel %vm279_vm0, %v2600_v15, %v2601_v30  ;;  %v2545_v15 = vsel %vm150_vm1, %v2429_v40, %v2430_v10 }
 0x274   :  { %v2569_v24 = vrot.slane %v5998_v16, 1  ;;  %v2570_v46 = vrot.slane %v6043_v17, 1 }
 0x275   :  { %2836 = vrot.lane.b32.xlu0 %v5900_v52, %s4041_s16  ;;  %3939 = vmatmul.msk.f32.gmra.mxu1 %vm3338_vm12, %v3260_v36  ;;  %v3013_v36 = vpop.permute.xlu1 %3012 }
 0x276   :  { %2772 = vrot.lane.b32.xlu2 %v5904_v47, %s4041_s16  ;;  %v2662_v21 = vsel %vm279_vm0, %v2568_v5, %v2569_v24  ;;  %v2629_v5 = vsel %vm279_vm0, %v2601_v30, %v2602_v39 }
 0x27a   :  { %2838 = vrot.lane.b32.xlu1 %v5918_v29, %s4041_s16 }
 0x27c   :  { %v5981_v18 = vpop.permute.xlu2 %2806 }
 0x27d   :  { %3028 = vrot.lane.b32.xlu0 %v2664_v26, %s4042_s0  ;;  %3940 = vmatmul.msk.f32.gmra.mxu1 %vm3338_vm12, %v3261_v2  ;;  %v2757_v26 = vpop.permute.xlu0 %2756  ;;  %v1363_v2 = vadd.f32 %v5822_v14, %v5658_v12  ;;  %v2759_v11 = vpop.permute.xlu1 %2758  ;;  %v1267_v12 = vadd.f32 %v5822_v14, %v5556_v27  ;;  %v2544_v27 = vsel %vm150_vm1, %v2430_v10, %v2431_v58 }
 0x27e   :  { %3094 = vrot.lane.b32.xlu2 %v2631_v41, %s4042_s0  ;;  %v3199_v41 = vsel %vm3192_vm8, %v2545_v15, %v2757_v26  ;;  %v3200_v0 = vsel %vm3192_vm8, %v2544_v27, %v2759_v11 }
 0x27f   :  { %v3264_v57 = vsel %vm3257_vm9, %v3199_v41, %v3013_v36  ;;  %v6068_v40 = vmax.f32 %v1267_v12, 0.0  ;;  %v7139_v36 = vrot.slane %v6062_v1, 7  ;;  %v1270_v41 = vadd.f32 %v5822_v14, %v5571_v54 }
 0x280   :  { %v7185_v12 = vrot.slane %v5323_v8, 7 }
 0x281   :  { %v2571_v10 = vrot.slane %v6068_v40, 1 }
 0x282   :  { %3030 = vrot.lane.b32.xlu1 %v2663_v49, %s4042_s0  ;;  %v6050_v49 = vmax.f32 %v1363_v2, 0.0 }
 0x284   :  { %v2603_v30 = vrot.slane %v6050_v49, 1 }
 0x285   :  { %2774 = vrot.lane.b32.xlu0 %v5947_v42, %s4041_s16  ;;  %3941 = vmatmul.msk.f32.gmra.mxu1 %vm3338_vm12, %v3262_v34  ;;  %v6057_v53 = vpop.permute.xlu0 %3078 }
 0x286   :  { %2840 = vrot.lane.b32.xlu2 %v5951_v59, %s4041_s16  ;;  %v2628_v26 = vsel %vm279_vm0, %v2602_v39, %v2603_v30  ;;  %v1366_v39 = vadd.f32 %v5822_v14, %v5667_v44  ;;  %v1369_v44 = vadd.f32 %v5822_v14, %v5676_v56 }
 0x287   :  { %v6008_v35 = vpop.permute.xlu2 %3064 }
 0x288   :  { %v6105_v55 = vmax.f32 %v1366_v39, 0.0 }
 0x28a   :  { %2776 = vrot.lane.b32.xlu1 %v5963_v6, %s4041_s16  ;;  %v2604_v56 = vrot.slane %v6105_v55, 1 }
 0x28d   :  { %3096 = vrot.lane.b32.xlu0 %v2630_v23, %s4042_s0  ;;  %3942 = vmatmul.msk.f32.gmra.mxu1 %vm3338_vm12, %v3263_v13  ;;  %v2661_v23 = vsel %vm279_vm0, %v2569_v24, %v2570_v46  ;;  %v3265_v13 = vsel %vm3257_vm9, %v3200_v0, %v5958_v63 }
 0x28e   :  { %3032 = vrot.lane.b32.xlu2 %v2662_v21, %s4042_s0  ;;  %v7184_v21 = vrot.slane %v5695_v22, 7 }
 0x28f   :  { %v6030_v37 = vpop.permute.xlu2 %2760 }
 0x290   :  { %v2520_v62 = vsel %vm150_vm1, %v7139_v36, %v7184_v21 }
 0x291   :  { %v3224_v63 = vsel %vm3192_vm8, %v2520_v62, %v5981_v18  ;;  %v7141_v18 = vrot.slane %v5509_v50, 7  ;;  %v2627_v62 = vsel %vm279_vm0, %v2603_v30, %v2604_v56 }
 0x292   :  { %3098 = vrot.lane.b32.xlu1 %v2629_v5, %s4042_s0  ;;  %v2660_v5 = vsel %vm279_vm0, %v2570_v46, %v2571_v10 }
 0x293   :  { %v2511_v46 = vsel %vm150_vm1, %v7185_v12, %v7141_v18 }
 0x295   :  { %2842 = vrot.lane.b32.xlu0 %v5994_v32, %s4041_s16  ;;  %3943 = vmatmul.msk.f32.gmra.mxu1 %vm3338_vm12, %v3264_v57  ;;  %v6107_v57 = vmax.f32 %v1270_v41, 0.0  ;;  %v7186_v41 = vld [vmem:[#allocation4_spill] sm:$0xff] }
 0x296   :  { %2778 = vrot.lane.b32.xlu2 %v5998_v16, %s4041_s16 }
 0x297   :  { %v6059_v34 = vpop.permute.xlu2 %3082 }
 0x29a   :  { %2844 = vrot.lane.b32.xlu1 %v6012_v33, %s4041_s16 }
 0x29c   :  { %v2809_v45 = vpop.permute.xlu1 %2808 }
 0x29d   :  { %3034 = vrot.lane.b32.xlu0 %v2661_v23, %s4042_s0  ;;  %3944 = vmatmul.msk.f32.gmra.mxu1 %vm3338_vm12, %v3265_v13  ;;  %v3225_v54 = vsel %vm3192_vm8, %v5721_v9, %v2809_v45  ;;  %v2572_v23 = vrot.slane %v6107_v57, 1  ;;  %v6130_v13 = vmax.f32 %v1369_v44, 0.0 }
 0x29e   :  { %3100 = vrot.lane.b32.xlu2 %v2628_v26, %s4042_s0  ;;  %v3290_v45 = vsel %vm3257_vm9, %v3225_v54, %v6008_v35  ;;  %v2432_v26 = vrot.slane %v5476_v51, 7  ;;  %v7188_v54 = vld [vmem:[#allocation5_spill] sm:$0xff] }
 0x29f   :  { %v3063_v24 = vpop.permute.xlu0 %3062  ;;  %v6093_v15 = vpop.permute.xlu2 %2828  ;;  %v2605_v35 = vrot.slane %v6130_v13, 1  ;;  %v1276_v12 = vadd.f32 %v5822_v14, %v7188_v54 }
 0x2a0   :  { %v3289_v2 = vsel %vm3257_vm9, %v3224_v63, %v3063_v24  ;;  %v2659_v63 = vsel %vm279_vm0, %v2571_v10, %v2572_v23  ;;  %v3226_v24 = vsel %vm3192_vm8, %v5727_v38, %v5558_v61  ;;  %v2543_v51 = vsel %vm150_vm1, %v2431_v58, %v2432_v26 }
 0x2a1   :  { %3968 = vmatmul.msk.f32.vlgmr.msra.gmra.mxu2 %vm3338_vm12, %v3289_v2  ;;  %v3201_v30 = vsel %vm3192_vm8, %v2543_v51, %v6030_v37  ;;  %v1273_v10 = vadd.f32 %v5822_v14, %v7186_v41  ;;  %v2626_v38 = vsel %vm279_vm0, %v2604_v56, %v2605_v35  ;;  %v2433_v37 = vrot.slane %v5752_v20, 7 }
 0x2a2   :  { %3036 = vrot.lane.b32.xlu1 %v2660_v5, %s4042_s0 }
 0x2a3   :  { %v6172_v58 = vmax.f32 %v1273_v10, 0.0  ;;  %v2542_v31 = vsel %vm150_vm1, %v2432_v26, %v2433_v37  ;;  %v1519_v26 = vadd.s32 440, %v4101_v7  ;;  %v7190_v10 = vld [vmem:[#allocation20_spill] sm:$0xff] }
 0x2a4   :  { %v3081_v11 = vpop.permute.xlu1 %3080 }
 0x2a5   :  { %2780 = vrot.lane.b32.xlu0 %v6043_v17, %s4041_s16  ;;  %v2573_v20 = vrot.slane %v6172_v58, 1 }
 0x2a6   :  { %2846 = vrot.lane.b32.xlu2 %v6050_v49, %s4041_s16 }
 0x2a7   :  { %v2825_v27 = vpop.permute.xlu0 %2824  ;;  %v6123_v0 = vpop.permute.xlu2 %3020 }
 0x2a8   :  { %v3233_v9 = vsel %vm3192_vm8, %v2511_v46, %v2825_v27  ;;  %v6176_v46 = vmax.f32 %v1372_v3, 0.0  ;;  %v7191_v3 = vld [vmem:[#allocation6_spill] sm:$0xff] }
 0x2a9   :  { %3969 = vmatmul.msk.f32.gmra.mxu2 %vm3338_vm12, %v3290_v45  ;;  %v6134_v8 = vsel %vm3257_vm9, %v3233_v9, %v3081_v11  ;;  %v7187_v11 = vld [vmem:[#allocation7_spill] sm:$0xff]  ;;  %v2434_v45 = vrot.slane %v5773_v60, 7  ;;  %v2658_v60 = vsel %vm279_vm0, %v2572_v23, %v2573_v20 }
 0x2aa   :  { %2782 = vrot.lane.b32.xlu1 %v6068_v40, %s4041_s16  ;;  %v3291_v61 = vsel %vm3257_vm9, %v3226_v24, %v7187_v11  ;;  %v7189_v24 = vld [vmem:[#allocation9_spill] sm:$0xff] }
 0x2ab   :  { %v2541_v11 = vsel %vm150_vm1, %v2433_v37, %v2434_v45  ;;  %v7192_v37 = vld [vmem:[#allocation11_spill] sm:$0xff] }
 0x2ac   :  { %v6139_v21 = vpop.permute.xlu1 %2826 }
 0x2ad   :  { %3102 = vrot.lane.b32.xlu0 %v2627_v62, %s4042_s0  ;;  %v6189_v62 = vmax.f32 %v1276_v12, 0.0 }
 0x2ae   :  { %3038 = vrot.lane.b32.xlu2 %v2659_v63, %s4042_s0  ;;  %v2606_v63 = vrot.slane %v6176_v46, 1 }
 0x2af   :  { %v3017_v39 = vpop.permute.xlu0 %3016  ;;  %v6157_v2 = vpop.permute.xlu2 %2766  ;;  %v2574_v41 = vrot.slane %v6189_v62, 1 }
 0x2b0   :  { %v3266_v5 = vsel %vm3257_vm9, %v3201_v30, %v3017_v39  ;;  %v1487_v30 = vadd.s32 184, %v4101_v7 }
 0x2b1   :  { %3945 = vmatmul.msk.f32.gmra.mxu1 %vm3338_vm12, %v3266_v5  ;;  %3970 = vmatmul.msk.f32.gmra.mxu2 %vm3338_vm12, %v3291_v61  ;;  %v1375_v5 = vadd.f32 %v5822_v14, %v7190_v10  ;;  %v2625_v61 = vsel %vm279_vm0, %v2605_v35, %v2606_v63  ;;  %v2657_v35 = vsel %vm279_vm0, %v2573_v20, %v2574_v41 }
 0x2b2   :  { %3104 = vrot.lane.b32.xlu1 %v2626_v38, %s4042_s0  ;;  %v1279_v38 = vadd.f32 %v5822_v14, %v7191_v3  ;;  %v1693_v23 = vand.u32 63, %v1487_v30  ;;  %v7193_v30 = vld [vmem:[#allocation21_spill] sm:$0xff]  ;;  %v2435_v3 = vrot.slane %v5815_v43, 7 }
 0x2b4   :  { %v3019_v44 = vpop.permute.xlu1 %3018  ;;  %vm2319_vm2 = vcmp.lt.s32.totalorder %v1693_v23, 60 }
 0x2b5   :  { %2848 = vrot.lane.b32.xlu0 %v6105_v55, %s4041_s16 }
 0x2b6   :  { %2784 = vrot.lane.b32.xlu2 %v6107_v57, %s4041_s16 }
 0x2b7   :  { %v2763_v27 = vpop.permute.xlu0 %2762  ;;  %v6184_v56 = vpop.permute.xlu2 %3088 }
 0x2b8   :  { %v3202_v9 = vsel %vm3192_vm8, %v2542_v31, %v2763_v27  ;;  %v1456_v27 = vmax.f32 %v1375_v5, 0.0 }
 0x2b9   :  { %3971 = vmatmul.msk.f32.gmra.mxu2 %vm3338_vm12, %v7189_v24  ;;  %v3267_v51 = vsel %vm3257_vm9, %v3202_v9, %v3019_v44  ;;  %v1917_v44 = vand.u32 63, %v1519_v26  ;;  %v1424_v24 = vmax.f32 %v1279_v38, 0.0 }
 0x2ba   :  { %2850 = vrot.lane.b32.xlu1 %v6130_v13, %s4041_s16  ;;  %3946 = vmatmul.msk.f32.gmra.mxu1 %vm3338_vm12, %v3267_v51 }
 0x2bb   :  { %vm2351_vm15 = vcmp.lt.s32.totalorder %v1917_v44, 60  ;;  %v6234_v20 = vsel %vm2319_vm2, %v1424_v24, 0.0 }
 0x2bc   :  { %v2765_v39 = vpop.permute.xlu1 %2764  ;;  %v6228_v26 = vsel %vm2351_vm15, %v1456_v27, 0.0  ;;  %v2575_v5 = vrot.slane %v6234_v20, 1  ;;  %v2540_v27 = vsel %vm150_vm1, %v2434_v45, %v2435_v3 }
 0x2bd   :  { %3040 = vrot.lane.b32.xlu0 %v2658_v60, %s4042_s0  ;;  %v3203_v54 = vsel %vm3192_vm8, %v2541_v11, %v2765_v39  ;;  %v1378_v39 = vadd.f32 %v5822_v14, %v7193_v30  ;;  %v2607_v60 = vrot.slane %v6228_v26, 1  ;;  %v3204_v43 = vsel %vm3192_vm8, %v2540_v27, %v6157_v2  ;;  %v7197_v30 = vld [vmem:[#allocation23_spill] sm:$0xff] }
 0x2be   :  { %3106 = vrot.lane.b32.xlu2 %v2625_v61, %s4042_s0  ;;  %v3268_v9 = vsel %vm3257_vm9, %v3203_v54, %v6123_v0  ;;  %v7195_v61 = vld [vmem:[#allocation14_spill] sm:$0xff]  ;;  %v2656_v23 = vsel %vm279_vm0, %v2574_v41, %v2575_v5  ;;  %v7198_v41 = vld [vmem:[#allocation16_spill] sm:$0xff]  ;;  %v2436_v2 = vrot.slane %v5854_v4, 7 }
 0x2bf   :  { %v6214_v12 = vpop.permute.xlu0 %3084  ;;  %v6242_v11 = vmax.f32 %v1378_v39, 0.0  ;;  %v2624_v44 = vsel %vm279_vm0, %v2606_v63, %v2607_v60  ;;  %v1381_v39 = vadd.f32 %v5822_v14, %v7197_v30 }
 0x2c0   :  { %v6216_v31 = vpop.permute.xlu2 %2834 }
 0x2c1   :  { %3972 = vmatmul.msk.f32.gmra.mxu2 %vm3338_vm12, %v7192_v37  ;;  %7194 = vst [vmem:[#allocation2_spill] sm:$0xff] %v6242_v11  ;;  %v2608_v54 = vrot.slane %v6242_v11, 1 }
 0x2c2   :  { %3042 = vrot.lane.b32.xlu1 %v2657_v35, %s4042_s0  ;;  %3947 = vmatmul.msk.f32.gmra.mxu1 %vm3338_vm12, %v3268_v9  ;;  %v7196_v35 = vld [vmem:[#allocation8_spill] sm:$0xff] }
 0x2c3   :  { %v1282_v9 = vadd.f32 %v5822_v14, %v7196_v35  ;;  %v2623_v45 = vsel %vm279_vm0, %v2607_v60, %v2608_v54  ;;  %v2539_v60 = vsel %vm150_vm1, %v2435_v3, %v2436_v2 }
 0x2c4   :  { %v6226_v51 = vpop.permute.xlu1 %3086 }
 0x2c5   :  { %2786 = vrot.lane.b32.xlu0 %v6172_v58, %s4041_s16 }
 0x2c6   :  { %2852 = vrot.lane.b32.xlu2 %v6176_v46, %s4041_s16 }
 0x2c7   :  { %v6238_v0 = vpop.permute.xlu0 %2830 }
 0x2c8   :  { %v3027_v10 = vpop.permute.xlu2 %3026 }
 0x2c9   :  { %3973 = vmatmul.msk.f32.gmra.mxu2 %vm3338_vm12, %v7195_v61  ;;  %v6276_v61 = vmax.f32 %v1282_v9, 0.0 }
 0x2ca   :  { %2788 = vrot.lane.b32.xlu1 %v6189_v62, %s4041_s16 }
 0x2cb   :  { %v2576_v4 = vrot.slane %v6276_v61, 1 }
 0x2cc   :  { %v6249_v38 = vpop.permute.xlu1 %2832 }
 0x2cd   :  { %3108 = vrot.lane.b32.xlu0 %v2624_v44, %s4042_s0 }
 0x2ce   :  { %3044 = vrot.lane.b32.xlu2 %v2656_v23, %s4042_s0  ;;  %v7199_v23 = vld [vmem:[#allocation10_spill] sm:$0xff] }
 0x2cf   :  { %v3023_v37 = vpop.permute.xlu0 %3022  ;;  %v1285_v27 = vadd.f32 %v5822_v14, %v7199_v23  ;;  %v2655_v23 = vsel %vm279_vm0, %v2575_v5, %v2576_v4  ;;  %v6317_v5 = vld [vmem:[%s7120_s4] ss:$0 sm:$0xff] }
 0x2d0   :  { %v6264_v63 = vpop.permute.xlu2 %2772  ;;  %v3269_v24 = vsel %vm3257_vm9, %v3204_v43, %v3023_v37  ;;  %v6280_v43 = vmax.f32 %v1381_v39, 0.0 }
 0x2d1   :  { %3948 = vmatmul.msk.f32.gmra.mxu1 %vm3338_vm12, %v3269_v24  ;;  %3974 = vmatmul.msk.f32.gmra.mxu2 %vm3338_vm12, %v7198_v41  ;;  %v2437_v24 = vrot.slane %v5867_v19, 7  ;;  %v6293_v30 = vmax.f32 %v1285_v27, 0.0  ;;  %v7201_v41 = vld [vmem:[#allocation18_spill] sm:$0xff] }
 0x2d2   :  { %3110 = vrot.lane.b32.xlu1 %v2623_v45, %s4042_s0  ;;  %7200 = vst [vmem:[#allocation4_spill] sm:$0xff] %v6280_v43  ;;  %v2609_v39 = vrot.slane %v6280_v43, 1 }
 0x2d3   :  { %v2577_v19 = vrot.slane %v6293_v30, 1  ;;  %v2538_v27 = vsel %vm150_vm1, %v2436_v2, %v2437_v24 }
 0x2d4   :  { %v3025_v44 = vpop.permute.xlu1 %3024 }
 0x2d5   :  { %2854 = vrot.lane.b32.xlu0 %v6228_v26, %s4041_s16 }
 0x2d6   :  { %2790 = vrot.lane.b32.xlu2 %v6234_v20, %s4041_s16 }
 0x2d7   :  { %v2769_v37 = vpop.permute.xlu0 %2768 }
 0x2d8   :  { %v3205_v35 = vsel %vm3192_vm8, %v2539_v60, %v2769_v37  ;;  %v6290_v9 = vpop.permute.xlu2 %3094  ;;  %v2622_v60 = vsel %vm279_vm0, %v2608_v54, %v2609_v39 }
 0x2d9   :  { %3975 = vmatmul.msk.f32.gmra.mxu2 %vm3338_vm12, %v7201_v41  ;;  %v3270_v45 = vsel %vm3257_vm9, %v3205_v35, %v3025_v44  ;;  %v7202_v35 = vld [vmem:[#allocation24_spill] sm:$0xff] }
 0x2da   :  { %2856 = vrot.lane.b32.xlu1 %v6242_v11, %s4041_s16  ;;  %3949 = vmatmul.msk.f32.gmra.mxu1 %vm3338_vm12, %v3270_v45  ;;  %v1384_v41 = vadd.f32 %v5822_v14, %v7202_v35  ;;  %v7203_v45 = vld [vmem:[#allocation12_spill] sm:$0xff] }
 0x2db   :  { %v3297_v54 = vsel %vm3257_vm9, %v7203_v45, %v6057_v53 }
 0x2dc   :  { %v2771_v3 = vpop.permute.xlu1 %2770  ;;  %v6335_v28 = vmax.f32 %v1384_v41, 0.0 }
 0x2dd   :  { %3046 = vrot.lane.b32.xlu0 %v2655_v23, %s4042_s0  ;;  %v3206_v44 = vsel %vm3192_vm8, %v2538_v27, %v2771_v3  ;;  %v7204_v23 = vld [vmem:[#allocation13_spill] sm:$0xff]  ;;  %v2654_v27 = vsel %vm279_vm0, %v2576_v4, %v2577_v19 }
 0x2de   :  { %3112 = vrot.lane.b32.xlu2 %v2622_v60, %s4042_s0  ;;  %v1288_v3 = vadd.f32 %v5822_v14, %v7204_v23  ;;  %v3271_v60 = vsel %vm3257_vm9, %v3206_v44, %v3027_v10  ;;  %v7205_v23 = vld [vmem:[#allocation26_spill] sm:$0xff]  ;;  %v2610_v44 = vrot.slane %v6335_v28, 1 }
 0x2df   :  { %v6312_v37 = vpop.permute.xlu0 %3090  ;;  %v7206_v10 = vld [vmem:[#allocation22_spill] sm:$0xff] }
 0x2e0   :  { %v6321_v2 = vpop.permute.xlu2 %2840  ;;  %v6339_v45 = vmax.f32 %v1288_v3, 0.0  ;;  %v2465_v4 = vrot.slane %v7206_v10, 7 }
 0x2e1   :  { %3976 = vmatmul.msk.f32.gmra.mxu2 %vm3338_vm12, %v3297_v54  ;;  %v1387_v54 = vadd.f32 %v5822_v14, %v7205_v23  ;;  %v7207_v23 = vrot.slane %v5509_v50, 7 }
 0x2e2   :  { %3048 = vrot.lane.b32.xlu1 %v2654_v27, %s4042_s0  ;;  %v3548_v36 = vpop.f32.mrf.mxu1  ;;  %3950 = vmatmul.msk.f32.gmra.mxu1 %vm3338_vm12, %v3271_v60  ;;  %v2438_v60 = vrot.slane %v5904_v47, 7 }
 0x2e3   :  { %v3549_v35 = vadd.f32 %v6317_v5, %v3548_v36  ;;  %v6358_v27 = vmax.f32 %v1387_v54, 0.0  ;;  %v2510_v10 = vsel %vm150_vm1, %v7207_v23, %v2465_v4  ;;  %v2621_v54 = vsel %vm279_vm0, %v2609_v39, %v2610_v44 }
 0x2e4   :  { %v6337_v53 = vpop.permute.xlu1 %3092  ;;  %v3234_v47 = vsel %vm3192_vm8, %v2510_v10, %v6139_v21  ;;  %v2537_v23 = vsel %vm150_vm1, %v2437_v24, %v2438_v60 }
 0x2e5   :  { %v3740_v18 = vmax.f32 %v3549_v35, 0.0  ;;  %2792 = vrot.lane.b32.xlu0 %v6276_v61, %s4041_s16  ;;  %v3207_v39 = vsel %vm3192_vm8, %v2537_v23, %v6264_v63  ;;  %v3299_v24 = vsel %vm3257_vm9, %v3234_v47, %v6059_v34 }
 0x2e6   :  { %2858 = vrot.lane.b32.xlu2 %v6280_v43, %s4041_s16 }
 0x2e7   :  { %3804 = vst.msk [vmem:[%s7121_s5] sm:$0xff] %vm3257_vm9, %v3740_v18  ;;  %v6351_v36 = vpop.permute.xlu0 %2836 }
 0x2e8   :  { %v6355_v41 = vpop.permute.xlu2 %3032 }
 0x2e9   :  { %3977 = vmatmul.msk.f32.gmra.mxu2 %vm3338_vm12, %v6134_v8  ;;  %v2611_v8 = vrot.slane %v6358_v27, 1 }
 0x2ea   :  { %2794 = vrot.lane.b32.xlu1 %v6293_v30, %s4041_s16  ;;  %v3551_v18 = vpop.f32.mrf.mxu1 }
 0x2eb   :  { %v3552_v35 = vadd.f32 %v6317_v5, %v3551_v18  ;;  %v7208_v18 = vrot.slane %v6339_v45, 1  ;;  %v2620_v63 = vsel %vm279_vm0, %v2610_v44, %v2611_v8 }
 0x2ec   :  { %v6370_v43 = vpop.permute.xlu1 %2838 }
 0x2ed   :  { %v3741_v3 = vmax.f32 %v3552_v35, 0.0  ;;  %3114 = vrot.lane.b32.xlu0 %v2621_v54, %s4042_s0  ;;  %v2653_v50 = vsel %vm279_vm0, %v2577_v19, %v7208_v18  ;;  %v7209_v35 = vld [vmem:[#allocation15_spill] sm:$0xff] }
 0x2ee   :  { %3050 = vrot.lane.b32.xlu2 %v2653_v50, %s4042_s0  ;;  %v1291_v10 = vadd.f32 %v5822_v14, %v7209_v35  ;;  %v7210_v18 = vld [vmem:[#allocation27_spill] sm:$0xff] }
 0x2ef   :  { %3805 = vst.msk [vmem:[%s7121_s5 + $0x8] sm:$0xff] %vm3257_vm9, %v3741_v3  ;;  %v3029_v21 = vpop.permute.xlu0 %3028  ;;  %v1390_v50 = vadd.f32 %v5822_v14, %v7210_v18  ;;  %v7211_v3 = vld [vmem:[#allocation25_spill] sm:$0xff] }
 0x2f0   :  { %v6393_v54 = vpop.permute.xlu2 %2778  ;;  %v3272_v19 = vsel %vm3257_vm9, %v3207_v39, %v3029_v21  ;;  %v2466_v23 = vrot.slane %v7211_v3, 7  ;;  %v2439_v39 = vrot.slane %v5947_v42, 7  ;;  %v6408_v34 = vmax.f32 %v1291_v10, 0.0  ;;  %v7212_v18 = vld [vmem:[#allocation17_spill] sm:$0xff]  ;;  %v7213_v3 = vld [vmem:[#allocation28_spill] sm:$0xff] }
 0x2f1   :  { %3951 = vmatmul.msk.f32.gmra.mxu1 %vm3338_vm12, %v3272_v19  ;;  %3978 = vmatmul.msk.f32.gmra.mxu2 %vm3338_vm12, %v3299_v24  ;;  %v1294_v19 = vadd.f32 %v5822_v14, %v7212_v18  ;;  %v6412_v11 = vmax.f32 %v1390_v50, 0.0 }
 0x2f2   :  { %3116 = vrot.lane.b32.xlu1 %v2620_v63, %s4042_s0  ;;  %v3554_v35 = vpop.f32.mrf.mxu1  ;;  %v2509_v44 = vsel %vm150_vm1, %v2465_v4, %v2466_v23  ;;  %v2536_v50 = vsel %vm150_vm1, %v2438_v60, %v2439_v39  ;;  %v2579_v4 = vrot.slane %v6408_v34, 1 }
 0x2f3   :  { %v3555_v21 = vadd.f32 %v6317_v5, %v3554_v35  ;;  %v3235_v10 = vsel %vm3192_vm8, %v2509_v44, %v6093_v15  ;;  %v2467_v35 = vrot.slane %v7213_v3, 7  ;;  %v6436_v44 = vmax.f32 %v1294_v19, 0.0 }
 0x2f4   :  { %v3031_v47 = vpop.permute.xlu1 %3030  ;;  %v3300_v15 = vsel %vm3257_vm9, %v3235_v10, %v6214_v12  ;;  %v2612_v42 = vrot.slane %v6412_v11, 1  ;;  %v7214_v12 = vrot.slane %v5963_v6, 7  ;;  %v7215_v3 = vrot.slane %v6339_v45, 1 }
 0x2f5   :  { %v3742_v24 = vmax.f32 %v3555_v21, 0.0  ;;  %2860 = vrot.lane.b32.xlu0 %v6335_v28, %s4041_s16 }
 0x2f6   :  { %2796 = vrot.lane.b32.xlu2 %v6339_v45, %s4041_s16  ;;  %v2535_v19 = vsel %vm150_vm1, %v2439_v39, %v7214_v12  ;;  %v7216_v12 = vld [vmem:[#allocation29_spill] sm:$0xff] }
 0x2f7   :  { %3806 = vst.msk [vmem:[%s7121_s5 + $0x10] sm:$0xff] %vm3257_vm9, %v3742_v24  ;;  %v2775_v63 = vpop.permute.xlu0 %2774 }
 0x2f8   :  { %v3208_v21 = vsel %vm3192_vm8, %v2536_v50, %v2775_v63  ;;  %v6432_v18 = vpop.permute.xlu2 %3100  ;;  %v2508_v63 = vsel %vm150_vm1, %v2466_v23, %v2467_v35  ;;  %v2619_v23 = vsel %vm279_vm0, %v2611_v8, %v2612_v42 }
 0x2f9   :  { %3979 = vmatmul.msk.f32.gmra.mxu2 %vm3338_vm12, %v3300_v15  ;;  %v3273_v60 = vsel %vm3257_vm9, %v3208_v21, %v3031_v47  ;;  %v2652_v47 = vsel %vm279_vm0, %v7215_v3, %v2579_v4  ;;  %v2580_v21 = vrot.slane %v6436_v44, 1  ;;  %v3236_v15 = vsel %vm3192_vm8, %v2508_v63, %v6238_v0  ;;  %v7217_v0 = vld [vmem:[#allocation30_spill] sm:$0xff] }
 0x2fa   :  { %2862 = vrot.lane.b32.xlu1 %v6358_v27, %s4041_s16  ;;  %v3557_v24 = vpop.f32.mrf.mxu1  ;;  %3952 = vmatmul.msk.f32.gmra.mxu1 %vm3338_vm12, %v3273_v60  ;;  %v2468_v3 = vrot.slane %v7216_v12, 7  ;;  %v3301_v8 = vsel %vm3257_vm9, %v3236_v15, %v6226_v51 }
 0x2fb   :  { %v3558_v50 = vadd.f32 %v6317_v5, %v3557_v24 }
 0x2fc   :  { %v2777_v10 = vpop.permute.xlu1 %2776  ;;  %v2507_v51 = vsel %vm150_vm1, %v2467_v35, %v2468_v3 }
 0x2fd   :  { %v3743_v60 = vmax.f32 %v3558_v50, 0.0  ;;  %3052 = vrot.lane.b32.xlu0 %v2652_v47, %s4042_s0  ;;  %v3209_v24 = vsel %vm3192_vm8, %v2535_v19, %v2777_v10  ;;  %v1393_v50 = vadd.f32 %v5822_v14, %v7217_v0  ;;  %v7218_v19 = vld [vmem:[#allocation19_spill] sm:$0xff]  ;;  %v2651_v47 = vsel %vm279_vm0, %v2579_v4, %v2580_v21 }
 0x2fe   :  { %3118 = vrot.lane.b32.xlu2 %v2619_v23, %s4042_s0  ;;  %v1297_v10 = vadd.f32 %v5822_v14, %v7218_v19  ;;  %v7219_v4 = vld [vmem:[#allocation31_spill] sm:$0xff] }
 0x2ff   :  { %3807 = vst.msk [vmem:[%s7121_s5 + $0x18] sm:$0xff] %vm3257_vm9, %v3743_v60  ;;  %v6467_v39 = vpop.permute.xlu0 %3096  ;;  %v3274_v60 = vsel %vm3257_vm9, %v3209_v24, %v6355_v41  ;;  %v6486_v0 = vmax.f32 %v1393_v50, 0.0  ;;  %v1396_v19 = vadd.f32 %v5822_v14, %v7219_v4  ;;  %v3237_v41 = vsel %vm3192_vm8, %v2507_v51, %v6249_v38 }
 0x300   :  { %v6472_v63 = vpop.permute.xlu2 %2846  ;;  %v3302_v38 = vsel %vm3257_vm9, %v3237_v41, %v6184_v56 }
 0x301   :  { %3980 = vmatmul.msk.f32.gmra.mxu2 %vm3338_vm12, %v3301_v8  ;;  %v6492_v8 = vmax.f32 %v1297_v10, 0.0  ;;  %v2613_v50 = vrot.slane %v6486_v0, 1 }
 0x302   :  { %3054 = vrot.lane.b32.xlu1 %v2651_v47, %s4042_s0  ;;  %v3560_v23 = vpop.f32.mrf.mxu1  ;;  %3953 = vmatmul.msk.f32.gmra.mxu1 %vm3338_vm12, %v3274_v60  ;;  %v6514_v47 = vmax.f32 %v1396_v19, 0.0  ;;  %v2441_v60 = vrot.slane %v5998_v16, 7 }
 0x303   :  { %v3561_v12 = vadd.f32 %v6317_v5, %v3560_v23  ;;  %v2581_v10 = vrot.slane %v6492_v8, 1  ;;  %v2469_v23 = vrot.slane %v5856_v48, 7  ;;  %v2618_v56 = vsel %vm279_vm0, %v2612_v42, %v2613_v50 }
 0x304   :  { %v6490_v15 = vpop.permute.xlu1 %3098  ;;  %v2614_v19 = vrot.slane %v6514_v47, 1 }
 0x305   :  { %v3744_v24 = vmax.f32 %v3561_v12, 0.0  ;;  %2798 = vrot.lane.b32.xlu0 %v6408_v34, %s4041_s16  ;;  %v2650_v16 = vsel %vm279_vm0, %v2580_v21, %v2581_v10  ;;  %v2506_v48 = vsel %vm150_vm1, %v2468_v3, %v2469_v23  ;;  %v2470_v3 = vrot.slane %v5900_v52, 7 }
 0x306   :  { %2864 = vrot.lane.b32.xlu2 %v6412_v11, %s4041_s16  ;;  %v3238_v42 = vsel %vm3192_vm8, %v2506_v48, %v6216_v31  ;;  %v2617_v31 = vsel %vm279_vm0, %v2613_v50, %v2614_v19  ;;  %v2442_v52 = vrot.slane %v6043_v17, 7 }
 0x307   :  { %3808 = vst.msk [vmem:[%s7121_s5 + $0x20] sm:$0xff] %vm3257_vm9, %v3744_v24  ;;  %v6506_v35 = vpop.permute.xlu0 %2842  ;;  %v7220_v24 = vrot.slane %v5963_v6, 7 }
 0x308   :  { %v6509_v14 = vpop.permute.xlu2 %3038  ;;  %v2533_v17 = vsel %vm150_vm1, %v2441_v60, %v2442_v52 }
 0x309   :  { %3981 = vmatmul.msk.f32.gmra.mxu2 %vm3338_vm12, %v3302_v38  ;;  %v2534_v38 = vsel %vm150_vm1, %v7220_v24, %v2441_v60 }
 0x30a   :  { %2800 = vrot.lane.b32.xlu1 %v6436_v44, %s4041_s16  ;;  %v3563_v12 = vpop.f32.mrf.mxu1 }
 0x30b   :  { %v3564_v51 = vadd.f32 %v6317_v5, %v3563_v12  ;;  %v3210_v12 = vsel %vm3192_vm8, %v2534_v38, %v6393_v54 }
 0x30c   :  { %v6522_v4 = vpop.permute.xlu1 %2844 }
 0x30d   :  { %v3745_v41 = vmax.f32 %v3564_v51, 0.0  ;;  %3120 = vrot.lane.b32.xlu0 %v2618_v56, %s4042_s0  ;;  %v3303_v56 = vsel %vm3257_vm9, %v3238_v42, %v6312_v37 }
 0x30e   :  { %3056 = vrot.lane.b32.xlu2 %v2650_v16, %s4042_s0  ;;  %v2505_v16 = vsel %vm150_vm1, %v2469_v23, %v2470_v3  ;;  %v2471_v23 = vrot.slane %v5918_v29, 7 }
 0x30f   :  { %3809 = vst.msk [vmem:[%s7121_s5 + $0x28] sm:$0xff] %vm3257_vm9, %v3745_v41  ;;  %v3035_v21 = vpop.permute.xlu0 %3034  ;;  %v3239_v48 = vsel %vm3192_vm8, %v2505_v16, %v6351_v36  ;;  %v2582_v36 = vrot.slane %v6062_v1, 1 }
 0x310   :  { %v6546_v6 = vpop.permute.xlu2 %2784  ;;  %v3275_v51 = vsel %vm3257_vm9, %v3210_v12, %v3035_v21  ;;  %v3304_v12 = vsel %vm3257_vm9, %v3239_v48, %v6337_v53  ;;  %v2443_v21 = vrot.slane %v6068_v40, 7  ;;  %v2615_v40 = vrot.slane %v5880_v25, 1 }
 0x311   :  { %3954 = vmatmul.msk.f32.gmra.mxu1 %vm3338_vm12, %v3275_v51  ;;  %3982 = vmatmul.msk.f32.gmra.mxu2 %vm3338_vm12, %v3303_v56  ;;  %v2504_v56 = vsel %vm150_vm1, %v2470_v3, %v2471_v23  ;;  %v2649_v53 = vsel %vm279_vm0, %v2581_v10, %v2582_v36 }
 0x312   :  { %3122 = vrot.lane.b32.xlu1 %v2617_v31, %s4042_s0  ;;  %v3566_v54 = vpop.f32.mrf.mxu1  ;;  %v2532_v16 = vsel %vm150_vm1, %v2442_v52, %v2443_v21  ;;  %v7221_v52 = vld [vmem:[#allocation3_spill] sm:$0xff] }
 0x313   :  { %v3567_v41 = vadd.f32 %v6317_v5, %v3566_v54  ;;  %v3240_v54 = vsel %vm3192_vm8, %v2504_v56, %v6370_v43  ;;  %v7222_v48 = vrot.slane %v7221_v52, 1  ;;  %v2473_v56 = vrot.slane %v5994_v32, 7 }
 0x314   :  { %v3037_v37 = vpop.permute.xlu1 %3036  ;;  %v3305_v43 = vsel %vm3257_vm9, %v3240_v54, %v6290_v9  ;;  %v2616_v9 = vsel %vm279_vm0, %v2614_v19, %v2615_v40 }
 0x315   :  { %v3746_v24 = vmax.f32 %v3567_v41, 0.0  ;;  %2866 = vrot.lane.b32.xlu0 %v6486_v0, %s4041_s16 }
 0x316   :  { %2802 = vrot.lane.b32.xlu2 %v6492_v8, %s4041_s16 }
 0x317   :  { %3810 = vst.msk [vmem:[%s7121_s5 + $0x30] sm:$0xff] %vm3257_vm9, %v3746_v24  ;;  %v2781_v50 = vpop.permute.xlu0 %2780  ;;  %v2679_v24 = vsel %vm279_vm0, %v2615_v40, %v7222_v48  ;;  %v7223_v40 = vrot.slane %v5695_v22, 1 }
 0x318   :  { %v3211_v38 = vsel %vm3192_vm8, %v2533_v17, %v2781_v50  ;;  %v6577_v42 = vpop.permute.xlu2 %3106  ;;  %v2472_v50 = vrot.slane %v5951_v59, 7 }
 0x319   :  { %3983 = vmatmul.msk.f32.gmra.mxu2 %vm3338_vm12, %v3304_v12  ;;  %v3276_v51 = vsel %vm3257_vm9, %v3211_v38, %v3037_v37 }
 0x31a   :  { %2868 = vrot.lane.b32.xlu1 %v6514_v47, %s4041_s16  ;;  %v3569_v60 = vpop.f32.mrf.mxu1  ;;  %3955 = vmatmul.msk.f32.gmra.mxu1 %vm3338_vm12, %v3276_v51 }
 0x31b   :  { %v3570_v29 = vadd.f32 %v6317_v5, %v3569_v60 }
 0x31c   :  { %v2783_v31 = vpop.permute.xlu1 %2782 }
 0x31d   :  { %v3747_v41 = vmax.f32 %v3570_v29, 0.0  ;;  %3058 = vrot.lane.b32.xlu0 %v2649_v53, %s4042_s0  ;;  %v3212_v37 = vsel %vm3192_vm8, %v2532_v16, %v2783_v31  ;;  %v2444_v31 = vrot.slane %v6107_v57, 7 }
 0x31e   :  { %2870 = vrot.lane.b32.xlu2 %v5880_v25, %s4041_s16  ;;  %v3277_v17 = vsel %vm3257_vm9, %v3212_v37, %v6509_v14  ;;  %v2503_v14 = vsel %vm150_vm1, %v2471_v23, %v2472_v50 }
 0x31f   :  { %3811 = vst.msk [vmem:[%s7121_s5 + $0x38] sm:$0xff] %vm3257_vm9, %v3747_v41  ;;  %v6605_v10 = vpop.permute.xlu0 %3102  ;;  %v3241_v59 = vsel %vm3192_vm8, %v2503_v14, %v6321_v2  ;;  %v2502_v2 = vsel %vm150_vm1, %v2472_v50, %v2473_v56  ;;  %v2531_v57 = vsel %vm150_vm1, %v2443_v21, %v2444_v31 }
 0x320   :  { %v6607_v3 = vpop.permute.xlu2 %2852  ;;  %v3306_v19 = vsel %vm3257_vm9, %v3241_v59, %v6467_v39  ;;  %v2648_v39 = vsel %vm279_vm0, %v2582_v36, %v7223_v40  ;;  %v3242_v54 = vsel %vm3192_vm8, %v2502_v2, %v6506_v35  ;;  %v3213_v37 = vsel %vm3192_vm8, %v2531_v57, %v6546_v6 }
 0x321   :  { %3984 = vmatmul.msk.f32.gmra.mxu2 %vm3338_vm12, %v3305_v43  ;;  %v2474_v36 = vrot.slane %v6012_v33, 7  ;;  %v3307_v35 = vsel %vm3257_vm9, %v3242_v54, %v6490_v15  ;;  %v2445_v6 = vrot.slane %v6172_v58, 7 }
 0x322   :  { %3126 = vrot.lane.b32.xlu1 %v2679_v24, %s4042_s0  ;;  %3956 = vmatmul.msk.f32.gmra.mxu1 %vm3338_vm12, %v3277_v17 }
 0x323   :  { %v2501_v15 = vsel %vm150_vm1, %v2473_v56, %v2474_v36  ;;  %v2530_v58 = vsel %vm150_vm1, %v2444_v31, %v2445_v6  ;;  %v2475_v31 = vrot.slane %v6050_v49, 7 }
 0x324   :  { %v6621_v38 = vpop.permute.xlu1 %3104  ;;  %v3641_v12 = vpop.f32.mrf.mxu2  ;;  %v3243_v50 = vsel %vm3192_vm8, %v2501_v15, %v6522_v4  ;;  %v2477_v15 = vrot.slane %v6130_v13, 7 }
 0x325   :  { %v3642_v51 = vadd.f32 %v6317_v5, %v3641_v12  ;;  %3124 = vrot.lane.b32.xlu0 %v2616_v9, %s4042_s0  ;;  %v3308_v56 = vsel %vm3257_vm9, %v3243_v50, %v6432_v18 }
 0x326   :  { %2804 = vrot.lane.b32.xlu2 %v6062_v1, %s4041_s16 }
 0x327   :  { %v3771_v60 = vmax.f32 %v3642_v51, 0.0  ;;  %v6635_v29 = vpop.permute.xlu0 %2848 }
 0x328   :  { %v6644_v23 = vpop.permute.xlu2 %3044 }
 0x329   :  { %3835 = vst.msk [vmem:[%s7121_s5 + $0xf8] sm:$0xff] %vm3257_vm9, %v3771_v60  ;;  %3985 = vmatmul.msk.f32.gmra.mxu2 %vm3338_vm12, %v3306_v19  ;;  %v2446_v19 = vrot.slane %v6189_v62, 7 }
 0x32c   :  { %v6650_v53 = vpop.permute.xlu1 %2850  ;;  %v3644_v32 = vpop.f32.mrf.mxu2 }
 0x32d   :  { %v3645_v41 = vadd.f32 %v6317_v5, %v3644_v32  ;;  %3060 = vrot.lane.b32.xlu0 %v2648_v39, %s4042_s0  ;;  %v2529_v32 = vsel %vm150_vm1, %v2445_v6, %v2446_v19  ;;  %v2500_v39 = vsel %vm150_vm1, %v2474_v36, %v2475_v31 }
 0x32e   :  { %v3572_v16 = vpop.f32.mrf.mxu1 }
 0x32f   :  { %v3772_v43 = vmax.f32 %v3645_v41, 0.0  ;;  %v3573_v22 = vadd.f32 %v6317_v5, %v3572_v16  ;;  %v3041_v52 = vpop.permute.xlu0 %3040  ;;  %v3244_v41 = vsel %vm3192_vm8, %v2500_v39, %v6472_v63 }
 0x330   :  { %v3278_v48 = vsel %vm3257_vm9, %v3213_v37, %v3041_v52  ;;  %v2791_v33 = vpop.permute.xlu2 %2790  ;;  %v3309_v52 = vsel %vm3257_vm9, %v3244_v41, %v6605_v10 }
 0x331   :  { %3836 = vst.msk [vmem:[%s7121_s5 + $0x100] sm:$0xff] %vm3257_vm9, %v3772_v43  ;;  %v3748_v21 = vmax.f32 %v3573_v22, 0.0  ;;  %3957 = vmatmul.msk.f32.gmra.mxu1 %vm3338_vm12, %v3278_v48  ;;  %3986 = vmatmul.msk.f32.gmra.mxu2 %vm3338_vm12, %v3307_v35  ;;  %v2476_v43 = vrot.slane %v6105_v55, 7 }
 0x333   :  { %3812 = vst.msk [vmem:[%s7121_s5 + $0x40] sm:$0xff] %vm3257_vm9, %v3748_v21  ;;  %v2499_v55 = vsel %vm150_vm1, %v2475_v31, %v2476_v43  ;;  %v2498_v50 = vsel %vm150_vm1, %v2476_v43, %v2477_v15  ;;  %v2449_v43 = vrot.slane %v6293_v30, 7 }
 0x334   :  { %v3043_v24 = vpop.permute.xlu1 %3042  ;;  %v3647_v17 = vpop.f32.mrf.mxu2  ;;  %v3245_v35 = vsel %vm3192_vm8, %v2499_v55, %v6635_v29  ;;  %v2447_v29 = vrot.slane %v6234_v20, 7 }
 0x335   :  { %v3648_v12 = vadd.f32 %v6317_v5, %v3647_v17 }
 0x337   :  { %v3773_v9 = vmax.f32 %v3648_v12, 0.0  ;;  %v2787_v51 = vpop.permute.xlu0 %2786  ;;  %v3575_v14 = vpop.f32.mrf.mxu1 }
 0x338   :  { %v3214_v59 = vsel %vm3192_vm8, %v2530_v58, %v2787_v51  ;;  %v3576_v60 = vadd.f32 %v6317_v5, %v3575_v14  ;;  %v6709_v54 = vpop.permute.xlu2 %3112  ;;  %v2528_v58 = vsel %vm150_vm1, %v2446_v19, %v2447_v29  ;;  %v2448_v19 = vrot.slane %v6276_v61, 7 }
 0x339   :  { %3837 = vst.msk [vmem:[%s7121_s5 + $0x108] sm:$0xff] %vm3257_vm9, %v3773_v9  ;;  %3987 = vmatmul.msk.f32.gmra.mxu2 %vm3338_vm12, %v3308_v56  ;;  %v3279_v4 = vsel %vm3257_vm9, %v3214_v59, %v3043_v24  ;;  %v3310_v24 = vsel %vm3257_vm9, %v3245_v35, %v6621_v38  ;;  %v3246_v38 = vsel %vm3192_vm8, %v2498_v50, %v6650_v53 }
 0x33a   :  { %v3749_v2 = vmax.f32 %v3576_v60, 0.0  ;;  %3958 = vmatmul.msk.f32.gmra.mxu1 %vm3338_vm12, %v3279_v4  ;;  %v3216_v14 = vsel %vm3192_vm8, %v2528_v58, %v2791_v33  ;;  %v3311_v4 = vsel %vm3257_vm9, %v3246_v38, %v6577_v42  ;;  %v2478_v33 = vrot.slane %v6176_v46, 7 }
 0x33b   :  { %v2527_v46 = vsel %vm150_vm1, %v2447_v29, %v2448_v19 }
 0x33c   :  { %3813 = vst.msk [vmem:[%s7121_s5 + $0x48] sm:$0xff] %vm3257_vm9, %v3749_v2  ;;  %v2789_v62 = vpop.permute.xlu1 %2788  ;;  %v3650_v18 = vpop.f32.mrf.mxu2 }
 0x33d   :  { %v3651_v40 = vadd.f32 %v6317_v5, %v3650_v18  ;;  %v3215_v49 = vsel %vm3192_vm8, %v2529_v32, %v2789_v62  ;;  %v2497_v18 = vsel %vm150_vm1, %v2477_v15, %v2478_v33  ;;  %v7224_v15 = vld [vmem:[#allocation2_spill] sm:$0xff] }
 0x33e   :  { %v3280_v63 = vsel %vm3257_vm9, %v3215_v49, %v6644_v23  ;;  %v3247_v32 = vsel %vm3192_vm8, %v2497_v18, %v6607_v3  ;;  %v2479_v49 = vrot.slane %v6228_v26, 7 }
 0x33f   :  { %v3774_v57 = vmax.f32 %v3651_v40, 0.0  ;;  %v3109_v16 = vpop.permute.xlu0 %3108  ;;  %v3578_v37 = vpop.f32.mrf.mxu1 }
 0x340   :  { %v3579_v22 = vadd.f32 %v6317_v5, %v3578_v37  ;;  %v6740_v17 = vpop.permute.xlu2 %2858  ;;  %v3312_v37 = vsel %vm3257_vm9, %v3247_v32, %v3109_v16  ;;  %v2496_v26 = vsel %vm150_vm1, %v2478_v33, %v2479_v49 }
 0x341   :  { %3838 = vst.msk [vmem:[%s7121_s5 + $0x110] sm:$0xff] %vm3257_vm9, %v3774_v57  ;;  %3988 = vmatmul.msk.f32.gmra.mxu2 %vm3338_vm12, %v3309_v52 }
 0x342   :  { %v3750_v36 = vmax.f32 %v3579_v22, 0.0  ;;  %3959 = vmatmul.msk.f32.gmra.mxu1 %vm3338_vm12, %v3280_v63  ;;  %v2526_v63 = vsel %vm150_vm1, %v2448_v19, %v2449_v43 }
 0x344   :  { %3814 = vst.msk [vmem:[%s7121_s5 + $0x50] sm:$0xff] %vm3257_vm9, %v3750_v36  ;;  %v6732_v10 = vpop.permute.xlu1 %3110  ;;  %v3653_v48 = vpop.f32.mrf.mxu2 }
 0x345   :  { %v3654_v21 = vadd.f32 %v6317_v5, %v3653_v48 }
 0x347   :  { %v3775_v23 = vmax.f32 %v3654_v21, 0.0  ;;  %v2855_v6 = vpop.permute.xlu0 %2854 }
 0x348   :  { %v3051_v31 = vpop.permute.xlu2 %3050  ;;  %v3248_v52 = vsel %vm3192_vm8, %v2496_v26, %v2855_v6 }
 0x349   :  { %3839 = vst.msk [vmem:[%s7121_s5 + $0x118] sm:$0xff] %vm3257_vm9, %v3775_v23  ;;  %3989 = vmatmul.msk.f32.gmra.mxu2 %vm3338_vm12, %v3310_v24  ;;  %v2480_v24 = vrot.slane %v7224_v15, 7  ;;  %v3313_v50 = vsel %vm3257_vm9, %v3248_v52, %v6732_v10 }
 0x34b   :  { %v2495_v38 = vsel %vm150_vm1, %v2479_v49, %v2480_v24 }
 0x34c   :  { %v6750_v12 = vpop.permute.xlu1 %2856  ;;  %v3656_v13 = vpop.f32.mrf.mxu2 }
 0x34d   :  { %v3657_v9 = vadd.f32 %v6317_v5, %v3656_v13  ;;  %v3249_v58 = vsel %vm3192_vm8, %v2495_v38, %v6750_v12 }
 0x34e   :  { %v3581_v51 = vpop.f32.mrf.mxu1 }
 0x34f   :  { %v3776_v59 = vmax.f32 %v3657_v9, 0.0  ;;  %v3582_v20 = vadd.f32 %v6317_v5, %v3581_v51  ;;  %v3047_v60 = vpop.permute.xlu0 %3046 }
 0x350   :  { %v3281_v56 = vsel %vm3257_vm9, %v3216_v14, %v3047_v60  ;;  %v2797_v55 = vpop.permute.xlu2 %2796 }
 0x351   :  { %3840 = vst.msk [vmem:[%s7121_s5 + $0x120] sm:$0xff] %vm3257_vm9, %v3776_v59  ;;  %v3751_v53 = vmax.f32 %v3582_v20, 0.0  ;;  %3960 = vmatmul.msk.f32.gmra.mxu1 %vm3338_vm12, %v3281_v56  ;;  %3990 = vmatmul.msk.f32.gmra.mxu2 %vm3338_vm12, %v3311_v4  ;;  %v3314_v20 = vsel %vm3257_vm9, %v3249_v58, %v6709_v54  ;;  %v2450_v56 = vrot.slane %v6339_v45, 7  ;;  %v7225_v4 = vld [vmem:[#allocation4_spill] sm:$0xff]  ;;  %v2484_v58 = vrot.slane %v6412_v11, 7 }
 0x353   :  { %3815 = vst.msk [vmem:[%s7121_s5 + $0x58] sm:$0xff] %vm3257_vm9, %v3751_v53  ;;  %v2481_v53 = vrot.slane %v7225_v4, 7  ;;  %v2525_v54 = vsel %vm150_vm1, %v2449_v43, %v2450_v56 }
 0x354   :  { %v3049_v42 = vpop.permute.xlu1 %3048  ;;  %v3659_v2 = vpop.f32.mrf.mxu2 }
 0x355   :  { %v3660_v62 = vadd.f32 %v6317_v5, %v3659_v2 }
 0x357   :  { %v3777_v40 = vmax.f32 %v3660_v62, 0.0  ;;  %v2793_v61 = vpop.permute.xlu0 %2792  ;;  %v3584_v39 = vpop.f32.mrf.mxu1  ;;  %v3219_v62 = vsel %vm3192_vm8, %v2525_v54, %v2797_v55 }
 0x358   :  { %v3217_v41 = vsel %vm3192_vm8, %v2527_v46, %v2793_v61  ;;  %v3585_v57 = vadd.f32 %v6317_v5, %v3584_v39  ;;  %v3119_v60 = vpop.permute.xlu2 %3118 }
 0x359   :  { %3841 = vst.msk [vmem:[%s7121_s5 + $0x128] sm:$0xff] %vm3257_vm9, %v3777_v40  ;;  %3991 = vmatmul.msk.f32.gmra.mxu2 %vm3338_vm12, %v3312_v37  ;;  %v3282_v3 = vsel %vm3257_vm9, %v3217_v41, %v3049_v42  ;;  %v2482_v40 = vrot.slane %v6335_v28, 7 }
 0x35a   :  { %v3752_v22 = vmax.f32 %v3585_v57, 0.0  ;;  %3961 = vmatmul.msk.f32.gmra.mxu1 %vm3338_vm12, %v3282_v3 }
 0x35b   :  { %v2493_v28 = vsel %vm150_vm1, %v2481_v53, %v2482_v40 }
 0x35c   :  { %3816 = vst.msk [vmem:[%s7121_s5 + $0x60] sm:$0xff] %vm3257_vm9, %v3752_v22  ;;  %v2795_v30 = vpop.permute.xlu1 %2794  ;;  %v3662_v16 = vpop.f32.mrf.mxu2 }
 0x35d   :  { %v3663_v36 = vadd.f32 %v6317_v5, %v3662_v16  ;;  %v3218_v48 = vsel %vm3192_vm8, %v2526_v63, %v2795_v30  ;;  %v2483_v30 = vrot.slane %v6358_v27, 7 }
 0x35e   :  { %v3283_v6 = vsel %vm3257_vm9, %v3218_v48, %v3051_v31  ;;  %v2494_v31 = vsel %vm150_vm1, %v2480_v24, %v2481_v53 }
 0x35f   :  { %v3778_v35 = vmax.f32 %v3663_v36, 0.0  ;;  %v3115_v21 = vpop.permute.xlu0 %3114  ;;  %v3587_v23 = vpop.f32.mrf.mxu1  ;;  %v3250_v2 = vsel %vm3192_vm8, %v2494_v31, %v6740_v17  ;;  %v2451_v17 = vrot.slane %v6408_v34, 7  ;;  %v2452_v36 = vrot.slane %v6436_v44, 7 }
 0x360   :  { %v3588_v29 = vadd.f32 %v6317_v5, %v3587_v23  ;;  %v3315_v46 = vsel %vm3257_vm9, %v3250_v2, %v3115_v21  ;;  %v2865_v49 = vpop.permute.xlu2 %2864  ;;  %v2492_v27 = vsel %vm150_vm1, %v2482_v40, %v2483_v30 }
 0x361   :  { %3842 = vst.msk [vmem:[%s7121_s5 + $0x130] sm:$0xff] %vm3257_vm9, %v3778_v35  ;;  %3992 = vmatmul.msk.f32.gmra.mxu2 %vm3338_vm12, %v3313_v50  ;;  %v2524_v22 = vsel %vm150_vm1, %v2450_v56, %v2451_v17  ;;  %v2523_v15 = vsel %vm150_vm1, %v2451_v17, %v2452_v36 }
 0x362   :  { %v3753_v13 = vmax.f32 %v3588_v29, 0.0  ;;  %3962 = vmatmul.msk.f32.gmra.mxu1 %vm3338_vm12, %v3283_v6 }
 0x364   :  { %3817 = vst.msk [vmem:[%s7121_s5 + $0x68] sm:$0xff] %vm3257_vm9, %v3753_v13  ;;  %v3117_v10 = vpop.permute.xlu1 %3116  ;;  %v3665_v9 = vpop.f32.mrf.mxu2 }
 0x365   :  { %v3666_v51 = vadd.f32 %v6317_v5, %v3665_v9 }
 0x367   :  { %v3779_v14 = vmax.f32 %v3666_v51, 0.0  ;;  %v2861_v59 = vpop.permute.xlu0 %2860 }
 0x368   :  { %v3251_v37 = vsel %vm3192_vm8, %v2493_v28, %v2861_v59  ;;  %v3057_v21 = vpop.permute.xlu2 %3056  ;;  %v7226_v28 = vrot.slane %v5880_v25, 7 }
 0x369   :  { %3843 = vst.msk [vmem:[%s7121_s5 + $0x138] sm:$0xff] %vm3257_vm9, %v3779_v14  ;;  %3993 = vmatmul.msk.f32.gmra.mxu2 %vm3338_vm12, %v3314_v20  ;;  %v3316_v63 = vsel %vm3257_vm9, %v3251_v37, %v3117_v10 }
 0x36c   :  { %v2863_v12 = vpop.permute.xlu1 %2862  ;;  %v3668_v33 = vpop.f32.mrf.mxu2 }
 0x36d   :  { %v3669_v19 = vadd.f32 %v6317_v5, %v3668_v33  ;;  %v3252_v23 = vsel %vm3192_vm8, %v2492_v27, %v2863_v12  ;;  %v2485_v12 = vrot.slane %v6486_v0, 7  ;;  %v7227_v27 = vrot.slane %v6062_v1, 7 }
 0x36e   :  { %v3590_v42 = vpop.f32.mrf.mxu1  ;;  %v3317_v10 = vsel %vm3257_vm9, %v3252_v23, %v3119_v60  ;;  %v2491_v60 = vsel %vm150_vm1, %v2483_v30, %v2484_v58 }
 0x36f   :  { %v3780_v18 = vmax.f32 %v3669_v19, 0.0  ;;  %v3591_v45 = vadd.f32 %v6317_v5, %v3590_v42  ;;  %v3053_v32 = vpop.permute.xlu0 %3052  ;;  %v3253_v56 = vsel %vm3192_vm8, %v2491_v60, %v2865_v49  ;;  %v2453_v19 = vrot.slane %v6492_v8, 7 }
 0x370   :  { %v3284_v61 = vsel %vm3257_vm9, %v3219_v62, %v3053_v32  ;;  %v2803_v4 = vpop.permute.xlu2 %2802  ;;  %v2490_v31 = vsel %vm150_vm1, %v2484_v58, %v2485_v12 }
 0x371   :  { %3844 = vst.msk [vmem:[%s7121_s5 + $0x140] sm:$0xff] %vm3257_vm9, %v3780_v18  ;;  %v3754_v39 = vmax.f32 %v3591_v45, 0.0  ;;  %3963 = vmatmul.msk.f32.gmra.mxu1 %vm3338_vm12, %v3284_v61  ;;  %3994 = vmatmul.msk.f32.gmra.mxu2 %vm3338_vm12, %v3315_v46  ;;  %v2522_v62 = vsel %vm150_vm1, %v2452_v36, %v2453_v19 }
 0x372   :  { %v3222_v45 = vsel %vm3192_vm8, %v2522_v62, %v2803_v4 }
 0x373   :  { %3818 = vst.msk [vmem:[%s7121_s5 + $0x70] sm:$0xff] %vm3257_vm9, %v3754_v39  ;;  %v2486_v39 = vrot.slane %v6514_v47, 7 }
 0x374   :  { %v3055_v41 = vpop.permute.xlu1 %3054  ;;  %v3671_v57 = vpop.f32.mrf.mxu2 }
 0x375   :  { %v3672_v43 = vadd.f32 %v6317_v5, %v3671_v57 }
 0x377   :  { %v3781_v3 = vmax.f32 %v3672_v43, 0.0  ;;  %v2799_v34 = vpop.permute.xlu0 %2798  ;;  %v3593_v26 = vpop.f32.mrf.mxu1 }
 0x378   :  { %v3220_v16 = vsel %vm3192_vm8, %v2524_v22, %v2799_v34  ;;  %v3594_v52 = vadd.f32 %v6317_v5, %v3593_v26  ;;  %v2871_v17 = vpop.permute.xlu2 %2870  ;;  %v2489_v22 = vsel %vm150_vm1, %v2485_v12, %v2486_v39 }
 0x379   :  { %3845 = vst.msk [vmem:[%s7121_s5 + $0x148] sm:$0xff] %vm3257_vm9, %v3781_v3  ;;  %3995 = vmatmul.msk.f32.gmra.mxu2 %vm3338_vm12, %v3316_v63  ;;  %v3285_v55 = vsel %vm3257_vm9, %v3220_v16, %v3055_v41  ;;  %v2488_v41 = vsel %vm150_vm1, %v2486_v39, %v7226_v28 }
 0x37a   :  { %v3755_v48 = vmax.f32 %v3594_v52, 0.0  ;;  %3964 = vmatmul.msk.f32.gmra.mxu1 %vm3338_vm12, %v3285_v55  ;;  %v3256_v47 = vsel %vm3192_vm8, %v2488_v41, %v2871_v17 }
 0x37c   :  { %3819 = vst.msk [vmem:[%s7121_s5 + $0x78] sm:$0xff] %vm3257_vm9, %v3755_v48  ;;  %v2801_v44 = vpop.permute.xlu1 %2800  ;;  %v3674_v35 = vpop.f32.mrf.mxu2 }
 0x37d   :  { %v3675_v24 = vadd.f32 %v6317_v5, %v3674_v35  ;;  %v3221_v29 = vsel %vm3192_vm8, %v2523_v15, %v2801_v44  ;;  %v2521_v44 = vsel %vm150_vm1, %v2453_v19, %v7227_v27  ;;  %v7000_v19 = vld [vmem:[%s7120_s4] ss:$0 sm:$0xff] }
 0x37e   :  { %v3286_v9 = vsel %vm3257_vm9, %v3221_v29, %v3057_v21 }
 0x37f   :  { %v3782_v50 = vmax.f32 %v3675_v24, 0.0  ;;  %v3121_v6 = vpop.permute.xlu0 %3120  ;;  %v3596_v13 = vpop.f32.mrf.mxu1 }
 0x380   :  { %v3597_v38 = vadd.f32 %v6317_v5, %v3596_v13  ;;  %v3318_v33 = vsel %vm3257_vm9, %v3253_v56, %v3121_v6  ;;  %v2805_v36 = vpop.permute.xlu2 %2804 }
 0x381   :  { %3846 = vst.msk [vmem:[%s7121_s5 + $0x150] sm:$0xff] %vm3257_vm9, %v3782_v50  ;;  %3996 = vmatmul.msk.f32.gmra.mxu2 %vm3338_vm12, %v3317_v10  ;;  %v3223_v35 = vsel %vm3192_vm8, %v2521_v44, %v2805_v36 }
 0x382   :  { %v3756_v51 = vmax.f32 %v3597_v38, 0.0  ;;  %3965 = vmatmul.msk.f32.gmra.mxu1 %vm3338_vm12, %v3286_v9 }
 0x384   :  { %3820 = vst.msk [vmem:[%s7121_s5 + $0x80] sm:$0xff] %vm3257_vm9, %v3756_v51  ;;  %v3123_v14 = vpop.permute.xlu1 %3122  ;;  %v3677_v59 = vpop.f32.mrf.mxu2 }
 0x385   :  { %v3678_v20 = vadd.f32 %v6317_v5, %v3677_v59 }
 0x387   :  { %v3783_v53 = vmax.f32 %v3678_v20, 0.0  ;;  %v2867_v11 = vpop.permute.xlu0 %2866 }
 0x388   :  { %v3254_v2 = vsel %vm3192_vm8, %v2490_v31, %v2867_v11 }
 0x389   :  { %3847 = vst.msk [vmem:[%s7121_s5 + $0x158] sm:$0xff] %vm3257_vm9, %v3783_v53  ;;  %3997 = vmatmul.msk.f32.gmra.mxu2 %vm3338_vm12, %v3318_v33  ;;  %v3319_v61 = vsel %vm3257_vm9, %v3254_v2, %v3123_v14 }
 0x38c   :  { %v2869_v54 = vpop.permute.xlu1 %2868  ;;  %v3680_v42 = vpop.f32.mrf.mxu2 }
 0x38d   :  { %v3681_v0 = vadd.f32 %v6317_v5, %v3680_v42  ;;  %v3255_v25 = vsel %vm3192_vm8, %v2489_v22, %v2869_v54 }
 0x38e   :  { %v3599_v18 = vpop.f32.mrf.mxu1 }
 0x38f   :  { %v3784_v32 = vmax.f32 %v3681_v0, 0.0  ;;  %v3600_v40 = vadd.f32 %v6317_v5, %v3599_v18  ;;  %v3059_v46 = vpop.permute.xlu0 %3058 }
 0x390   :  { %v3287_v8 = vsel %vm3257_vm9, %v3222_v45, %v3059_v46 }
 0x391   :  { %3848 = vst.msk [vmem:[%s7121_s5 + $0x160] sm:$0xff] %vm3257_vm9, %v3784_v32  ;;  %v3757_v49 = vmax.f32 %v3600_v40, 0.0  ;;  %3966 = vmatmul.msk.f32.gmra.mxu1 %vm3338_vm12, %v3287_v8  ;;  %3998 = vmatmul.msk.f32.gmra.mxu2 %vm3338_vm12, %v3319_v61 }
 0x393   :  { %3821 = vst.msk [vmem:[%s7121_s5 + $0x88] sm:$0xff] %vm3257_vm9, %v3757_v49 }
 0x394   :  { %v3127_v57 = vpop.permute.xlu1 %3126  ;;  %v3683_v37 = vpop.f32.mrf.mxu2 }
 0x395   :  { %v3321_v43 = vsel %vm3257_vm9, %v3256_v47, %v3127_v57  ;;  %v3684_v3 = vadd.f32 %v6317_v5, %v3683_v37 }
 0x396   :  { %4000 = vmatmul.msk.f32.vlgmr.msrb.gmra.mxu3 %vm3338_vm12, %v3321_v43 }
 0x397   :  { %v3785_v34 = vmax.f32 %v3684_v3, 0.0  ;;  %v3125_v26 = vpop.permute.xlu0 %3124  ;;  %v3602_v30 = vpop.f32.mrf.mxu1 }
 0x398   :  { %v3320_v16 = vsel %vm3257_vm9, %v3255_v25, %v3125_v26  ;;  %v3603_v52 = vadd.f32 %v6317_v5, %v3602_v30 }
 0x399   :  { %3849 = vst.msk [vmem:[%s7121_s5 + $0x168] sm:$0xff] %vm3257_vm9, %v3785_v34  ;;  %3999 = vmatmul.msk.f32.gmra.mxu2 %vm3338_vm12, %v3320_v16 }
 0x39a   :  { %v3758_v63 = vmax.f32 %v3603_v52, 0.0 }
 0x39c   :  { %3822 = vst.msk [vmem:[%s7121_s5 + $0x90] sm:$0xff] %vm3257_vm9, %v3758_v63  ;;  %v3686_v55 = vpop.f32.mrf.mxu2 }
 0x39d   :  { %v3687_v48 = vadd.f32 %v6317_v5, %v3686_v55 }
 0x39f   :  { %v3786_v21 = vmax.f32 %v3687_v48, 0.0  ;;  %v3061_v23 = vpop.permute.xlu0 %3060  ;;  %v3605_v15 = vpop.f32.mrf.mxu1 }
 0x3a0   :  { %v3288_v24 = vsel %vm3257_vm9, %v3223_v35, %v3061_v23  ;;  %v3606_v29 = vadd.f32 %v6317_v5, %v3605_v15 }
 0x3a1   :  { %3850 = vst.msk [vmem:[%s7121_s5 + $0x170] sm:$0xff] %vm3257_vm9, %v3786_v21  ;;  %3967 = vmatmul.msk.f32.gmra.mxu1 %vm3338_vm12, %v3288_v24 }
 0x3a2   :  { %v3759_v1 = vmax.f32 %v3606_v29, 0.0 }
 0x3a4   :  { %3823 = vst.msk [vmem:[%s7121_s5 + $0x98] sm:$0xff] %vm3257_vm9, %v3759_v1  ;;  %v3689_v7 = vpop.f32.mrf.mxu2 }
 0x3a5   :  { %v3690_v50 = vadd.f32 %v6317_v5, %v3689_v7 }
 0x3a7   :  { %v3787_v6 = vmax.f32 %v3690_v50, 0.0 }
 0x3a9   :  { %3851 = vst.msk [vmem:[%s7121_s5 + $0x178] sm:$0xff] %vm3257_vm9, %v3787_v6 }
 0x3ac   :  { %v3692_v13 = vpop.f32.mrf.mxu2 }
 0x3ad   :  { %v3693_v38 = vadd.f32 %v6317_v5, %v3692_v13 }
 0x3ae   :  { %v3608_v10 = vpop.f32.mrf.mxu1 }
 0x3af   :  { %v3788_v9 = vmax.f32 %v3693_v38, 0.0  ;;  %v3609_v58 = vadd.f32 %v6317_v5, %v3608_v10 }
 0x3b1   :  { %3852 = vst.msk [vmem:[%s7121_s5 + $0x180] sm:$0xff] %vm3257_vm9, %v3788_v9  ;;  %v3760_v51 = vmax.f32 %v3609_v58, 0.0 }
 0x3b3   :  { %3824 = vst.msk [vmem:[%s7121_s5 + $0xa0] sm:$0xff] %vm3257_vm9, %v3760_v51 }
 0x3b4   :  { %v3695_v14 = vpop.f32.mrf.mxu2 }
 0x3b5   :  { %v3696_v59 = vadd.f32 %v6317_v5, %v3695_v14 }
 0x3b7   :  { %v3789_v20 = vmax.f32 %v3696_v59, 0.0  ;;  %v3611_v60 = vpop.f32.mrf.mxu1 }
 0x3b8   :  { %v3612_v56 = vadd.f32 %v6317_v5, %v3611_v60 }
 0x3b9   :  { %3853 = vst.msk [vmem:[%s7121_s5 + $0x188] sm:$0xff] %vm3257_vm9, %v3789_v20 }
 0x3ba   :  { %v3761_v4 = vmax.f32 %v3612_v56, 0.0 }
 0x3bc   :  { %3825 = vst.msk [vmem:[%s7121_s5 + $0xa8] sm:$0xff] %vm3257_vm9, %v3761_v4  ;;  %v3698_v53 = vpop.f32.mrf.mxu2 }
 0x3bd   :  { %v3699_v11 = vadd.f32 %v6317_v5, %v3698_v53 }
 0x3bf   :  { %v3790_v12 = vmax.f32 %v3699_v11, 0.0  ;;  %v3614_v33 = vpop.f32.mrf.mxu1 }
 0x3c0   :  { %v3615_v31 = vadd.f32 %v7000_v19, %v3614_v33 }
 0x3c1   :  { %3854 = vst.msk [vmem:[%s7121_s5 + $0x190] sm:$0xff] %vm3257_vm9, %v3790_v12 }
 0x3c2   :  { %v3762_v54 = vmax.f32 %v3615_v31, 0.0 }
 0x3c4   :  { %3826 = vst.msk [vmem:[%s7121_s5 + $0xb0] sm:$0xff] %vm3257_vm9, %v3762_v54  ;;  %v3701_v5 = vpop.f32.mrf.mxu2 }
 0x3c5   :  { %v3702_v42 = vadd.f32 %v7000_v19, %v3701_v5 }
 0x3c7   :  { %v3791_v2 = vmax.f32 %v3702_v42, 0.0 }
 0x3c9   :  { %3855 = vst.msk [vmem:[%s7121_s5 + $0x198] sm:$0xff] %vm3257_vm9, %v3791_v2 }
 0x3cc   :  { %v3704_v0 = vpop.f32.mrf.mxu2 }
 0x3cd   :  { %v3705_v62 = vadd.f32 %v7000_v19, %v3704_v0 }
 0x3ce   :  { %v3617_v18 = vpop.f32.mrf.mxu1 }
 0x3cf   :  { %v3792_v45 = vmax.f32 %v3705_v62, 0.0  ;;  %v3618_v32 = vadd.f32 %v7000_v19, %v3617_v18 }
 0x3d1   :  { %3856 = vst.msk [vmem:[%s7121_s5 + $0x1a0] sm:$0xff] %vm3257_vm9, %v3792_v45  ;;  %v3763_v40 = vmax.f32 %v3618_v32, 0.0 }
 0x3d3   :  { %3827 = vst.msk [vmem:[%s7121_s5 + $0xb8] sm:$0xff] %vm3257_vm9, %v3763_v40 }
 0x3d4   :  { %v3707_v46 = vpop.f32.mrf.mxu2 }
 0x3d5   :  { %v3708_v8 = vadd.f32 %v7000_v19, %v3707_v46 }
 0x3d7   :  { %v3793_v61 = vmax.f32 %v3708_v8, 0.0  ;;  %v3620_v39 = vpop.f32.mrf.mxu1 }
 0x3d8   :  { %v3621_v17 = vadd.f32 %v7000_v19, %v3620_v39 }
 0x3d9   :  { %3857 = vst.msk [vmem:[%s7121_s5 + $0x1a8] sm:$0xff] %vm3257_vm9, %v3793_v61 }
 0x3da   :  { %v3764_v49 = vmax.f32 %v3621_v17, 0.0 }
 0x3dc   :  { %3828 = vst.msk [vmem:[%s7121_s5 + $0xc0] sm:$0xff] %vm3257_vm9, %v3764_v49  ;;  %v3710_v28 = vpop.f32.mrf.mxu2 }
 0x3dd   :  { %v3711_v41 = vadd.f32 %v7000_v19, %v3710_v28 }
 0x3df   :  { %v3794_v47 = vmax.f32 %v3711_v41, 0.0  ;;  %v3623_v57 = vpop.f32.mrf.mxu1 }
 0x3e0   :  { %v3624_v37 = vadd.f32 %v7000_v19, %v3623_v57 }
 0x3e1   :  { %3858 = vst.msk [vmem:[%s7121_s5 + $0x1b0] sm:$0xff] %vm3257_vm9, %v3794_v47 }
 0x3e2   :  { %v3765_v43 = vmax.f32 %v3624_v37, 0.0 }
 0x3e4   :  { %3829 = vst.msk [vmem:[%s7121_s5 + $0xc8] sm:$0xff] %vm3257_vm9, %v3765_v43  ;;  %v3713_v3 = vpop.f32.mrf.mxu2 }
 0x3e5   :  { %v3714_v22 = vadd.f32 %v7000_v19, %v3713_v3 }
 0x3e7   :  { %v3795_v25 = vmax.f32 %v3714_v22, 0.0 }
 0x3e9   :  { %3859 = vst.msk [vmem:[%s7121_s5 + $0x1b8] sm:$0xff] %vm3257_vm9, %v3795_v25 }
 0x3ec   :  { %v3716_v34 = vpop.f32.mrf.mxu2 }
 0x3ed   :  { %v3717_v26 = vadd.f32 %v7000_v19, %v3716_v34 }
 0x3ee   :  { %v3626_v30 = vpop.f32.mrf.mxu1 }
 0x3ef   :  { %v3796_v16 = vmax.f32 %v3717_v26, 0.0  ;;  %v3627_v52 = vadd.f32 %v7000_v19, %v3626_v30 }
 0x3f1   :  { %3860 = vst.msk [vmem:[%s7121_s5 + $0x1c0] sm:$0xff] %vm3257_vm9, %v3796_v16  ;;  %v3766_v63 = vmax.f32 %v3627_v52, 0.0 }
 0x3f3   :  { %3830 = vst.msk [vmem:[%s7121_s5 + $0xd0] sm:$0xff] %vm3257_vm9, %v3766_v63 }
 0x3f4   :  { %v3719_v36 = vpop.f32.mrf.mxu2 }
 0x3f5   :  { %v3720_v55 = vadd.f32 %v7000_v19, %v3719_v36 }
 0x3f7   :  { %v3797_v48 = vmax.f32 %v3720_v55, 0.0  ;;  %v3629_v27 = vpop.f32.mrf.mxu1 }
 0x3f8   :  { %v3630_v44 = vadd.f32 %v7000_v19, %v3629_v27 }
 0x3f9   :  { %3861 = vst.msk [vmem:[%s7121_s5 + $0x1c8] sm:$0xff] %vm3257_vm9, %v3797_v48 }
 0x3fa   :  { %v3767_v35 = vmax.f32 %v3630_v44, 0.0 }
 0x3fc   :  { %3831 = vst.msk [vmem:[%s7121_s5 + $0xd8] sm:$0xff] %vm3257_vm9, %v3767_v35  ;;  %v3722_v21 = vpop.f32.mrf.mxu2 }
 0x3fd   :  { %v3723_v23 = vadd.f32 %v7000_v19, %v3722_v21 }
 0x3ff   :  { %v3798_v15 = vmax.f32 %v3723_v23, 0.0  ;;  %v3632_v24 = vpop.f32.mrf.mxu1 }
 0x400   :  { %v3633_v29 = vadd.f32 %v7000_v19, %v3632_v24 }
 0x401   :  { %3862 = vst.msk [vmem:[%s7121_s5 + $0x1d0] sm:$0xff] %vm3257_vm9, %v3798_v15 }
 0x402   :  { %v3768_v1 = vmax.f32 %v3633_v29, 0.0 }
 0x404   :  { %3832 = vst.msk [vmem:[%s7121_s5 + $0xe0] sm:$0xff] %vm3257_vm9, %v3768_v1  ;;  %v3725_v7 = vpop.f32.mrf.mxu2 }
 0x405   :  { %v3726_v50 = vadd.f32 %v7000_v19, %v3725_v7 }
 0x407   :  { %v3799_v6 = vmax.f32 %v3726_v50, 0.0 }
 0x409   :  { %3863 = vst.msk [vmem:[%s7121_s5 + $0x1d8] sm:$0xff] %vm3257_vm9, %v3799_v6 }
 0x40c   :  { %v3728_v13 = vpop.f32.mrf.mxu2 }
 0x40d   :  { %v3729_v38 = vadd.f32 %v7000_v19, %v3728_v13 }
 0x40e   :  { %v3635_v10 = vpop.f32.mrf.mxu1 }
 0x40f   :  { %v3800_v9 = vmax.f32 %v3729_v38, 0.0  ;;  %v3636_v58 = vadd.f32 %v7000_v19, %v3635_v10 }
 0x411   :  { %3864 = vst.msk [vmem:[%s7121_s5 + $0x1e0] sm:$0xff] %vm3257_vm9, %v3800_v9  ;;  %v3769_v51 = vmax.f32 %v3636_v58, 0.0 }
 0x413   :  { %3833 = vst.msk [vmem:[%s7121_s5 + $0xe8] sm:$0xff] %vm3257_vm9, %v3769_v51 }
 0x414   :  { %v3731_v14 = vpop.f32.mrf.mxu2 }
 0x415   :  { %v3732_v59 = vadd.f32 %v7000_v19, %v3731_v14 }
 0x417   :  { %v3801_v20 = vmax.f32 %v3732_v59, 0.0 }
 0x419   :  { %3865 = vst.msk [vmem:[%s7121_s5 + $0x1e8] sm:$0xff] %vm3257_vm9, %v3801_v20  ;;  %v3737_v60 = vpop.f32.mrf.mxu3 }
 0x41a   :  { %v3738_v56 = vadd.f32 %v7000_v19, %v3737_v60 }
 0x41c   :  { %v3803_v4 = vmax.f32 %v3738_v56, 0.0  ;;  %v3734_v53 = vpop.f32.mrf.mxu2 }
 0x41d   :  { %v3735_v11 = vadd.f32 %v7000_v19, %v3734_v53 }
 0x41e   :  { %3867 = vst.msk [vmem:[%s7121_s5 + $0x1f8] sm:$0xff] %vm3257_vm9, %v3803_v4  ;;  %v3638_v12 = vpop.f32.mrf.mxu1 }
 0x41f   :  { %v3802_v33 = vmax.f32 %v3735_v11, 0.0  ;;  %v3639_v31 = vadd.f32 %v7000_v19, %v3638_v12 }
 0x421   :  { %3866 = vst.msk [vmem:[%s7121_s5 + $0x1f0] sm:$0xff] %vm3257_vm9, %v3802_v33  ;;  %v3770_v54 = vmax.f32 %v3639_v31, 0.0 }
 0x423   :  { %3834 = vst.msk [vmem:[%s7121_s5 + $0xf0] sm:$0xff] %vm3257_vm9, %v3770_v54 }

</bundles_post_ra>
